<compile_context>
chip_gen: v7x
topology: tpu7x:2x2x1
jax: 0.10.0
libtpu: 0.0.40
codegen_flags: <defaults>
</compile_context>

<pallas_src>
import functools

import jax
import jax.numpy as jnp
from jax.experimental import pallas as pl
from jax.experimental.pallas import tpu as pltpu


# ----------------------------------------------------------------------------
# Fused forward kernel: conv1 -> relu -> pool -> conv2 -> relu -> pool -> fc1
#                       -> relu -> fc2, for one image per grid step.
# ----------------------------------------------------------------------------
def _fused_forward_kernel(x_ref, w1_ref, b1_ref, w2_ref, b2_ref,
                          wf1_ref, bf1_ref, wf2_ref, bf2_ref, o_ref,
                          *, hw, cin):
    f32 = jnp.float32
    bf16 = jnp.bfloat16
    H = W = hw
    H2, W2 = H // 2, W // 2          # spatial size after pool1
    F = H // 4                        # spatial size after pool2
    LP = 128                          # lane-dense padded channel / feature width

    x = x_ref[0]                      # [H+2, W+2, cin] f32, spatially zero-padded

    # ---- conv1 (3x3, pad=1) + bias + ReLU: 9 accumulated MXU matmuls ----------
    acc1 = jnp.broadcast_to(b1_ref[...], (H * W, LP)).astype(f32)
    for dy in range(3):
        for dx in range(3):
            xs = x[dy:dy + H, dx:dx + W, :].reshape(H * W, cin).astype(bf16)
            acc1 = acc1 + jnp.dot(xs, w1_ref[dy * 3 + dx],
                                  preferred_element_type=f32)
    y1 = jnp.maximum(acc1, 0.0)                              # [H*W, 128]

    # ---- maxpool1 2x2 (stride 2), built directly as the zero-padded conv2 input
    y1 = y1.reshape(H, W, LP)
    y1h = jnp.max(y1.reshape(H2, 2, W, LP), axis=1)          # pool row pairs
    zc = jnp.zeros((H2, 1, LP), f32)
    cols = [zc]
    for wo in range(W2):
        cols.append(jnp.max(y1h[:, 2 * wo:2 * wo + 2, :], axis=1, keepdims=True))
    cols.append(zc)
    p1 = jnp.concatenate(cols, axis=1)                       # [H2, W2+2, 128]
    zr = jnp.zeros((1, W2 + 2, LP), f32)
    p1 = jnp.concatenate([zr, p1, zr], axis=0)               # [H2+2, W2+2, 128]

    # ---- conv2 (3x3, pad=1) + bias + ReLU --------------------------------------
    acc2 = jnp.broadcast_to(b2_ref[...], (H2 * W2, LP)).astype(f32)
    for dy in range(3):
        for dx in range(3):
            xs = p1[dy:dy + H2, dx:dx + W2, :].reshape(H2 * W2, LP).astype(bf16)
            acc2 = acc2 + jnp.dot(xs, w2_ref[dy * 3 + dx],
                                  preferred_element_type=f32)
    y2 = jnp.maximum(acc2, 0.0)                              # [H2*W2, 128]

    # ---- maxpool2 2x2 fused with fc1 (torch flatten folded into wf1 row order) -
    y2 = y2.reshape(H2, W2, LP)
    y2h = jnp.max(y2.reshape(F, 2, W2, LP), axis=1)          # [F, W2, 128]
    accf = jnp.broadcast_to(bf1_ref[...], (8, LP)).astype(f32)   # replicated rows
    for wo in range(F):
        c = jnp.max(y2h[:, 2 * wo:2 * wo + 2, :], axis=1, keepdims=True)  # [F,1,128]
        for ho in range(F):
            row = jnp.broadcast_to(c[ho], (8, LP)).astype(bf16)           # [8,128]
            accf = accf + jnp.dot(row, wf1_ref[ho * F + wo],
                                  preferred_element_type=f32)
    h1 = jnp.maximum(accf, 0.0).astype(bf16)                 # [8,128] (rows identical)

    # ---- fc2 -> logits: lane-dense (8,128) store; real classes live in [:, :ncls]
    logits = jnp.dot(h1, wf2_ref[...], preferred_element_type=f32) + bf2_ref[...]
    o_ref[0] = logits.astype(o_ref.dtype)


# ----------------------------------------------------------------------------
# Wrapper: parameter re-layout (done once per call, tiny) + single pallas_call
# ----------------------------------------------------------------------------
def _pad_axis(a, axis, new_size):
    if a.shape[axis] == new_size:
        return a
    pad = [(0, 0)] * a.ndim
    pad[axis] = (0, new_size - a.shape[axis])
    return jnp.pad(a, pad)


def policy_model_forward(params, x_nchw):
    """Logits of PolicyModel(SimpleCNN).forward(x); x is NCHW like PyTorch."""
    conv1_w, conv1_b = params["conv1_w"], params["conv1_b"]
    conv2_w, conv2_b = params["conv2_w"], params["conv2_b"]
    fc1_w, fc1_b = params["fc1_w"], params["fc1_b"]
    fc2_w, fc2_b = params["fc2_w"], params["fc2_b"]

    N, cin, H, W = x_nchw.shape
    c1, c2 = conv1_w.shape[0], conv2_w.shape[0]
    hid, ncls = fc2_w.shape
    F = H // 4
    LP = 128
    assert H == W and H % 16 == 0, "spatial size must be a multiple of 16"
    assert max(c1, c2, hid, ncls) <= LP and conv1_w.shape[2:] == (3, 3)
    assert fc1_w.shape[0] == c2 * F * F

    # Input: NCHW -> NHWC + 1-pixel spatial zero pad (conv 'same' padding).
    x = jnp.transpose(x_nchw, (0, 2, 3, 1)).astype(jnp.float32)
    xp = jnp.pad(x, ((0, 0), (1, 1), (1, 1), (0, 0)))               # [N, H+2, W+2, cin]

    # Conv weights -> per-tap matrices with lane-dense (128) output channels.
    # (kh, kw, cin) tap ordering; nn.Conv2d is cross-correlation (no flip).
    w1 = jnp.transpose(conv1_w, (2, 3, 1, 0)).reshape(9, cin, c1)
    w1 = _pad_axis(w1, 2, LP).astype(jnp.bfloat16)                   # [9, cin, 128]
    w2 = jnp.transpose(conv2_w, (2, 3, 1, 0)).reshape(9, c1, c2)
    w2 = _pad_axis(_pad_axis(w2, 1, LP), 2, LP).astype(jnp.bfloat16)  # [9, 128, 128]
    b1 = _pad_axis(conv1_b, 0, LP).reshape(1, LP).astype(jnp.float32)
    b2 = _pad_axis(conv2_b, 0, LP).reshape(1, LP).astype(jnp.float32)

    # fc1: fold torch's NCHW flatten (row = c*F*F + h*F + w) into the weight
    # layout the kernel consumes (spatial block s = h*F + w, channel on lanes).
    wf1 = fc1_w.reshape(c2, F, F, hid)
    wf1 = jnp.transpose(wf1, (1, 2, 0, 3)).reshape(F * F, c2, hid)
    wf1 = _pad_axis(_pad_axis(wf1, 1, LP), 2, LP).astype(jnp.bfloat16)  # [F*F,128,128]
    bf1 = _pad_axis(fc1_b, 0, LP).reshape(1, LP).astype(jnp.float32)
    wf2 = _pad_axis(_pad_axis(fc2_w, 0, LP), 1, LP).astype(jnp.bfloat16)  # [128,128]
    bf2 = _pad_axis(fc2_b, 0, LP).reshape(1, LP).astype(jnp.float32)

    kernel = functools.partial(_fused_forward_kernel, hw=H, cin=cin)

    flops = 2 * N * (H * W * 9 * cin * LP                     # conv1
                     + (H // 2) * (W // 2) * 9 * LP * LP      # conv2
                     + 8 * LP * LP * (F * F + 1))             # fc1 + fc2
    bytes_accessed = (xp.size * 4 + N * 8 * LP * 4
                      + 2 * (w1.size + w2.size + wf1.size + wf2.size)
                      + 4 * (b1.size + b2.size + bf1.size + bf2.size))

    out = pl.pallas_call(
        kernel,
        out_shape=jax.ShapeDtypeStruct((N, 8, LP), jnp.float32),
        grid=(N,),
        in_specs=[
            pl.BlockSpec((1, H + 2, W + 2, cin), lambda n: (n, 0, 0, 0)),
            pl.BlockSpec((9, cin, LP), lambda n: (0, 0, 0)),
            pl.BlockSpec((1, LP), lambda n: (0, 0)),
            pl.BlockSpec((9, LP, LP), lambda n: (0, 0, 0)),
            pl.BlockSpec((1, LP), lambda n: (0, 0)),
            pl.BlockSpec((F * F, LP, LP), lambda n: (0, 0, 0)),
            pl.BlockSpec((1, LP), lambda n: (0, 0)),
            pl.BlockSpec((LP, LP), lambda n: (0, 0)),
            pl.BlockSpec((1, LP), lambda n: (0, 0)),
        ],
        out_specs=pl.BlockSpec((1, 8, LP), lambda n: (n, 0, 0)),
        compiler_params=pltpu.CompilerParams(
            dimension_semantics=("parallel",)),
        cost_estimate=pl.CostEstimate(flops=flops, transcendentals=0,
                                      bytes_accessed=bytes_accessed),
    )(xp, w1, b1, w2, b2, wf1, bf1, wf2, bf2)

    return out[:, 0, :ncls]


def policy_model_action_probs(params, x_nchw):
    """PolicyModel.get_action_probs: softmax over the last dim of the logits."""
    logits = policy_model_forward(params, x_nchw)
    return jax.nn.softmax(logits, axis=-1)       # trivial 2-wide op, plain JAX


# ----------------------------------------------------------------------------
# Deterministic synthetic parameters (PyTorch layouts: conv [O,I,kH,kW]; fc [in,out])
# ----------------------------------------------------------------------------
def init_params(key, cin=3, c1=8, c2=16, hw=16, hid=32, num_classes=2):
    ks = jax.random.split(key, 8)
    f = hw // 4

    def nrm(k, shape, scale):
        return scale * jax.random.normal(k, shape, jnp.float32)

    return {
        "conv1_w": nrm(ks[0], (c1, cin, 3, 3), 0.10),
        "conv1_b": nrm(ks[1], (c1,), 0.01),
        "conv2_w": nrm(ks[2], (c2, c1, 3, 3), 0.10),
        "conv2_b": nrm(ks[3], (c2,), 0.01),
        "fc1_w":   nrm(ks[4], (c2 * f * f, hid), 0.05),
        "fc1_b":   nrm(ks[5], (hid,), 0.01),
        "fc2_w":   nrm(ks[6], (hid, num_classes), 0.05),
        "fc2_b":   nrm(ks[7], (num_classes,), 0.01),
    }


if __name__ == "__main__":
    key = jax.random.PRNGKey(0)
    pkey, xkey = jax.random.split(key)

    params = init_params(pkey, cin=3, c1=8, c2=16, hw=16, hid=32, num_classes=2)
    x = jax.random.normal(xkey, (2, 3, 16, 16), jnp.float32)   # NCHW, like PyTorch

    logits = jax.block_until_ready(jax.jit(policy_model_forward)(params, x))
    assert logits.shape == (2, 2), logits.shape
    assert bool(jnp.all(jnp.isfinite(logits)))

    probs = jax.block_until_ready(jax.jit(policy_model_action_probs)(params, x))
    assert probs.shape == (2, 2)
    assert bool(jnp.allclose(jnp.sum(probs, axis=-1), 1.0, atol=1e-5))

    print("KERNEL_OK")
</pallas_src>

<mosaic_0001>
module attributes {stable_mosaic.version = 11 : i64} {
  func.func @_fused_forward_kernel(%arg0: i32, %arg1: memref<1x18x18x3xf32, #tpu.memory_space<vmem>>, %arg2: memref<9x3x128xbf16, #tpu.memory_space<vmem>>, %arg3: memref<1x128xf32, #tpu.memory_space<vmem>>, %arg4: memref<9x128x128xbf16, #tpu.memory_space<vmem>>, %arg5: memref<1x128xf32, #tpu.memory_space<vmem>>, %arg6: memref<16x128x128xbf16, #tpu.memory_space<vmem>>, %arg7: memref<1x128xf32, #tpu.memory_space<vmem>>, %arg8: memref<128x128xbf16, #tpu.memory_space<vmem>>, %arg9: memref<1x128xf32, #tpu.memory_space<vmem>>, %arg10: memref<1x8x128xf32, #tpu.memory_space<vmem>>) attributes {dimension_semantics = [#tpu.dimension_semantics<parallel>], iteration_bounds = array<i64: 2>, scalar_prefetch = 0 : i64, scratch_operands = 0 : i64, tpu.core_type = #tpu.core_type<tc>, window_params = [{transform_indices = @transform_0, window_bounds = array<i64: 1, 18, 18, 3>}, {pipeline_mode = #tpu.pipeline_mode<synchronous>, transform_indices = @transform_1, window_bounds = array<i64: 9, 3, 128>}, {pipeline_mode = #tpu.pipeline_mode<synchronous>, transform_indices = @transform_2, window_bounds = array<i64: 1, 128>}, {pipeline_mode = #tpu.pipeline_mode<synchronous>, transform_indices = @transform_3, window_bounds = array<i64: 9, 128, 128>}, {pipeline_mode = #tpu.pipeline_mode<synchronous>, transform_indices = @transform_4, window_bounds = array<i64: 1, 128>}, {pipeline_mode = #tpu.pipeline_mode<synchronous>, transform_indices = @transform_5, window_bounds = array<i64: 16, 128, 128>}, {pipeline_mode = #tpu.pipeline_mode<synchronous>, transform_indices = @transform_6, window_bounds = array<i64: 1, 128>}, {pipeline_mode = #tpu.pipeline_mode<synchronous>, transform_indices = @transform_7, window_bounds = array<i64: 128, 128>}, {pipeline_mode = #tpu.pipeline_mode<synchronous>, transform_indices = @transform_8, window_bounds = array<i64: 1, 128>}, {transform_indices = @transform_9, window_bounds = array<i64: 1, 8, 128>}]} {
    %c0 = arith.constant 0 : index
    %c0_0 = arith.constant 0 : index
    %c0_1 = arith.constant 0 : index
    %c0_2 = arith.constant 0 : index
    %0 = vector.load %arg1[%c0, %c0_0, %c0_1, %c0_2] : memref<1x18x18x3xf32, #tpu.memory_space<vmem>>, vector<1x18x18x3xf32>
    %1 = vector.shape_cast %0 : vector<1x18x18x3xf32> to vector<18x18x3xf32>
    %c0_3 = arith.constant 0 : index
    %c0_4 = arith.constant 0 : index
    %2 = vector.load %arg3[%c0_3, %c0_4] : memref<1x128xf32, #tpu.memory_space<vmem>>, vector<1x128xf32>
    %3 = vector.shape_cast %2 : vector<1x128xf32> to vector<1x128xf32>
    %4 = vector.broadcast %3 : vector<1x128xf32> to vector<256x128xf32>
    %5 = vector.extract_strided_slice %1 {offsets = [0, 0, 0], sizes = [16, 16, 3], strides = [1, 1, 1]} : vector<18x18x3xf32> to vector<16x16x3xf32>
    %6 = vector.shape_cast %5 : vector<16x16x3xf32> to vector<256x3xf32>
    %7 = arith.truncf %6 : vector<256x3xf32> to vector<256x3xbf16>
    %c0_5 = arith.constant 0 : index
    %c0_6 = arith.constant 0 : index
    %c0_7 = arith.constant 0 : index
    %8 = vector.load %arg2[%c0_5, %c0_6, %c0_7] : memref<9x3x128xbf16, #tpu.memory_space<vmem>>, vector<1x3x128xbf16>
    %9 = vector.shape_cast %8 : vector<1x3x128xbf16> to vector<3x128xbf16>
    %cst = arith.constant dense<0.000000e+00> : vector<256x128xf32>
    %10 = tpu.matmul %7, %9, %cst {dimension_numbers = #tpu.dot_dimension_numbers<[1], [0], [0], [1], [0, 0, 1, 1], [], []>} : vector<256x3xbf16>, vector<3x128xbf16>, vector<256x128xf32> -> vector<256x128xf32>
    %11 = arith.addf %4, %10 : vector<256x128xf32>
    %12 = vector.extract_strided_slice %1 {offsets = [0, 1, 0], sizes = [16, 16, 3], strides = [1, 1, 1]} : vector<18x18x3xf32> to vector<16x16x3xf32>
    %13 = vector.shape_cast %12 : vector<16x16x3xf32> to vector<256x3xf32>
    %14 = arith.truncf %13 : vector<256x3xf32> to vector<256x3xbf16>
    %c1 = arith.constant 1 : index
    %c0_8 = arith.constant 0 : index
    %c0_9 = arith.constant 0 : index
    %15 = vector.load %arg2[%c1, %c0_8, %c0_9] : memref<9x3x128xbf16, #tpu.memory_space<vmem>>, vector<1x3x128xbf16>
    %16 = vector.shape_cast %15 : vector<1x3x128xbf16> to vector<3x128xbf16>
    %cst_10 = arith.constant dense<0.000000e+00> : vector<256x128xf32>
    %17 = tpu.matmul %14, %16, %cst_10 {dimension_numbers = #tpu.dot_dimension_numbers<[1], [0], [0], [1], [0, 0, 1, 1], [], []>} : vector<256x3xbf16>, vector<3x128xbf16>, vector<256x128xf32> -> vector<256x128xf32>
    %18 = arith.addf %11, %17 : vector<256x128xf32>
    %19 = vector.extract_strided_slice %1 {offsets = [0, 2, 0], sizes = [16, 16, 3], strides = [1, 1, 1]} : vector<18x18x3xf32> to vector<16x16x3xf32>
    %20 = vector.shape_cast %19 : vector<16x16x3xf32> to vector<256x3xf32>
    %21 = arith.truncf %20 : vector<256x3xf32> to vector<256x3xbf16>
    %c2 = arith.constant 2 : index
    %c0_11 = arith.constant 0 : index
    %c0_12 = arith.constant 0 : index
    %22 = vector.load %arg2[%c2, %c0_11, %c0_12] : memref<9x3x128xbf16, #tpu.memory_space<vmem>>, vector<1x3x128xbf16>
    %23 = vector.shape_cast %22 : vector<1x3x128xbf16> to vector<3x128xbf16>
    %cst_13 = arith.constant dense<0.000000e+00> : vector<256x128xf32>
    %24 = tpu.matmul %21, %23, %cst_13 {dimension_numbers = #tpu.dot_dimension_numbers<[1], [0], [0], [1], [0, 0, 1, 1], [], []>} : vector<256x3xbf16>, vector<3x128xbf16>, vector<256x128xf32> -> vector<256x128xf32>
    %25 = arith.addf %18, %24 : vector<256x128xf32>
    %26 = vector.extract_strided_slice %1 {offsets = [1, 0, 0], sizes = [16, 16, 3], strides = [1, 1, 1]} : vector<18x18x3xf32> to vector<16x16x3xf32>
    %27 = vector.shape_cast %26 : vector<16x16x3xf32> to vector<256x3xf32>
    %28 = arith.truncf %27 : vector<256x3xf32> to vector<256x3xbf16>
    %c3 = arith.constant 3 : index
    %c0_14 = arith.constant 0 : index
    %c0_15 = arith.constant 0 : index
    %29 = vector.load %arg2[%c3, %c0_14, %c0_15] : memref<9x3x128xbf16, #tpu.memory_space<vmem>>, vector<1x3x128xbf16>
    %30 = vector.shape_cast %29 : vector<1x3x128xbf16> to vector<3x128xbf16>
    %cst_16 = arith.constant dense<0.000000e+00> : vector<256x128xf32>
    %31 = tpu.matmul %28, %30, %cst_16 {dimension_numbers = #tpu.dot_dimension_numbers<[1], [0], [0], [1], [0, 0, 1, 1], [], []>} : vector<256x3xbf16>, vector<3x128xbf16>, vector<256x128xf32> -> vector<256x128xf32>
    %32 = arith.addf %25, %31 : vector<256x128xf32>
    %33 = vector.extract_strided_slice %1 {offsets = [1, 1, 0], sizes = [16, 16, 3], strides = [1, 1, 1]} : vector<18x18x3xf32> to vector<16x16x3xf32>
    %34 = vector.shape_cast %33 : vector<16x16x3xf32> to vector<256x3xf32>
    %35 = arith.truncf %34 : vector<256x3xf32> to vector<256x3xbf16>
    %c4 = arith.constant 4 : index
    %c0_17 = arith.constant 0 : index
    %c0_18 = arith.constant 0 : index
    %36 = vector.load %arg2[%c4, %c0_17, %c0_18] : memref<9x3x128xbf16, #tpu.memory_space<vmem>>, vector<1x3x128xbf16>
    %37 = vector.shape_cast %36 : vector<1x3x128xbf16> to vector<3x128xbf16>
    %cst_19 = arith.constant dense<0.000000e+00> : vector<256x128xf32>
    %38 = tpu.matmul %35, %37, %cst_19 {dimension_numbers = #tpu.dot_dimension_numbers<[1], [0], [0], [1], [0, 0, 1, 1], [], []>} : vector<256x3xbf16>, vector<3x128xbf16>, vector<256x128xf32> -> vector<256x128xf32>
    %39 = arith.addf %32, %38 : vector<256x128xf32>
    %40 = vector.extract_strided_slice %1 {offsets = [1, 2, 0], sizes = [16, 16, 3], strides = [1, 1, 1]} : vector<18x18x3xf32> to vector<16x16x3xf32>
    %41 = vector.shape_cast %40 : vector<16x16x3xf32> to vector<256x3xf32>
    %42 = arith.truncf %41 : vector<256x3xf32> to vector<256x3xbf16>
    %c5 = arith.constant 5 : index
    %c0_20 = arith.constant 0 : index
    %c0_21 = arith.constant 0 : index
    %43 = vector.load %arg2[%c5, %c0_20, %c0_21] : memref<9x3x128xbf16, #tpu.memory_space<vmem>>, vector<1x3x128xbf16>
    %44 = vector.shape_cast %43 : vector<1x3x128xbf16> to vector<3x128xbf16>
    %cst_22 = arith.constant dense<0.000000e+00> : vector<256x128xf32>
    %45 = tpu.matmul %42, %44, %cst_22 {dimension_numbers = #tpu.dot_dimension_numbers<[1], [0], [0], [1], [0, 0, 1, 1], [], []>} : vector<256x3xbf16>, vector<3x128xbf16>, vector<256x128xf32> -> vector<256x128xf32>
    %46 = arith.addf %39, %45 : vector<256x128xf32>
    %47 = vector.extract_strided_slice %1 {offsets = [2, 0, 0], sizes = [16, 16, 3], strides = [1, 1, 1]} : vector<18x18x3xf32> to vector<16x16x3xf32>
    %48 = vector.shape_cast %47 : vector<16x16x3xf32> to vector<256x3xf32>
    %49 = arith.truncf %48 : vector<256x3xf32> to vector<256x3xbf16>
    %c6 = arith.constant 6 : index
    %c0_23 = arith.constant 0 : index
    %c0_24 = arith.constant 0 : index
    %50 = vector.load %arg2[%c6, %c0_23, %c0_24] : memref<9x3x128xbf16, #tpu.memory_space<vmem>>, vector<1x3x128xbf16>
    %51 = vector.shape_cast %50 : vector<1x3x128xbf16> to vector<3x128xbf16>
    %cst_25 = arith.constant dense<0.000000e+00> : vector<256x128xf32>
    %52 = tpu.matmul %49, %51, %cst_25 {dimension_numbers = #tpu.dot_dimension_numbers<[1], [0], [0], [1], [0, 0, 1, 1], [], []>} : vector<256x3xbf16>, vector<3x128xbf16>, vector<256x128xf32> -> vector<256x128xf32>
    %53 = arith.addf %46, %52 : vector<256x128xf32>
    %54 = vector.extract_strided_slice %1 {offsets = [2, 1, 0], sizes = [16, 16, 3], strides = [1, 1, 1]} : vector<18x18x3xf32> to vector<16x16x3xf32>
    %55 = vector.shape_cast %54 : vector<16x16x3xf32> to vector<256x3xf32>
    %56 = arith.truncf %55 : vector<256x3xf32> to vector<256x3xbf16>
    %c7 = arith.constant 7 : index
    %c0_26 = arith.constant 0 : index
    %c0_27 = arith.constant 0 : index
    %57 = vector.load %arg2[%c7, %c0_26, %c0_27] : memref<9x3x128xbf16, #tpu.memory_space<vmem>>, vector<1x3x128xbf16>
    %58 = vector.shape_cast %57 : vector<1x3x128xbf16> to vector<3x128xbf16>
    %cst_28 = arith.constant dense<0.000000e+00> : vector<256x128xf32>
    %59 = tpu.matmul %56, %58, %cst_28 {dimension_numbers = #tpu.dot_dimension_numbers<[1], [0], [0], [1], [0, 0, 1, 1], [], []>} : vector<256x3xbf16>, vector<3x128xbf16>, vector<256x128xf32> -> vector<256x128xf32>
    %60 = arith.addf %53, %59 : vector<256x128xf32>
    %61 = vector.extract_strided_slice %1 {offsets = [2, 2, 0], sizes = [16, 16, 3], strides = [1, 1, 1]} : vector<18x18x3xf32> to vector<16x16x3xf32>
    %62 = vector.shape_cast %61 : vector<16x16x3xf32> to vector<256x3xf32>
    %63 = arith.truncf %62 : vector<256x3xf32> to vector<256x3xbf16>
    %c8 = arith.constant 8 : index
    %c0_29 = arith.constant 0 : index
    %c0_30 = arith.constant 0 : index
    %64 = vector.load %arg2[%c8, %c0_29, %c0_30] : memref<9x3x128xbf16, #tpu.memory_space<vmem>>, vector<1x3x128xbf16>
    %65 = vector.shape_cast %64 : vector<1x3x128xbf16> to vector<3x128xbf16>
    %cst_31 = arith.constant dense<0.000000e+00> : vector<256x128xf32>
    %66 = tpu.matmul %63, %65, %cst_31 {dimension_numbers = #tpu.dot_dimension_numbers<[1], [0], [0], [1], [0, 0, 1, 1], [], []>} : vector<256x3xbf16>, vector<3x128xbf16>, vector<256x128xf32> -> vector<256x128xf32>
    %67 = arith.addf %60, %66 : vector<256x128xf32>
    %cst_32 = arith.constant 0.000000e+00 : f32
    %68 = vector.broadcast %cst_32 : f32 to vector<256x128xf32>
    %69 = arith.maximumf %67, %68 : vector<256x128xf32>
    %70 = vector.shape_cast %69 : vector<256x128xf32> to vector<16x16x128xf32>
    %71 = vector.shape_cast %70 : vector<16x16x128xf32> to vector<8x2x16x128xf32>
    %cst_33 = arith.constant dense<0xFF800000> : vector<8x16x128xf32>
    %72 = vector.multi_reduction <maximumf>, %71, %cst_33 [1] : vector<8x2x16x128xf32> to vector<8x16x128xf32>
    %cst_34 = arith.constant 0.000000e+00 : f32
    %73 = vector.broadcast %cst_34 : f32 to vector<8x1x128xf32>
    %74 = vector.extract_strided_slice %72 {offsets = [0, 0, 0], sizes = [8, 2, 128], strides = [1, 1, 1]} : vector<8x16x128xf32> to vector<8x2x128xf32>
    %cst_35 = arith.constant dense<0xFF800000> : vector<8x128xf32>
    %75 = vector.multi_reduction <maximumf>, %74, %cst_35 [1] : vector<8x2x128xf32> to vector<8x128xf32>
    %76 = vector.shape_cast %75 : vector<8x128xf32> to vector<8x1x128xf32>
    %77 = vector.extract_strided_slice %72 {offsets = [0, 2, 0], sizes = [8, 2, 128], strides = [1, 1, 1]} : vector<8x16x128xf32> to vector<8x2x128xf32>
    %cst_36 = arith.constant dense<0xFF800000> : vector<8x128xf32>
    %78 = vector.multi_reduction <maximumf>, %77, %cst_36 [1] : vector<8x2x128xf32> to vector<8x128xf32>
    %79 = vector.shape_cast %78 : vector<8x128xf32> to vector<8x1x128xf32>
    %80 = vector.extract_strided_slice %72 {offsets = [0, 4, 0], sizes = [8, 2, 128], strides = [1, 1, 1]} : vector<8x16x128xf32> to vector<8x2x128xf32>
    %cst_37 = arith.constant dense<0xFF800000> : vector<8x128xf32>
    %81 = vector.multi_reduction <maximumf>, %80, %cst_37 [1] : vector<8x2x128xf32> to vector<8x128xf32>
    %82 = vector.shape_cast %81 : vector<8x128xf32> to vector<8x1x128xf32>
    %83 = vector.extract_strided_slice %72 {offsets = [0, 6, 0], sizes = [8, 2, 128], strides = [1, 1, 1]} : vector<8x16x128xf32> to vector<8x2x128xf32>
    %cst_38 = arith.constant dense<0xFF800000> : vector<8x128xf32>
    %84 = vector.multi_reduction <maximumf>, %83, %cst_38 [1] : vector<8x2x128xf32> to vector<8x128xf32>
    %85 = vector.shape_cast %84 : vector<8x128xf32> to vector<8x1x128xf32>
    %86 = vector.extract_strided_slice %72 {offsets = [0, 8, 0], sizes = [8, 2, 128], strides = [1, 1, 1]} : vector<8x16x128xf32> to vector<8x2x128xf32>
    %cst_39 = arith.constant dense<0xFF800000> : vector<8x128xf32>
    %87 = vector.multi_reduction <maximumf>, %86, %cst_39 [1] : vector<8x2x128xf32> to vector<8x128xf32>
    %88 = vector.shape_cast %87 : vector<8x128xf32> to vector<8x1x128xf32>
    %89 = vector.extract_strided_slice %72 {offsets = [0, 10, 0], sizes = [8, 2, 128], strides = [1, 1, 1]} : vector<8x16x128xf32> to vector<8x2x128xf32>
    %cst_40 = arith.constant dense<0xFF800000> : vector<8x128xf32>
    %90 = vector.multi_reduction <maximumf>, %89, %cst_40 [1] : vector<8x2x128xf32> to vector<8x128xf32>
    %91 = vector.shape_cast %90 : vector<8x128xf32> to vector<8x1x128xf32>
    %92 = vector.extract_strided_slice %72 {offsets = [0, 12, 0], sizes = [8, 2, 128], strides = [1, 1, 1]} : vector<8x16x128xf32> to vector<8x2x128xf32>
    %cst_41 = arith.constant dense<0xFF800000> : vector<8x128xf32>
    %93 = vector.multi_reduction <maximumf>, %92, %cst_41 [1] : vector<8x2x128xf32> to vector<8x128xf32>
    %94 = vector.shape_cast %93 : vector<8x128xf32> to vector<8x1x128xf32>
    %95 = vector.extract_strided_slice %72 {offsets = [0, 14, 0], sizes = [8, 2, 128], strides = [1, 1, 1]} : vector<8x16x128xf32> to vector<8x2x128xf32>
    %cst_42 = arith.constant dense<0xFF800000> : vector<8x128xf32>
    %96 = vector.multi_reduction <maximumf>, %95, %cst_42 [1] : vector<8x2x128xf32> to vector<8x128xf32>
    %97 = vector.shape_cast %96 : vector<8x128xf32> to vector<8x1x128xf32>
    %98 = tpu.concatenate %73, %76, %79, %82, %85, %88, %91, %94, %97, %73 in 1 : vector<8x1x128xf32>, vector<8x1x128xf32>, vector<8x1x128xf32>, vector<8x1x128xf32>, vector<8x1x128xf32>, vector<8x1x128xf32>, vector<8x1x128xf32>, vector<8x1x128xf32>, vector<8x1x128xf32>, vector<8x1x128xf32> -> vector<8x10x128xf32>
    %cst_43 = arith.constant 0.000000e+00 : f32
    %99 = vector.broadcast %cst_43 : f32 to vector<1x10x128xf32>
    %100 = tpu.concatenate %99, %98, %99 in 0 : vector<1x10x128xf32>, vector<8x10x128xf32>, vector<1x10x128xf32> -> vector<10x10x128xf32>
    %c0_44 = arith.constant 0 : index
    %c0_45 = arith.constant 0 : index
    %101 = vector.load %arg5[%c0_44, %c0_45] : memref<1x128xf32, #tpu.memory_space<vmem>>, vector<1x128xf32>
    %102 = vector.shape_cast %101 : vector<1x128xf32> to vector<1x128xf32>
    %103 = vector.broadcast %102 : vector<1x128xf32> to vector<64x128xf32>
    %104 = vector.extract_strided_slice %100 {offsets = [0, 0, 0], sizes = [8, 8, 128], strides = [1, 1, 1]} : vector<10x10x128xf32> to vector<8x8x128xf32>
    %105 = vector.shape_cast %104 : vector<8x8x128xf32> to vector<64x128xf32>
    %106 = arith.truncf %105 : vector<64x128xf32> to vector<64x128xbf16>
    %c0_46 = arith.constant 0 : index
    %c0_47 = arith.constant 0 : index
    %c0_48 = arith.constant 0 : index
    %107 = vector.load %arg4[%c0_46, %c0_47, %c0_48] : memref<9x128x128xbf16, #tpu.memory_space<vmem>>, vector<1x128x128xbf16>
    %108 = vector.shape_cast %107 : vector<1x128x128xbf16> to vector<128x128xbf16>
    %cst_49 = arith.constant dense<0.000000e+00> : vector<64x128xf32>
    %109 = tpu.matmul %106, %108, %cst_49 {dimension_numbers = #tpu.dot_dimension_numbers<[1], [0], [0], [1], [0, 0, 1, 1], [], []>} : vector<64x128xbf16>, vector<128x128xbf16>, vector<64x128xf32> -> vector<64x128xf32>
    %110 = arith.addf %103, %109 : vector<64x128xf32>
    %111 = vector.extract_strided_slice %100 {offsets = [0, 1, 0], sizes = [8, 8, 128], strides = [1, 1, 1]} : vector<10x10x128xf32> to vector<8x8x128xf32>
    %112 = vector.shape_cast %111 : vector<8x8x128xf32> to vector<64x128xf32>
    %113 = arith.truncf %112 : vector<64x128xf32> to vector<64x128xbf16>
    %c1_50 = arith.constant 1 : index
    %c0_51 = arith.constant 0 : index
    %c0_52 = arith.constant 0 : index
    %114 = vector.load %arg4[%c1_50, %c0_51, %c0_52] : memref<9x128x128xbf16, #tpu.memory_space<vmem>>, vector<1x128x128xbf16>
    %115 = vector.shape_cast %114 : vector<1x128x128xbf16> to vector<128x128xbf16>
    %cst_53 = arith.constant dense<0.000000e+00> : vector<64x128xf32>
    %116 = tpu.matmul %113, %115, %cst_53 {dimension_numbers = #tpu.dot_dimension_numbers<[1], [0], [0], [1], [0, 0, 1, 1], [], []>} : vector<64x128xbf16>, vector<128x128xbf16>, vector<64x128xf32> -> vector<64x128xf32>
    %117 = arith.addf %110, %116 : vector<64x128xf32>
    %118 = vector.extract_strided_slice %100 {offsets = [0, 2, 0], sizes = [8, 8, 128], strides = [1, 1, 1]} : vector<10x10x128xf32> to vector<8x8x128xf32>
    %119 = vector.shape_cast %118 : vector<8x8x128xf32> to vector<64x128xf32>
    %120 = arith.truncf %119 : vector<64x128xf32> to vector<64x128xbf16>
    %c2_54 = arith.constant 2 : index
    %c0_55 = arith.constant 0 : index
    %c0_56 = arith.constant 0 : index
    %121 = vector.load %arg4[%c2_54, %c0_55, %c0_56] : memref<9x128x128xbf16, #tpu.memory_space<vmem>>, vector<1x128x128xbf16>
    %122 = vector.shape_cast %121 : vector<1x128x128xbf16> to vector<128x128xbf16>
    %cst_57 = arith.constant dense<0.000000e+00> : vector<64x128xf32>
    %123 = tpu.matmul %120, %122, %cst_57 {dimension_numbers = #tpu.dot_dimension_numbers<[1], [0], [0], [1], [0, 0, 1, 1], [], []>} : vector<64x128xbf16>, vector<128x128xbf16>, vector<64x128xf32> -> vector<64x128xf32>
    %124 = arith.addf %117, %123 : vector<64x128xf32>
    %125 = vector.extract_strided_slice %100 {offsets = [1, 0, 0], sizes = [8, 8, 128], strides = [1, 1, 1]} : vector<10x10x128xf32> to vector<8x8x128xf32>
    %126 = vector.shape_cast %125 : vector<8x8x128xf32> to vector<64x128xf32>
    %127 = arith.truncf %126 : vector<64x128xf32> to vector<64x128xbf16>
    %c3_58 = arith.constant 3 : index
    %c0_59 = arith.constant 0 : index
    %c0_60 = arith.constant 0 : index
    %128 = vector.load %arg4[%c3_58, %c0_59, %c0_60] : memref<9x128x128xbf16, #tpu.memory_space<vmem>>, vector<1x128x128xbf16>
    %129 = vector.shape_cast %128 : vector<1x128x128xbf16> to vector<128x128xbf16>
    %cst_61 = arith.constant dense<0.000000e+00> : vector<64x128xf32>
    %130 = tpu.matmul %127, %129, %cst_61 {dimension_numbers = #tpu.dot_dimension_numbers<[1], [0], [0], [1], [0, 0, 1, 1], [], []>} : vector<64x128xbf16>, vector<128x128xbf16>, vector<64x128xf32> -> vector<64x128xf32>
    %131 = arith.addf %124, %130 : vector<64x128xf32>
    %132 = vector.extract_strided_slice %100 {offsets = [1, 1, 0], sizes = [8, 8, 128], strides = [1, 1, 1]} : vector<10x10x128xf32> to vector<8x8x128xf32>
    %133 = vector.shape_cast %132 : vector<8x8x128xf32> to vector<64x128xf32>
    %134 = arith.truncf %133 : vector<64x128xf32> to vector<64x128xbf16>
    %c4_62 = arith.constant 4 : index
    %c0_63 = arith.constant 0 : index
    %c0_64 = arith.constant 0 : index
    %135 = vector.load %arg4[%c4_62, %c0_63, %c0_64] : memref<9x128x128xbf16, #tpu.memory_space<vmem>>, vector<1x128x128xbf16>
    %136 = vector.shape_cast %135 : vector<1x128x128xbf16> to vector<128x128xbf16>
    %cst_65 = arith.constant dense<0.000000e+00> : vector<64x128xf32>
    %137 = tpu.matmul %134, %136, %cst_65 {dimension_numbers = #tpu.dot_dimension_numbers<[1], [0], [0], [1], [0, 0, 1, 1], [], []>} : vector<64x128xbf16>, vector<128x128xbf16>, vector<64x128xf32> -> vector<64x128xf32>
    %138 = arith.addf %131, %137 : vector<64x128xf32>
    %139 = vector.extract_strided_slice %100 {offsets = [1, 2, 0], sizes = [8, 8, 128], strides = [1, 1, 1]} : vector<10x10x128xf32> to vector<8x8x128xf32>
    %140 = vector.shape_cast %139 : vector<8x8x128xf32> to vector<64x128xf32>
    %141 = arith.truncf %140 : vector<64x128xf32> to vector<64x128xbf16>
    %c5_66 = arith.constant 5 : index
    %c0_67 = arith.constant 0 : index
    %c0_68 = arith.constant 0 : index
    %142 = vector.load %arg4[%c5_66, %c0_67, %c0_68] : memref<9x128x128xbf16, #tpu.memory_space<vmem>>, vector<1x128x128xbf16>
    %143 = vector.shape_cast %142 : vector<1x128x128xbf16> to vector<128x128xbf16>
    %cst_69 = arith.constant dense<0.000000e+00> : vector<64x128xf32>
    %144 = tpu.matmul %141, %143, %cst_69 {dimension_numbers = #tpu.dot_dimension_numbers<[1], [0], [0], [1], [0, 0, 1, 1], [], []>} : vector<64x128xbf16>, vector<128x128xbf16>, vector<64x128xf32> -> vector<64x128xf32>
    %145 = arith.addf %138, %144 : vector<64x128xf32>
    %146 = vector.extract_strided_slice %100 {offsets = [2, 0, 0], sizes = [8, 8, 128], strides = [1, 1, 1]} : vector<10x10x128xf32> to vector<8x8x128xf32>
    %147 = vector.shape_cast %146 : vector<8x8x128xf32> to vector<64x128xf32>
    %148 = arith.truncf %147 : vector<64x128xf32> to vector<64x128xbf16>
    %c6_70 = arith.constant 6 : index
    %c0_71 = arith.constant 0 : index
    %c0_72 = arith.constant 0 : index
    %149 = vector.load %arg4[%c6_70, %c0_71, %c0_72] : memref<9x128x128xbf16, #tpu.memory_space<vmem>>, vector<1x128x128xbf16>
    %150 = vector.shape_cast %149 : vector<1x128x128xbf16> to vector<128x128xbf16>
    %cst_73 = arith.constant dense<0.000000e+00> : vector<64x128xf32>
    %151 = tpu.matmul %148, %150, %cst_73 {dimension_numbers = #tpu.dot_dimension_numbers<[1], [0], [0], [1], [0, 0, 1, 1], [], []>} : vector<64x128xbf16>, vector<128x128xbf16>, vector<64x128xf32> -> vector<64x128xf32>
    %152 = arith.addf %145, %151 : vector<64x128xf32>
    %153 = vector.extract_strided_slice %100 {offsets = [2, 1, 0], sizes = [8, 8, 128], strides = [1, 1, 1]} : vector<10x10x128xf32> to vector<8x8x128xf32>
    %154 = vector.shape_cast %153 : vector<8x8x128xf32> to vector<64x128xf32>
    %155 = arith.truncf %154 : vector<64x128xf32> to vector<64x128xbf16>
    %c7_74 = arith.constant 7 : index
    %c0_75 = arith.constant 0 : index
    %c0_76 = arith.constant 0 : index
    %156 = vector.load %arg4[%c7_74, %c0_75, %c0_76] : memref<9x128x128xbf16, #tpu.memory_space<vmem>>, vector<1x128x128xbf16>
    %157 = vector.shape_cast %156 : vector<1x128x128xbf16> to vector<128x128xbf16>
    %cst_77 = arith.constant dense<0.000000e+00> : vector<64x128xf32>
    %158 = tpu.matmul %155, %157, %cst_77 {dimension_numbers = #tpu.dot_dimension_numbers<[1], [0], [0], [1], [0, 0, 1, 1], [], []>} : vector<64x128xbf16>, vector<128x128xbf16>, vector<64x128xf32> -> vector<64x128xf32>
    %159 = arith.addf %152, %158 : vector<64x128xf32>
    %160 = vector.extract_strided_slice %100 {offsets = [2, 2, 0], sizes = [8, 8, 128], strides = [1, 1, 1]} : vector<10x10x128xf32> to vector<8x8x128xf32>
    %161 = vector.shape_cast %160 : vector<8x8x128xf32> to vector<64x128xf32>
    %162 = arith.truncf %161 : vector<64x128xf32> to vector<64x128xbf16>
    %c8_78 = arith.constant 8 : index
    %c0_79 = arith.constant 0 : index
    %c0_80 = arith.constant 0 : index
    %163 = vector.load %arg4[%c8_78, %c0_79, %c0_80] : memref<9x128x128xbf16, #tpu.memory_space<vmem>>, vector<1x128x128xbf16>
    %164 = vector.shape_cast %163 : vector<1x128x128xbf16> to vector<128x128xbf16>
    %cst_81 = arith.constant dense<0.000000e+00> : vector<64x128xf32>
    %165 = tpu.matmul %162, %164, %cst_81 {dimension_numbers = #tpu.dot_dimension_numbers<[1], [0], [0], [1], [0, 0, 1, 1], [], []>} : vector<64x128xbf16>, vector<128x128xbf16>, vector<64x128xf32> -> vector<64x128xf32>
    %166 = arith.addf %159, %165 : vector<64x128xf32>
    %cst_82 = arith.constant 0.000000e+00 : f32
    %167 = vector.broadcast %cst_82 : f32 to vector<64x128xf32>
    %168 = arith.maximumf %166, %167 : vector<64x128xf32>
    %169 = vector.shape_cast %168 : vector<64x128xf32> to vector<8x8x128xf32>
    %170 = vector.shape_cast %169 : vector<8x8x128xf32> to vector<4x2x8x128xf32>
    %cst_83 = arith.constant dense<0xFF800000> : vector<4x8x128xf32>
    %171 = vector.multi_reduction <maximumf>, %170, %cst_83 [1] : vector<4x2x8x128xf32> to vector<4x8x128xf32>
    %c0_84 = arith.constant 0 : index
    %c0_85 = arith.constant 0 : index
    %172 = vector.load %arg7[%c0_84, %c0_85] : memref<1x128xf32, #tpu.memory_space<vmem>>, vector<1x128xf32>
    %173 = vector.shape_cast %172 : vector<1x128xf32> to vector<1x128xf32>
    %174 = vector.broadcast %173 : vector<1x128xf32> to vector<8x128xf32>
    %175 = vector.extract_strided_slice %171 {offsets = [0, 0, 0], sizes = [4, 2, 128], strides = [1, 1, 1]} : vector<4x8x128xf32> to vector<4x2x128xf32>
    %cst_86 = arith.constant dense<0xFF800000> : vector<4x128xf32>
    %176 = vector.multi_reduction <maximumf>, %175, %cst_86 [1] : vector<4x2x128xf32> to vector<4x128xf32>
    %177 = vector.shape_cast %176 : vector<4x128xf32> to vector<4x1x128xf32>
    %178 = vector.extract_strided_slice %177 {offsets = [0, 0, 0], sizes = [1, 1, 128], strides = [1, 1, 1]} : vector<4x1x128xf32> to vector<1x1x128xf32>
    %179 = vector.shape_cast %178 : vector<1x1x128xf32> to vector<1x128xf32>
    %180 = vector.shape_cast %179 : vector<1x128xf32> to vector<1x128xf32>
    %181 = vector.broadcast %180 : vector<1x128xf32> to vector<8x128xf32>
    %182 = arith.truncf %181 : vector<8x128xf32> to vector<8x128xbf16>
    %c0_87 = arith.constant 0 : index
    %c0_88 = arith.constant 0 : index
    %c0_89 = arith.constant 0 : index
    %183 = vector.load %arg6[%c0_87, %c0_88, %c0_89] : memref<16x128x128xbf16, #tpu.memory_space<vmem>>, vector<1x128x128xbf16>
    %184 = vector.shape_cast %183 : vector<1x128x128xbf16> to vector<128x128xbf16>
    %cst_90 = arith.constant dense<0.000000e+00> : vector<8x128xf32>
    %185 = tpu.matmul %182, %184, %cst_90 {dimension_numbers = #tpu.dot_dimension_numbers<[1], [0], [0], [1], [0, 0, 1, 1], [], []>} : vector<8x128xbf16>, vector<128x128xbf16>, vector<8x128xf32> -> vector<8x128xf32>
    %186 = arith.addf %174, %185 : vector<8x128xf32>
    %187 = vector.extract_strided_slice %177 {offsets = [1, 0, 0], sizes = [1, 1, 128], strides = [1, 1, 1]} : vector<4x1x128xf32> to vector<1x1x128xf32>
    %188 = vector.shape_cast %187 : vector<1x1x128xf32> to vector<1x128xf32>
    %189 = vector.shape_cast %188 : vector<1x128xf32> to vector<1x128xf32>
    %190 = vector.broadcast %189 : vector<1x128xf32> to vector<8x128xf32>
    %191 = arith.truncf %190 : vector<8x128xf32> to vector<8x128xbf16>
    %c4_91 = arith.constant 4 : index
    %c0_92 = arith.constant 0 : index
    %c0_93 = arith.constant 0 : index
    %192 = vector.load %arg6[%c4_91, %c0_92, %c0_93] : memref<16x128x128xbf16, #tpu.memory_space<vmem>>, vector<1x128x128xbf16>
    %193 = vector.shape_cast %192 : vector<1x128x128xbf16> to vector<128x128xbf16>
    %cst_94 = arith.constant dense<0.000000e+00> : vector<8x128xf32>
    %194 = tpu.matmul %191, %193, %cst_94 {dimension_numbers = #tpu.dot_dimension_numbers<[1], [0], [0], [1], [0, 0, 1, 1], [], []>} : vector<8x128xbf16>, vector<128x128xbf16>, vector<8x128xf32> -> vector<8x128xf32>
    %195 = arith.addf %186, %194 : vector<8x128xf32>
    %196 = vector.extract_strided_slice %177 {offsets = [2, 0, 0], sizes = [1, 1, 128], strides = [1, 1, 1]} : vector<4x1x128xf32> to vector<1x1x128xf32>
    %197 = vector.shape_cast %196 : vector<1x1x128xf32> to vector<1x128xf32>
    %198 = vector.shape_cast %197 : vector<1x128xf32> to vector<1x128xf32>
    %199 = vector.broadcast %198 : vector<1x128xf32> to vector<8x128xf32>
    %200 = arith.truncf %199 : vector<8x128xf32> to vector<8x128xbf16>
    %c8_95 = arith.constant 8 : index
    %c0_96 = arith.constant 0 : index
    %c0_97 = arith.constant 0 : index
    %201 = vector.load %arg6[%c8_95, %c0_96, %c0_97] : memref<16x128x128xbf16, #tpu.memory_space<vmem>>, vector<1x128x128xbf16>
    %202 = vector.shape_cast %201 : vector<1x128x128xbf16> to vector<128x128xbf16>
    %cst_98 = arith.constant dense<0.000000e+00> : vector<8x128xf32>
    %203 = tpu.matmul %200, %202, %cst_98 {dimension_numbers = #tpu.dot_dimension_numbers<[1], [0], [0], [1], [0, 0, 1, 1], [], []>} : vector<8x128xbf16>, vector<128x128xbf16>, vector<8x128xf32> -> vector<8x128xf32>
    %204 = arith.addf %195, %203 : vector<8x128xf32>
    %205 = vector.extract_strided_slice %177 {offsets = [3, 0, 0], sizes = [1, 1, 128], strides = [1, 1, 1]} : vector<4x1x128xf32> to vector<1x1x128xf32>
    %206 = vector.shape_cast %205 : vector<1x1x128xf32> to vector<1x128xf32>
    %207 = vector.shape_cast %206 : vector<1x128xf32> to vector<1x128xf32>
    %208 = vector.broadcast %207 : vector<1x128xf32> to vector<8x128xf32>
    %209 = arith.truncf %208 : vector<8x128xf32> to vector<8x128xbf16>
    %c12 = arith.constant 12 : index
    %c0_99 = arith.constant 0 : index
    %c0_100 = arith.constant 0 : index
    %210 = vector.load %arg6[%c12, %c0_99, %c0_100] : memref<16x128x128xbf16, #tpu.memory_space<vmem>>, vector<1x128x128xbf16>
    %211 = vector.shape_cast %210 : vector<1x128x128xbf16> to vector<128x128xbf16>
    %cst_101 = arith.constant dense<0.000000e+00> : vector<8x128xf32>
    %212 = tpu.matmul %209, %211, %cst_101 {dimension_numbers = #tpu.dot_dimension_numbers<[1], [0], [0], [1], [0, 0, 1, 1], [], []>} : vector<8x128xbf16>, vector<128x128xbf16>, vector<8x128xf32> -> vector<8x128xf32>
    %213 = arith.addf %204, %212 : vector<8x128xf32>
    %214 = vector.extract_strided_slice %171 {offsets = [0, 2, 0], sizes = [4, 2, 128], strides = [1, 1, 1]} : vector<4x8x128xf32> to vector<4x2x128xf32>
    %cst_102 = arith.constant dense<0xFF800000> : vector<4x128xf32>
    %215 = vector.multi_reduction <maximumf>, %214, %cst_102 [1] : vector<4x2x128xf32> to vector<4x128xf32>
    %216 = vector.shape_cast %215 : vector<4x128xf32> to vector<4x1x128xf32>
    %217 = vector.extract_strided_slice %216 {offsets = [0, 0, 0], sizes = [1, 1, 128], strides = [1, 1, 1]} : vector<4x1x128xf32> to vector<1x1x128xf32>
    %218 = vector.shape_cast %217 : vector<1x1x128xf32> to vector<1x128xf32>
    %219 = vector.shape_cast %218 : vector<1x128xf32> to vector<1x128xf32>
    %220 = vector.broadcast %219 : vector<1x128xf32> to vector<8x128xf32>
    %221 = arith.truncf %220 : vector<8x128xf32> to vector<8x128xbf16>
    %c1_103 = arith.constant 1 : index
    %c0_104 = arith.constant 0 : index
    %c0_105 = arith.constant 0 : index
    %222 = vector.load %arg6[%c1_103, %c0_104, %c0_105] : memref<16x128x128xbf16, #tpu.memory_space<vmem>>, vector<1x128x128xbf16>
    %223 = vector.shape_cast %222 : vector<1x128x128xbf16> to vector<128x128xbf16>
    %cst_106 = arith.constant dense<0.000000e+00> : vector<8x128xf32>
    %224 = tpu.matmul %221, %223, %cst_106 {dimension_numbers = #tpu.dot_dimension_numbers<[1], [0], [0], [1], [0, 0, 1, 1], [], []>} : vector<8x128xbf16>, vector<128x128xbf16>, vector<8x128xf32> -> vector<8x128xf32>
    %225 = arith.addf %213, %224 : vector<8x128xf32>
    %226 = vector.extract_strided_slice %216 {offsets = [1, 0, 0], sizes = [1, 1, 128], strides = [1, 1, 1]} : vector<4x1x128xf32> to vector<1x1x128xf32>
    %227 = vector.shape_cast %226 : vector<1x1x128xf32> to vector<1x128xf32>
    %228 = vector.shape_cast %227 : vector<1x128xf32> to vector<1x128xf32>
    %229 = vector.broadcast %228 : vector<1x128xf32> to vector<8x128xf32>
    %230 = arith.truncf %229 : vector<8x128xf32> to vector<8x128xbf16>
    %c5_107 = arith.constant 5 : index
    %c0_108 = arith.constant 0 : index
    %c0_109 = arith.constant 0 : index
    %231 = vector.load %arg6[%c5_107, %c0_108, %c0_109] : memref<16x128x128xbf16, #tpu.memory_space<vmem>>, vector<1x128x128xbf16>
    %232 = vector.shape_cast %231 : vector<1x128x128xbf16> to vector<128x128xbf16>
    %cst_110 = arith.constant dense<0.000000e+00> : vector<8x128xf32>
    %233 = tpu.matmul %230, %232, %cst_110 {dimension_numbers = #tpu.dot_dimension_numbers<[1], [0], [0], [1], [0, 0, 1, 1], [], []>} : vector<8x128xbf16>, vector<128x128xbf16>, vector<8x128xf32> -> vector<8x128xf32>
    %234 = arith.addf %225, %233 : vector<8x128xf32>
    %235 = vector.extract_strided_slice %216 {offsets = [2, 0, 0], sizes = [1, 1, 128], strides = [1, 1, 1]} : vector<4x1x128xf32> to vector<1x1x128xf32>
    %236 = vector.shape_cast %235 : vector<1x1x128xf32> to vector<1x128xf32>
    %237 = vector.shape_cast %236 : vector<1x128xf32> to vector<1x128xf32>
    %238 = vector.broadcast %237 : vector<1x128xf32> to vector<8x128xf32>
    %239 = arith.truncf %238 : vector<8x128xf32> to vector<8x128xbf16>
    %c9 = arith.constant 9 : index
    %c0_111 = arith.constant 0 : index
    %c0_112 = arith.constant 0 : index
    %240 = vector.load %arg6[%c9, %c0_111, %c0_112] : memref<16x128x128xbf16, #tpu.memory_space<vmem>>, vector<1x128x128xbf16>
    %241 = vector.shape_cast %240 : vector<1x128x128xbf16> to vector<128x128xbf16>
    %cst_113 = arith.constant dense<0.000000e+00> : vector<8x128xf32>
    %242 = tpu.matmul %239, %241, %cst_113 {dimension_numbers = #tpu.dot_dimension_numbers<[1], [0], [0], [1], [0, 0, 1, 1], [], []>} : vector<8x128xbf16>, vector<128x128xbf16>, vector<8x128xf32> -> vector<8x128xf32>
    %243 = arith.addf %234, %242 : vector<8x128xf32>
    %244 = vector.extract_strided_slice %216 {offsets = [3, 0, 0], sizes = [1, 1, 128], strides = [1, 1, 1]} : vector<4x1x128xf32> to vector<1x1x128xf32>
    %245 = vector.shape_cast %244 : vector<1x1x128xf32> to vector<1x128xf32>
    %246 = vector.shape_cast %245 : vector<1x128xf32> to vector<1x128xf32>
    %247 = vector.broadcast %246 : vector<1x128xf32> to vector<8x128xf32>
    %248 = arith.truncf %247 : vector<8x128xf32> to vector<8x128xbf16>
    %c13 = arith.constant 13 : index
    %c0_114 = arith.constant 0 : index
    %c0_115 = arith.constant 0 : index
    %249 = vector.load %arg6[%c13, %c0_114, %c0_115] : memref<16x128x128xbf16, #tpu.memory_space<vmem>>, vector<1x128x128xbf16>
    %250 = vector.shape_cast %249 : vector<1x128x128xbf16> to vector<128x128xbf16>
    %cst_116 = arith.constant dense<0.000000e+00> : vector<8x128xf32>
    %251 = tpu.matmul %248, %250, %cst_116 {dimension_numbers = #tpu.dot_dimension_numbers<[1], [0], [0], [1], [0, 0, 1, 1], [], []>} : vector<8x128xbf16>, vector<128x128xbf16>, vector<8x128xf32> -> vector<8x128xf32>
    %252 = arith.addf %243, %251 : vector<8x128xf32>
    %253 = vector.extract_strided_slice %171 {offsets = [0, 4, 0], sizes = [4, 2, 128], strides = [1, 1, 1]} : vector<4x8x128xf32> to vector<4x2x128xf32>
    %cst_117 = arith.constant dense<0xFF800000> : vector<4x128xf32>
    %254 = vector.multi_reduction <maximumf>, %253, %cst_117 [1] : vector<4x2x128xf32> to vector<4x128xf32>
    %255 = vector.shape_cast %254 : vector<4x128xf32> to vector<4x1x128xf32>
    %256 = vector.extract_strided_slice %255 {offsets = [0, 0, 0], sizes = [1, 1, 128], strides = [1, 1, 1]} : vector<4x1x128xf32> to vector<1x1x128xf32>
    %257 = vector.shape_cast %256 : vector<1x1x128xf32> to vector<1x128xf32>
    %258 = vector.shape_cast %257 : vector<1x128xf32> to vector<1x128xf32>
    %259 = vector.broadcast %258 : vector<1x128xf32> to vector<8x128xf32>
    %260 = arith.truncf %259 : vector<8x128xf32> to vector<8x128xbf16>
    %c2_118 = arith.constant 2 : index
    %c0_119 = arith.constant 0 : index
    %c0_120 = arith.constant 0 : index
    %261 = vector.load %arg6[%c2_118, %c0_119, %c0_120] : memref<16x128x128xbf16, #tpu.memory_space<vmem>>, vector<1x128x128xbf16>
    %262 = vector.shape_cast %261 : vector<1x128x128xbf16> to vector<128x128xbf16>
    %cst_121 = arith.constant dense<0.000000e+00> : vector<8x128xf32>
    %263 = tpu.matmul %260, %262, %cst_121 {dimension_numbers = #tpu.dot_dimension_numbers<[1], [0], [0], [1], [0, 0, 1, 1], [], []>} : vector<8x128xbf16>, vector<128x128xbf16>, vector<8x128xf32> -> vector<8x128xf32>
    %264 = arith.addf %252, %263 : vector<8x128xf32>
    %265 = vector.extract_strided_slice %255 {offsets = [1, 0, 0], sizes = [1, 1, 128], strides = [1, 1, 1]} : vector<4x1x128xf32> to vector<1x1x128xf32>
    %266 = vector.shape_cast %265 : vector<1x1x128xf32> to vector<1x128xf32>
    %267 = vector.shape_cast %266 : vector<1x128xf32> to vector<1x128xf32>
    %268 = vector.broadcast %267 : vector<1x128xf32> to vector<8x128xf32>
    %269 = arith.truncf %268 : vector<8x128xf32> to vector<8x128xbf16>
    %c6_122 = arith.constant 6 : index
    %c0_123 = arith.constant 0 : index
    %c0_124 = arith.constant 0 : index
    %270 = vector.load %arg6[%c6_122, %c0_123, %c0_124] : memref<16x128x128xbf16, #tpu.memory_space<vmem>>, vector<1x128x128xbf16>
    %271 = vector.shape_cast %270 : vector<1x128x128xbf16> to vector<128x128xbf16>
    %cst_125 = arith.constant dense<0.000000e+00> : vector<8x128xf32>
    %272 = tpu.matmul %269, %271, %cst_125 {dimension_numbers = #tpu.dot_dimension_numbers<[1], [0], [0], [1], [0, 0, 1, 1], [], []>} : vector<8x128xbf16>, vector<128x128xbf16>, vector<8x128xf32> -> vector<8x128xf32>
    %273 = arith.addf %264, %272 : vector<8x128xf32>
    %274 = vector.extract_strided_slice %255 {offsets = [2, 0, 0], sizes = [1, 1, 128], strides = [1, 1, 1]} : vector<4x1x128xf32> to vector<1x1x128xf32>
    %275 = vector.shape_cast %274 : vector<1x1x128xf32> to vector<1x128xf32>
    %276 = vector.shape_cast %275 : vector<1x128xf32> to vector<1x128xf32>
    %277 = vector.broadcast %276 : vector<1x128xf32> to vector<8x128xf32>
    %278 = arith.truncf %277 : vector<8x128xf32> to vector<8x128xbf16>
    %c10 = arith.constant 10 : index
    %c0_126 = arith.constant 0 : index
    %c0_127 = arith.constant 0 : index
    %279 = vector.load %arg6[%c10, %c0_126, %c0_127] : memref<16x128x128xbf16, #tpu.memory_space<vmem>>, vector<1x128x128xbf16>
    %280 = vector.shape_cast %279 : vector<1x128x128xbf16> to vector<128x128xbf16>
    %cst_128 = arith.constant dense<0.000000e+00> : vector<8x128xf32>
    %281 = tpu.matmul %278, %280, %cst_128 {dimension_numbers = #tpu.dot_dimension_numbers<[1], [0], [0], [1], [0, 0, 1, 1], [], []>} : vector<8x128xbf16>, vector<128x128xbf16>, vector<8x128xf32> -> vector<8x128xf32>
    %282 = arith.addf %273, %281 : vector<8x128xf32>
    %283 = vector.extract_strided_slice %255 {offsets = [3, 0, 0], sizes = [1, 1, 128], strides = [1, 1, 1]} : vector<4x1x128xf32> to vector<1x1x128xf32>
    %284 = vector.shape_cast %283 : vector<1x1x128xf32> to vector<1x128xf32>
    %285 = vector.shape_cast %284 : vector<1x128xf32> to vector<1x128xf32>
    %286 = vector.broadcast %285 : vector<1x128xf32> to vector<8x128xf32>
    %287 = arith.truncf %286 : vector<8x128xf32> to vector<8x128xbf16>
    %c14 = arith.constant 14 : index
    %c0_129 = arith.constant 0 : index
    %c0_130 = arith.constant 0 : index
    %288 = vector.load %arg6[%c14, %c0_129, %c0_130] : memref<16x128x128xbf16, #tpu.memory_space<vmem>>, vector<1x128x128xbf16>
    %289 = vector.shape_cast %288 : vector<1x128x128xbf16> to vector<128x128xbf16>
    %cst_131 = arith.constant dense<0.000000e+00> : vector<8x128xf32>
    %290 = tpu.matmul %287, %289, %cst_131 {dimension_numbers = #tpu.dot_dimension_numbers<[1], [0], [0], [1], [0, 0, 1, 1], [], []>} : vector<8x128xbf16>, vector<128x128xbf16>, vector<8x128xf32> -> vector<8x128xf32>
    %291 = arith.addf %282, %290 : vector<8x128xf32>
    %292 = vector.extract_strided_slice %171 {offsets = [0, 6, 0], sizes = [4, 2, 128], strides = [1, 1, 1]} : vector<4x8x128xf32> to vector<4x2x128xf32>
    %cst_132 = arith.constant dense<0xFF800000> : vector<4x128xf32>
    %293 = vector.multi_reduction <maximumf>, %292, %cst_132 [1] : vector<4x2x128xf32> to vector<4x128xf32>
    %294 = vector.shape_cast %293 : vector<4x128xf32> to vector<4x1x128xf32>
    %295 = vector.extract_strided_slice %294 {offsets = [0, 0, 0], sizes = [1, 1, 128], strides = [1, 1, 1]} : vector<4x1x128xf32> to vector<1x1x128xf32>
    %296 = vector.shape_cast %295 : vector<1x1x128xf32> to vector<1x128xf32>
    %297 = vector.shape_cast %296 : vector<1x128xf32> to vector<1x128xf32>
    %298 = vector.broadcast %297 : vector<1x128xf32> to vector<8x128xf32>
    %299 = arith.truncf %298 : vector<8x128xf32> to vector<8x128xbf16>
    %c3_133 = arith.constant 3 : index
    %c0_134 = arith.constant 0 : index
    %c0_135 = arith.constant 0 : index
    %300 = vector.load %arg6[%c3_133, %c0_134, %c0_135] : memref<16x128x128xbf16, #tpu.memory_space<vmem>>, vector<1x128x128xbf16>
    %301 = vector.shape_cast %300 : vector<1x128x128xbf16> to vector<128x128xbf16>
    %cst_136 = arith.constant dense<0.000000e+00> : vector<8x128xf32>
    %302 = tpu.matmul %299, %301, %cst_136 {dimension_numbers = #tpu.dot_dimension_numbers<[1], [0], [0], [1], [0, 0, 1, 1], [], []>} : vector<8x128xbf16>, vector<128x128xbf16>, vector<8x128xf32> -> vector<8x128xf32>
    %303 = arith.addf %291, %302 : vector<8x128xf32>
    %304 = vector.extract_strided_slice %294 {offsets = [1, 0, 0], sizes = [1, 1, 128], strides = [1, 1, 1]} : vector<4x1x128xf32> to vector<1x1x128xf32>
    %305 = vector.shape_cast %304 : vector<1x1x128xf32> to vector<1x128xf32>
    %306 = vector.shape_cast %305 : vector<1x128xf32> to vector<1x128xf32>
    %307 = vector.broadcast %306 : vector<1x128xf32> to vector<8x128xf32>
    %308 = arith.truncf %307 : vector<8x128xf32> to vector<8x128xbf16>
    %c7_137 = arith.constant 7 : index
    %c0_138 = arith.constant 0 : index
    %c0_139 = arith.constant 0 : index
    %309 = vector.load %arg6[%c7_137, %c0_138, %c0_139] : memref<16x128x128xbf16, #tpu.memory_space<vmem>>, vector<1x128x128xbf16>
    %310 = vector.shape_cast %309 : vector<1x128x128xbf16> to vector<128x128xbf16>
    %cst_140 = arith.constant dense<0.000000e+00> : vector<8x128xf32>
    %311 = tpu.matmul %308, %310, %cst_140 {dimension_numbers = #tpu.dot_dimension_numbers<[1], [0], [0], [1], [0, 0, 1, 1], [], []>} : vector<8x128xbf16>, vector<128x128xbf16>, vector<8x128xf32> -> vector<8x128xf32>
    %312 = arith.addf %303, %311 : vector<8x128xf32>
    %313 = vector.extract_strided_slice %294 {offsets = [2, 0, 0], sizes = [1, 1, 128], strides = [1, 1, 1]} : vector<4x1x128xf32> to vector<1x1x128xf32>
    %314 = vector.shape_cast %313 : vector<1x1x128xf32> to vector<1x128xf32>
    %315 = vector.shape_cast %314 : vector<1x128xf32> to vector<1x128xf32>
    %316 = vector.broadcast %315 : vector<1x128xf32> to vector<8x128xf32>
    %317 = arith.truncf %316 : vector<8x128xf32> to vector<8x128xbf16>
    %c11 = arith.constant 11 : index
    %c0_141 = arith.constant 0 : index
    %c0_142 = arith.constant 0 : index
    %318 = vector.load %arg6[%c11, %c0_141, %c0_142] : memref<16x128x128xbf16, #tpu.memory_space<vmem>>, vector<1x128x128xbf16>
    %319 = vector.shape_cast %318 : vector<1x128x128xbf16> to vector<128x128xbf16>
    %cst_143 = arith.constant dense<0.000000e+00> : vector<8x128xf32>
    %320 = tpu.matmul %317, %319, %cst_143 {dimension_numbers = #tpu.dot_dimension_numbers<[1], [0], [0], [1], [0, 0, 1, 1], [], []>} : vector<8x128xbf16>, vector<128x128xbf16>, vector<8x128xf32> -> vector<8x128xf32>
    %321 = arith.addf %312, %320 : vector<8x128xf32>
    %322 = vector.extract_strided_slice %294 {offsets = [3, 0, 0], sizes = [1, 1, 128], strides = [1, 1, 1]} : vector<4x1x128xf32> to vector<1x1x128xf32>
    %323 = vector.shape_cast %322 : vector<1x1x128xf32> to vector<1x128xf32>
    %324 = vector.shape_cast %323 : vector<1x128xf32> to vector<1x128xf32>
    %325 = vector.broadcast %324 : vector<1x128xf32> to vector<8x128xf32>
    %326 = arith.truncf %325 : vector<8x128xf32> to vector<8x128xbf16>
    %c15 = arith.constant 15 : index
    %c0_144 = arith.constant 0 : index
    %c0_145 = arith.constant 0 : index
    %327 = vector.load %arg6[%c15, %c0_144, %c0_145] : memref<16x128x128xbf16, #tpu.memory_space<vmem>>, vector<1x128x128xbf16>
    %328 = vector.shape_cast %327 : vector<1x128x128xbf16> to vector<128x128xbf16>
    %cst_146 = arith.constant dense<0.000000e+00> : vector<8x128xf32>
    %329 = tpu.matmul %326, %328, %cst_146 {dimension_numbers = #tpu.dot_dimension_numbers<[1], [0], [0], [1], [0, 0, 1, 1], [], []>} : vector<8x128xbf16>, vector<128x128xbf16>, vector<8x128xf32> -> vector<8x128xf32>
    %330 = arith.addf %321, %329 : vector<8x128xf32>
    %cst_147 = arith.constant 0.000000e+00 : f32
    %331 = vector.broadcast %cst_147 : f32 to vector<8x128xf32>
    %332 = arith.maximumf %330, %331 : vector<8x128xf32>
    %333 = arith.truncf %332 : vector<8x128xf32> to vector<8x128xbf16>
    %c0_148 = arith.constant 0 : index
    %c0_149 = arith.constant 0 : index
    %334 = vector.load %arg8[%c0_148, %c0_149] : memref<128x128xbf16, #tpu.memory_space<vmem>>, vector<128x128xbf16>
    %cst_150 = arith.constant dense<0.000000e+00> : vector<8x128xf32>
    %335 = tpu.matmul %333, %334, %cst_150 {dimension_numbers = #tpu.dot_dimension_numbers<[1], [0], [0], [1], [0, 0, 1, 1], [], []>} : vector<8x128xbf16>, vector<128x128xbf16>, vector<8x128xf32> -> vector<8x128xf32>
    %c0_151 = arith.constant 0 : index
    %c0_152 = arith.constant 0 : index
    %336 = vector.load %arg9[%c0_151, %c0_152] : memref<1x128xf32, #tpu.memory_space<vmem>>, vector<1x128xf32>
    %337 = vector.broadcast %336 : vector<1x128xf32> to vector<8x128xf32>
    %338 = arith.addf %335, %337 : vector<8x128xf32>
    %c0_153 = arith.constant 0 : index
    %c0_154 = arith.constant 0 : index
    %c0_155 = arith.constant 0 : index
    %339 = vector.load %arg10[%c0_153, %c0_154, %c0_155] : memref<1x8x128xf32, #tpu.memory_space<vmem>>, vector<1x8x128xf32>
    %340 = vector.shape_cast %339 : vector<1x8x128xf32> to vector<8x128xf32>
    %341 = vector.shape_cast %338 : vector<8x128xf32> to vector<1x8x128xf32>
    tpu.vector_store %arg10[%c0_153, %c0_154, %c0_155], %341 {strides = array<i32>} : memref<1x8x128xf32, #tpu.memory_space<vmem>>, vector<1x8x128xf32>,
    return
  }
  func.func @transform_0(%arg0: i32) -> (i32, i32, i32, i32) {
    %c0_i32 = arith.constant 0 : i32
    %c0_i32_0 = arith.constant 0 : i32
    %c0_i32_1 = arith.constant 0 : i32
    %c0_i32_2 = arith.constant 0 : i32
    return %arg0, %c0_i32, %c0_i32_0, %c0_i32_1 : i32, i32, i32, i32
  }
  func.func @transform_1(%arg0: i32) -> (i32, i32, i32) {
    %c0_i32 = arith.constant 0 : i32
    %c0_i32_0 = arith.constant 0 : i32
    %c0_i32_1 = arith.constant 0 : i32
    %c0_i32_2 = arith.constant 0 : i32
    return %c0_i32, %c0_i32_0, %c0_i32_1 : i32, i32, i32
  }
  func.func @transform_2(%arg0: i32) -> (i32, i32) {
    %c0_i32 = arith.constant 0 : i32
    %c0_i32_0 = arith.constant 0 : i32
    %c0_i32_1 = arith.constant 0 : i32
    return %c0_i32, %c0_i32_0 : i32, i32
  }
  func.func @transform_3(%arg0: i32) -> (i32, i32, i32) {
    %c0_i32 = arith.constant 0 : i32
    %c0_i32_0 = arith.constant 0 : i32
    %c0_i32_1 = arith.constant 0 : i32
    %c0_i32_2 = arith.constant 0 : i32
    return %c0_i32, %c0_i32_0, %c0_i32_1 : i32, i32, i32
  }
  func.func @transform_4(%arg0: i32) -> (i32, i32) {
    %c0_i32 = arith.constant 0 : i32
    %c0_i32_0 = arith.constant 0 : i32
    %c0_i32_1 = arith.constant 0 : i32
    return %c0_i32, %c0_i32_0 : i32, i32
  }
  func.func @transform_5(%arg0: i32) -> (i32, i32, i32) {
    %c0_i32 = arith.constant 0 : i32
    %c0_i32_0 = arith.constant 0 : i32
    %c0_i32_1 = arith.constant 0 : i32
    %c0_i32_2 = arith.constant 0 : i32
    return %c0_i32, %c0_i32_0, %c0_i32_1 : i32, i32, i32
  }
  func.func @transform_6(%arg0: i32) -> (i32, i32) {
    %c0_i32 = arith.constant 0 : i32
    %c0_i32_0 = arith.constant 0 : i32
    %c0_i32_1 = arith.constant 0 : i32
    return %c0_i32, %c0_i32_0 : i32, i32
  }
  func.func @transform_7(%arg0: i32) -> (i32, i32) {
    %c0_i32 = arith.constant 0 : i32
    %c0_i32_0 = arith.constant 0 : i32
    %c0_i32_1 = arith.constant 0 : i32
    return %c0_i32, %c0_i32_0 : i32, i32
  }
  func.func @transform_8(%arg0: i32) -> (i32, i32) {
    %c0_i32 = arith.constant 0 : i32
    %c0_i32_0 = arith.constant 0 : i32
    %c0_i32_1 = arith.constant 0 : i32
    return %c0_i32, %c0_i32_0 : i32, i32
  }
  func.func @transform_9(%arg0: i32) -> (i32, i32, i32) {
    %c0_i32 = arith.constant 0 : i32
    %c0_i32_0 = arith.constant 0 : i32
    %c0_i32_1 = arith.constant 0 : i32
    return %arg0, %c0_i32, %c0_i32_0 : i32, i32, i32
  }
}

</mosaic_0001>

<bundles_post_ra>
// kernel: policy_model_forward.1
= control target key start
LH: loop header
LB: loop body
LE: loop exit
PB: predicated region body
PF: predicated region fallthrough
CT: control target
= control target key end

     0   :  { %s9361_s30 = smov 0   ;;  %s11877_s0 = inlined_call_operand.vmem [shape: f32[2,18,18,3], index: 0, kind: input, shape index: {}]   ;;  %s11878_s1 = inlined_call_operand.vmem [shape: bf16[9,3,128], index: 1, kind: input, shape index: {}]   ;;  %s11879_s2 = inlined_call_operand.vmem [shape: f32[1,128], index: 2, kind: input, shape index: {}]   ;;  %s11880_s3 = inlined_call_operand.vmem [shape: bf16[9,128,128], index: 3, kind: input, shape index: {}]   ;;  %s11881_s4 = inlined_call_operand.vmem [shape: f32[1,128], index: 4, kind: input, shape index: {}]   ;;  %s11882_s5 = inlined_call_operand.vmem [shape: bf16[16,128,128], index: 5, kind: input, shape index: {}]   ;;  %s11883_s6 = inlined_call_operand.vmem [shape: f32[1,128], index: 6, kind: input, shape index: {}]   ;;  %s11884_s7 = inlined_call_operand.vmem [shape: bf16[128,128], index: 7, kind: input, shape index: {}]   ;;  %s11885_s8 = inlined_call_operand.vmem [shape: f32[1,128], index: 8, kind: input, shape index: {}]   ;;  %s11886_s9 = inlined_call_operand.vmem [shape: f32[2,8,128], index: 9, kind: output, shape index: {}]  }
   0x1 LB: > { %s6640_s10 = sadd.s32 4294967295, %s9306_s30   ;;  %p6644_p0 = scmp.ge.s32.totalorder %s9306_s30, 1  ;;  %s9306_s30 = sphi %s9361_s30, %s19_s30  }
   0x2   : > { %p287_p1 = scmp.lt.s32.totalorder %s9306_s30, 3 }
   0x4   : > { %p288_p2 = pnand %p6644_p0, %p287_p1 }
   0x6   : > { %291 = sbr.rel (%p288_p2) target bundleno = 2192 (0x890), region = 56 }
   0xd   : > { %v409_v0 = vld [vmem:[%s11878_s1] sm:$0x3]  ;;  %vm459_vm0 = vcmask 1040384   ;;  %vm460_vm1 = vcmask 1041408   ;;  %p322_p3 = scmp.lt.s32.totalorder %s6640_s10, 1  ;;  %v9308_v1 = vmov 65535  }
   0xe   : > { %v461_v2 = vsel %vm459_vm0, 4294967295, %v9308_v1  ;;  %v6664_v3 = vld [vmem:[%s11878_s1 + $0x2] sm:$0x3]  ;;  %v6681_v7 = vld [vmem:[%s11878_s1 + $0x4] sm:$0x3]  ;;  %vm410_vm2 = vcmask 23552  }
   0xf   : > { %v9377_v4 = vsel %vm460_vm1, %v461_v2, 0  ;;  %s12121_s10 = smov (!%p322_p3, %s6640_s10), 1  ;;  %vm1082_vm3 = vcmask 1045504   ;;  %vm707_vm4 = vcmask 1046528   ;;  %vm2807_vm5 = vcmask 1043458  }
  0x10   : > { %v464_v5 = vand.u32 %v9377_v4, %v409_v0  ;;  %v887_v6 = vand.u32 %v6664_v3, %v9377_v4  ;;  %s9078_s15 = smul.u32 432, %s12121_s10  ;;  %v9420_v17 = vand.u32 %v6681_v7, %v9377_v4  ;;  %vm2864_vm6 = vcmask 1045508   ;;  %s6646_s22 = sshll.u32 %s12121_s10, 3 }
  0x11   : > { %vm2921_vm7 = vcmask 1047558   ;;  %vm3218_vm8 = vcmask 1042432   ;;  %vm3227_vm9 = vcmask 1043456   ;;  %vm3236_vm10 = vcmask 1044480   ;;  %s330_s27 = scalar_lea.vmem %s11886_s9, %s6646_s22 }
  0x12   : > { %7795 = vmatprep.subr.bf16.mxu0 %v464_v5  ;;  %s9390_s20 = scalar_lea.vmem %s11877_s0, %s9078_s15  ;;  %vm9310_vm11 = vmmov 0  }
  0x13   : > { %7796 = vmatpush3.bf16.msra.mxu0 %v464_v5  ;;  %v9393_v8 = vld [vmem:[%s9390_s20] sm:$0xff]  ;;  %v9396_v9 = vld [vmem:[%s9390_s20 + $0x8] sm:$0xff]  ;;  %v9399_v10 = vld [vmem:[%s9390_s20 + $0x18] sm:$0xff] }
  0x14   : > { %7829 = vmatprep.subr.bf16.mxu0 %v887_v6  ;;  %v393_v11 = vpack.c.bf16 %v9396_v9, %v9393_v8  ;;  %v9404_v12 = vld [vmem:[%s9390_s20 + $0x20] sm:$0xff]  ;;  %v9407_v13 = vld [vmem:[%s9390_s20 + $0x28] sm:$0x3]  ;;  %v9414_v15 = vld [vmem:[%s9390_s20 + $0x30] sm:$0xff]  ;;  %v1088_v18 = vrot.slane %v9399_v10, 2  ;;  %v11952_v47 = vrot.slane %v9396_v9, 2 }
  0x15   : > { %v9411_v14 = vpack.c.bf16 %v9404_v12, %v9399_v10  ;;  %v9417_v16 = vld [vmem:[%s9390_s20 + $0x38] sm:$0xff]  ;;  %v1089_v19 = vrot.slane %v9404_v12, 2  ;;  %v1091_v20 = vrot.slane %v9407_v13, 2  ;;  %v9439_v24 = vld [vmem:[%s9390_s20 + $0x48] sm:$0xff]  ;;  %v9442_v25 = vld [vmem:[%s9390_s20 + $0x50] sm:$0xff]  ;;  %v11953_v42 = vrot.slane %v9393_v8, 2 }
  0x16   : > { %7797 = vmatprep.mubr.msk.bf16.mxu0 %vm410_vm2, %v393_v11  ;;  %v9430_v21 = vpack.c.bf16 %v9417_v16, %v9414_v15  ;;  %11937 = vst [vmem:[#allocation4_spill] sm:$0xff] %v9439_v24  ;;  %v9447_v26 = vld [vmem:[%s9390_s20 + $0x60] sm:$0xff]  ;;  %v9450_v27 = vld [vmem:[%s9390_s20 + $0x68] sm:$0xff]  ;;  %v9455_v28 = vpack.c.bf16 %v9442_v25, %v9439_v24  ;;  %v9472_v38 = vld [vmem:[%s9390_s20 + $0x78] sm:$0xff] }
  0x17   : > { %11935 = vst [vmem:[#allocation2_spill] sm:$0xff] %v9411_v14  ;;  %7798 = vmatmul.mubr.msk.bf16.vlgmr.msra.gmra.mrb[0].mxu0 %vm410_vm2, %v9411_v14  ;;  %v9433_v22 = vsel %vm1082_vm3, %v1088_v18, %v1089_v19  ;;  %v9436_v23 = vsel %vm1082_vm3, %v1089_v19, %v1091_v20  ;;  %v9459_v29 = vpack.c.bf16 %v9450_v27, %v9447_v26  ;;  %11940 = vst [vmem:[#allocation7_spill] sm:$0xff] %v9472_v38  ;;  %v9475_v39 = vld [vmem:[%s9390_s20 + $0x80] sm:$0xff]  ;;  %v9488_v48 = vld [vmem:[%s9390_s20 + $0x90] sm:$0xff] }
  0x18   : > { %11936 = vst [vmem:[#allocation3_spill] sm:$0xff] %v9430_v21  ;;  %7830 = vmatpush3.bf16.msra.mxu0 %v887_v6  ;;  %7801 = vmatprep.mubr.msk.bf16.mxu0 %vm410_vm2, %v9430_v21  ;;  %11938 = vst [vmem:[#allocation5_spill] sm:$0xff] %v9455_v28  ;;  %v9491_v49 = vld [vmem:[%s9390_s20 + $0x98] sm:$0xff]  ;;  %v9498_v53 = vpack.c.bf16 %v9475_v39, %v9472_v38  ;;  %v9501_v54 = vld [vmem:[%s9390_s20 + $0xa8] sm:$0xff]  ;;  %v9679_v32 = vsel %vm1082_vm3, %v11953_v42, %v11952_v47  ;;  %v11958_v47 = vrot.slane %v9417_v16, 2 }
  0x19   : > { %7863 = vmatprep.subr.bf16.mxu0 %v9420_v17  ;;  %11939 = vst [vmem:[#allocation6_spill] sm:$0xff] %v9459_v29  ;;  %v9504_v55 = vld [vmem:[%s9390_s20 + $0xb0] sm:$0xff]  ;;  %v9512_v60 = vpack.c.bf16 %v9491_v49, %v9488_v48  ;;  %v9525_v5 = vld [vmem:[%s9390_s20 + $0xc0] sm:$0xff]  ;;  %v9528_v6 = vld [vmem:[%s9390_s20 + $0xc8] sm:$0xff]  ;;  %v9696_v42 = vpack.c.bf16 %v9436_v23, %v9433_v22  ;;  %v11964_v21 = vrot.slane %v9450_v27, 2  ;;  %v11965_v14 = vrot.slane %v9447_v26, 2 }
  0x1a   : > { %11941 = vst [vmem:[#allocation8_spill] sm:$0xff] %v9498_v53  ;;  %v9520_v1 = vpack.c.bf16 %v9504_v55, %v9501_v54  ;;  %v9535_v20 = vld [vmem:[%s9390_s20 + $0xd8] sm:$0xff]  ;;  %v9538_v2 = vld [vmem:[%s9390_s20 + $0xe0] sm:$0xff]  ;;  %v9547_v56 = vld [vmem:[%s9390_s20 + $0xf0] sm:$0xff]  ;;  %v9596_v31 = vpack.c.bf16 %v9528_v6, %v9525_v5 }
  0x1b   : > { %11942 = vst [vmem:[#allocation9_spill] sm:$0xff] %v9512_v60  ;;  %v9550_v19 = vld [vmem:[%s9390_s20 + $0xf8] sm:$0xff]  ;;  %v9559_v43 = vld [vmem:[%s9390_s20 + $0x108] sm:$0xff]  ;;  %v9562_v18 = vld [vmem:[%s9390_s20 + $0x110] sm:$0xff]  ;;  %v9644_v52 = vpack.c.bf16 %v9538_v2, %v9535_v20 }
  0x1c   : > { %11943 = vst [vmem:[#allocation10_spill] sm:$0xff] %v9520_v1  ;;  %11944 = vst [vmem:[#allocation11_spill] sm:$0xff] %v9559_v43  ;;  %v9569_v34 = vld [vmem:[%s9390_s20 + $0x120] sm:$0xff]  ;;  %v9572_v35 = vld [vmem:[%s9390_s20 + $0x128] sm:$0xff]  ;;  %v9653_v46 = vpack.c.bf16 %v9550_v19, %v9547_v56  ;;  %v9668_v33 = vpack.c.bf16 %v9562_v18, %v9559_v43 }
  0x1d   : > { %11945 = vst [vmem:[#allocation12_spill] sm:$0xff] %v9569_v34  ;;  %v9579_v44 = vld [vmem:[%s9390_s20 + $0x138] sm:$0xff]  ;;  %v9582_v40 = vld [vmem:[%s9390_s20 + $0x140] sm:$0xff]  ;;  %v9589_v62 = vld [vmem:[%s9390_s20 + $0x150] sm:$0xff]  ;;  %v9672_v36 = vpack.c.bf16 %v9572_v35, %v9569_v34 }
  0x1e   : > { %v9592_v30 = vld [vmem:[%s9390_s20 + $0x158] sm:$0xff]  ;;  %11946 = vst [vmem:[#allocation13_spill] sm:$0xff] %v9596_v31  ;;  %v9601_v37 = vld [vmem:[%s9390_s20 + $0x168] sm:$0xff]  ;;  %v9604_v57 = vld [vmem:[%s9390_s20 + $0x170] sm:$0xff]  ;;  %v9685_v3 = vpack.c.bf16 %v9582_v40, %v9579_v44 }
  0x1f   : > { %7802 = vmatmul.mubr.msk.bf16.gmra.mrb[4].mxu0 %vm410_vm2, %v9455_v28  ;;  %v9609_v61 = vld [vmem:[%s9390_s20 + $0x10] sm:$0x3]  ;;  %v9612_v7 = vld [vmem:[%s9390_s20 + $0x40] sm:$0x3]  ;;  %v9619_v11 = vld [vmem:[%s9390_s20 + $0x58] sm:$0x3]  ;;  %v9689_v50 = vpack.c.bf16 %v9592_v30, %v9589_v62 }
  0x20   : > { %7805 = vmatprep.mubr.msk.bf16.mxu0 %vm410_vm2, %v9459_v29  ;;  %11947 = vst [vmem:[#allocation14_spill] sm:$0xff] %v9619_v11  ;;  %v9622_v63 = vld [vmem:[%s9390_s20 + $0x70] sm:$0x3]  ;;  %v9629_v0 = vld [vmem:[%s9390_s20 + $0x88] sm:$0x3]  ;;  %11948 = vst [vmem:[#allocation15_spill] sm:$0xff] %v9644_v52 }
  0x21   : > { %v9632_v58 = vld [vmem:[%s9390_s20 + $0xa0] sm:$0x3]  ;;  %v9637_v59 = vld [vmem:[%s9390_s20 + $0xb8] sm:$0x3]  ;;  %v9640_v51 = vld [vmem:[%s9390_s20 + $0xd0] sm:$0x3] }
  0x22   : > { %v9649_v45 = vld [vmem:[%s9390_s20 + $0xe8] sm:$0x3]  ;;  %11949 = vst [vmem:[#allocation16_spill] sm:$0xff] %v9653_v46  ;;  %v9658_v41 = vld [vmem:[%s9390_s20 + $0x100] sm:$0x3]  ;;  %11950 = vst [vmem:[#allocation17_spill] sm:$0xff] %v9668_v33 }
  0x23   : > { %11951 = vst [vmem:[#allocation18_spill] sm:$0xff] %v9672_v36  ;;  %11954 = vst [vmem:[#allocation19_spill] sm:$0xff] %v9679_v32  ;;  %v11960_v29 = vrot.slane %v9396_v9, 2  ;;  %v11962_v28 = vrot.slane %v9442_v25, 2  ;;  %v1101_v23 = vrot.slane %v9619_v11, 2  ;;  %v11971_v32 = vrot.slane %v9491_v49, 2 }
  0x24   : > { %11955 = vst [vmem:[#allocation20_spill] sm:$0xff] %v9685_v3  ;;  %11956 = vst [vmem:[#allocation21_spill] sm:$0xff] %v9689_v50 }
  0x25   : > { %11957 = vst [vmem:[#allocation22_spill] sm:$0xff] %v9696_v42  ;;  %v1106_v42 = vrot.slane %v9622_v63, 2 }
  0x27   : > { %7806 = vmatmul.mubr.msk.bf16.gmra.mrb[8].mxu0 %vm410_vm2, %v9498_v53  ;;  %v1096_v53 = vrot.slane %v9612_v7, 2 }
  0x28   : > { %7809 = vmatprep.mubr.msk.bf16.mxu0 %vm410_vm2, %v9512_v60 }
  0x2f   : > { %7810 = vmatmul.mubr.msk.bf16.gmra.mrb[12].mxu0 %vm410_vm2, %v9520_v1  ;;  %v11963_v1 = vrot.slane %v9439_v24, 2  ;;  %v11967_v24 = vrot.slane %v9475_v39, 2 }
  0x30   : > { %7813 = vmatprep.mubr.msk.bf16.mxu0 %vm410_vm2, %v9596_v31  ;;  %v1086_v31 = vrot.slane %v9609_v61, 2 }
  0x31   : > { %v1100_v22 = vsel %vm1082_vm3, %v11963_v1, %v11962_v28  ;;  %v11968_v28 = vrot.slane %v9472_v38, 2  ;;  %v11974_v38 = vrot.slane %v9450_v27, 2 }
  0x33   : > { %v1110_v1 = vsel %vm1082_vm3, %v11968_v28, %v11967_v24  ;;  %v1107_v24 = vsel %vm1082_vm3, %v11974_v38, %v1106_v42  ;;  %v11979_v38 = vrot.slane %v9528_v6, 2  ;;  %v11980_v42 = vrot.slane %v9525_v5, 2 }
  0x37   : > { %7814 = vmatmul.mubr.msk.bf16.gmra.mrb[16].mxu0 %vm410_vm2, %v9644_v52  ;;  %v9707_v52 = vsel %vm1082_vm3, %v11960_v29, %v1086_v31  ;;  %v11966_v29 = vmov %v11958_v47 }
  0x38   : > { %7817 = vmatprep.mubr.msk.bf16.mxu0 %vm410_vm2, %v9653_v46  ;;  %v11959_v46 = vrot.slane %v9414_v15, 2  ;;  %11961 = vst [vmem:[#allocation23_spill] sm:$0xff] %v9707_v52  ;;  %v1097_v31 = vsel %vm1082_vm3, %v11966_v29, %v1096_v53  ;;  %v11972_v53 = vrot.slane %v9488_v48, 2 }
  0x3a   : > { %v1095_v60 = vsel %vm1082_vm3, %v11959_v46, %v11958_v47  ;;  %v1105_v46 = vsel %vm1082_vm3, %v11965_v14, %v11964_v21  ;;  %v11970_v14 = vrot.slane %v9442_v25, 2  ;;  %v1111_v47 = vrot.slane %v9629_v0, 2 }
  0x3b   : > { %v9731_v11 = vpack.c.bf16 %v1097_v31, %v1095_v60  ;;  %v1115_v29 = vsel %vm1082_vm3, %v11972_v53, %v11971_v32  ;;  %v1116_v60 = vrot.slane %v9632_v58, 2  ;;  %v11975_v31 = vrot.slane %v9504_v55, 2 }
  0x3c   : > { %v1102_v21 = vsel %vm1082_vm3, %v11970_v14, %v1101_v23  ;;  %v11976_v23 = vrot.slane %v9501_v54, 2  ;;  %v9753_v14 = vpack.c.bf16 %v1107_v24, %v1105_v46  ;;  %v11978_v32 = vrot.slane %v9475_v39, 2 }
  0x3d   : > { %11969 = vst [vmem:[#allocation24_spill] sm:$0xff] %v9731_v11  ;;  %v9742_v52 = vpack.c.bf16 %v1102_v21, %v1100_v22  ;;  %v1121_v21 = vrot.slane %v9637_v59, 2  ;;  %v1125_v53 = vsel %vm1082_vm3, %v11980_v42, %v11979_v38  ;;  %v11982_v24 = vrot.slane %v9491_v49, 2  ;;  %v9783_v38 = vld [vmem:[%s9390_s20 + $0x130] sm:$0x3] }
  0x3e   : > { %v1120_v28 = vsel %vm1082_vm3, %v11976_v23, %v11975_v31  ;;  %11977 = vst [vmem:[#allocation26_spill] sm:$0xff] %v9753_v14  ;;  %v1112_v22 = vsel %vm1082_vm3, %v11978_v32, %v1111_v47  ;;  %v9767_v31 = vld [vmem:[%s9390_s20 + $0x118] sm:$0x3]  ;;  %v1126_v47 = vrot.slane %v9640_v51, 2  ;;  %v11983_v32 = vrot.slane %v9538_v2, 2 }
  0x3f   : > { %11973 = vst [vmem:[#allocation25_spill] sm:$0xff] %v9742_v52  ;;  %7818 = vmatmul.mubr.msk.bf16.gmra.mrb[20].mxu0 %vm410_vm2, %v9668_v33  ;;  %v9769_v46 = vpack.c.bf16 %v1112_v22, %v1110_v1  ;;  %v1117_v23 = vsel %vm1082_vm3, %v11982_v24, %v1116_v60  ;;  %v11984_v14 = vrot.slane %v9535_v20, 2  ;;  %v11986_v1 = vrot.slane %v9504_v55, 2 }
  0x40   : > { %7821 = vmatprep.mubr.msk.bf16.mxu0 %vm410_vm2, %v9672_v36  ;;  %v9785_v42 = vpack.c.bf16 %v1117_v23, %v1115_v29  ;;  %v1131_v60 = vrot.slane %v9649_v45, 2  ;;  %v11987_v24 = vrot.slane %v9550_v19, 2  ;;  %v11988_v33 = vrot.slane %v9547_v56, 2 }
  0x41   : > { %11981 = vst [vmem:[#allocation27_spill] sm:$0xff] %v9769_v46  ;;  %v1130_v52 = vsel %vm1082_vm3, %v11984_v14, %v11983_v32  ;;  %v1122_v22 = vsel %vm1082_vm3, %v11986_v1, %v1121_v21  ;;  %v9797_v32 = vld [vmem:[%s9390_s20 + $0x148] sm:$0x3]  ;;  %v11990_v29 = vrot.slane %v9528_v6, 2  ;;  %v1136_v21 = vrot.slane %v9658_v41, 2 }
  0x42   : > { %11985 = vst [vmem:[#allocation28_spill] sm:$0xff] %v9785_v42  ;;  %v1135_v14 = vsel %vm1082_vm3, %v11988_v33, %v11987_v24  ;;  %v9799_v36 = vpack.c.bf16 %v1122_v22, %v1120_v28  ;;  %v11991_v1 = vrot.slane %v9562_v18, 2  ;;  %v11992_v42 = vrot.slane %v9559_v43, 2 }
  0x43   : > { %v1127_v23 = vsel %vm1082_vm3, %v11990_v29, %v1126_v47  ;;  %v11994_v33 = vrot.slane %v9538_v2, 2  ;;  %v1141_v22 = vrot.slane %v9767_v31, 2  ;;  %v11995_v24 = vrot.slane %v9572_v35, 2 }
  0x44   : > { %11989 = vst [vmem:[#allocation29_spill] sm:$0xff] %v9799_v36  ;;  %v1140_v46 = vsel %vm1082_vm3, %v11992_v42, %v11991_v1  ;;  %v9810_v11 = vpack.c.bf16 %v1127_v23, %v1125_v53  ;;  %v11996_v47 = vrot.slane %v9569_v34, 2  ;;  %v11997_v43 = vrot.slane %v9550_v19, 2 }
  0x45   : > { %v1132_v28 = vsel %vm1082_vm3, %v11994_v33, %v1131_v60  ;;  %v1146_v53 = vrot.slane %v9783_v38, 2  ;;  %v11998_v23 = vrot.slane %v9582_v40, 2  ;;  %v11999_v60 = vrot.slane %v9579_v44, 2 }
  0x46   : > { %11993 = vst [vmem:[#allocation30_spill] sm:$0xff] %v9810_v11  ;;  %v1145_v29 = vsel %vm1082_vm3, %v11996_v47, %v11995_v24  ;;  %v9821_v36 = vpack.c.bf16 %v1132_v28, %v1130_v52  ;;  %v1137_v42 = vsel %vm1082_vm3, %v11997_v43, %v1136_v21  ;;  %v9834_v11 = vld [vmem:[%s9390_s20 + $0x160] sm:$0x3]  ;;  %v12000_v52 = vrot.slane %v9562_v18, 2  ;;  %v9843_v21 = vld [vmem:[%s9390_s20 + $0x178] sm:$0x3] }
  0x47   : > { %v1150_v1 = vsel %vm1082_vm3, %v11999_v60, %v11998_v23  ;;  %v9836_v34 = vpack.c.bf16 %v1137_v42, %v1135_v14  ;;  %v1151_v43 = vrot.slane %v9797_v32, 2  ;;  %v12001_v47 = vrot.slane %v9572_v35, 2  ;;  %7822 = vmatmul.mubr.msk.bf16.gmra.mrb[24].mxu0 %vm410_vm2, %v9685_v3 }
  0x48   : > { %v1142_v28 = vsel %vm1082_vm3, %v12000_v52, %v1141_v22  ;;  %v12002_v33 = vrot.slane %v9582_v40, 2  ;;  %v12005_v52 = vrot.slane %v9589_v62, 2  ;;  %7825 = vmatprep.mubr.msk.bf16.mxu0 %vm410_vm2, %v9689_v50  ;;  %v12012_v50 = vrot.slane %v9592_v30, 2 }
  0x49   : > { %v9845_v24 = vpack.c.bf16 %v1142_v28, %v1140_v46  ;;  %v1147_v23 = vsel %vm1082_vm3, %v12001_v47, %v1146_v53  ;;  %v12004_v46 = vrot.slane %v9592_v30, 2  ;;  %v1161_v47 = vrot.slane %v9843_v21, 2 }
  0x4a   : > { %v9850_v60 = vpack.c.bf16 %v1147_v23, %v1145_v29  ;;  %v1152_v14 = vsel %vm1082_vm3, %v12002_v33, %v1151_v43  ;;  %v1156_v29 = vrot.slane %v9834_v11, 2  ;;  %v12006_v33 = vrot.slane %v9604_v57, 2 }
  0x4b   : > { %v9858_v42 = vpack.c.bf16 %v1152_v14, %v1150_v1  ;;  %v1155_v28 = vsel %vm1082_vm3, %v12005_v52, %v12004_v46  ;;  %v12007_v43 = vrot.slane %v9601_v37, 2  ;;  %v12008_v23 = vrot.slane %v9396_v9, 1 }
  0x4c   : > { %v12009_v14 = vrot.slane %v9393_v8, 1  ;;  %v12010_v52 = vrot.slane %v9609_v61, 1  ;;  %v1157_v3 = vsel %vm1082_vm3, %v12012_v50, %v1156_v29  ;;  %v9895_v8 = vpack.c.bf16 %v9604_v57, %v9601_v37 }
  0x4d   : > { %12003 = vst [vmem:[#allocation31_spill] sm:$0xff] %v9858_v42  ;;  %v1160_v1 = vsel %vm1082_vm3, %v12007_v43, %v12006_v33  ;;  %v12011_v22 = vmov %v12008_v23  ;;  %v9888_v42 = vpack.c.bf16 %v1157_v3, %v1155_v28  ;;  %v1162_v43 = vsel %vm1082_vm3, %v12006_v33, %v1161_v47  ;;  %v6698_v47 = vld [vmem:[%s11878_s1 + $0x6] sm:$0x3] }
  0x4e   : > { %v710_v46 = vsel %vm707_vm4, %v12009_v14, %v12008_v23  ;;  %v712_v53 = vsel %vm707_vm4, %v12011_v22, %v12010_v52  ;;  %v9897_v23 = vpack.c.bf16 %v1162_v43, %v1160_v1  ;;  %v12013_v9 = vrot.slane %v9404_v12, 1 }
  0x4f   : > { %v820_v61 = vpack.c.bf16 %v712_v53, %v710_v46  ;;  %7826 = vmatmul.mubr.msk.bf16.gmra.mrb[28].mxu0 %vm410_vm2, %v9895_v8  ;;  %v12014_v50 = vrot.slane %v9399_v10, 1  ;;  %v12015_v22 = vrot.slane %v9407_v13, 1  ;;  %v781_v1 = vrot.slane %v9834_v11, 1 }
  0x50   : > { %v12016_v28 = vmov %v12013_v9  ;;  %v786_v53 = vrot.slane %v9843_v21, 1  ;;  %v12017_v10 = vrot.slane %v9417_v16, 1  ;;  %v12018_v14 = vrot.slane %v9414_v15, 1 }
  0x51   : > { %v715_v3 = vsel %vm707_vm4, %v12014_v50, %v12013_v9  ;;  %v717_v29 = vsel %vm707_vm4, %v12016_v28, %v12015_v22  ;;  %7831 = vmatprep.mubr.msk.bf16.mxu0 %vm410_vm2, %v820_v61  ;;  %v12019_v12 = vrot.slane %v9612_v7, 1  ;;  %v1464_v21 = vand.u32 %v6698_v47, %v9377_v4  ;;  %v12022_v7 = vld [vmem:[#allocation4_spill] sm:$0xff]  ;;  %v12024_v61 = vld [vmem:[#allocation14_spill] sm:$0xff] }
  0x52   : > { %v720_v13 = vsel %vm707_vm4, %v12018_v14, %v12017_v10  ;;  %v12020_v46 = vmov %v12017_v10  ;;  %v9927_v33 = vpack.c.bf16 %v717_v29, %v715_v3  ;;  %v12021_v15 = vrot.slane %v9442_v25, 1 }
  0x53   : > { %v722_v52 = vsel %vm707_vm4, %v12020_v46, %v12019_v12  ;;  %v12023_v16 = vrot.slane %v12022_v7, 1  ;;  %v12025_v9 = vrot.slane %v12024_v61, 1  ;;  %v12027_v22 = vrot.slane %v9450_v27, 1 }
  0x54   : > { %v9929_v11 = vpack.c.bf16 %v722_v52, %v720_v13  ;;  %v12026_v50 = vmov %v12021_v15  ;;  %v12028_v28 = vrot.slane %v9447_v26, 1  ;;  %v12029_v29 = vrot.slane %v9622_v63, 1  ;;  %v12032_v26 = vld [vmem:[#allocation7_spill] sm:$0xff] }
  0x55   : > { %v725_v43 = vsel %vm707_vm4, %v12023_v16, %v12021_v15  ;;  %v727_v3 = vsel %vm707_vm4, %v12026_v50, %v12025_v9  ;;  %v12030_v47 = vmov %v12027_v22  ;;  %v12031_v25 = vrot.slane %v9475_v39, 1 }
  0x56   : > { %v732_v10 = vsel %vm707_vm4, %v12030_v47, %v12029_v29  ;;  %v9957_v14 = vpack.c.bf16 %v727_v3, %v725_v43  ;;  %v12033_v12 = vrot.slane %v12032_v26, 1  ;;  %v12034_v27 = vrot.slane %v9629_v0, 1 }
  0x57   : > { %7832 = vmatmul.mubr.msk.bf16.vlgmr.msra.gmra.mrb[0].mxu0 %vm410_vm2, %v9927_v33  ;;  %v12035_v46 = vmov %v12031_v25  ;;  %v12036_v15 = vrot.slane %v9491_v49, 1  ;;  %v12037_v7 = vrot.slane %v9488_v48, 1  ;;  %v12038_v43 = vrot.slane %v9632_v58, 1 }
  0x58   : > { %7864 = vmatpush3.bf16.msra.mxu0 %v9420_v17  ;;  %7835 = vmatprep.mubr.msk.bf16.mxu0 %vm410_vm2, %v9929_v11  ;;  %v730_v17 = vsel %vm707_vm4, %v12028_v28, %v12027_v22  ;;  %v735_v63 = vsel %vm707_vm4, %v12033_v12, %v12031_v25  ;;  %v737_v52 = vsel %vm707_vm4, %v12035_v46, %v12034_v27  ;;  %v12040_v39 = vrot.slane %v9504_v55, 1 }
  0x59   : > { %7897 = vmatprep.subr.bf16.mxu0 %v1464_v21  ;;  %v9959_v13 = vpack.c.bf16 %v732_v10, %v730_v17  ;;  %v740_v16 = vsel %vm707_vm4, %v12037_v7, %v12036_v15  ;;  %v12039_v61 = vmov %v12036_v15  ;;  %v9985_v50 = vpack.c.bf16 %v737_v52, %v735_v63 }
  0x5a   : > { %v742_v9 = vsel %vm707_vm4, %v12039_v61, %v12038_v43  ;;  %v12041_v48 = vrot.slane %v9501_v54, 1  ;;  %v12042_v49 = vrot.slane %v9637_v59, 1  ;;  %v12043_v0 = vmov %v12040_v39 }
  0x5b   : > { %v9987_v3 = vpack.c.bf16 %v742_v9, %v740_v16  ;;  %v12044_v28 = vrot.slane %v9528_v6, 1  ;;  %v12045_v17 = vrot.slane %v9525_v5, 1  ;;  %v12046_v47 = vrot.slane %v9640_v51, 1 }
  0x5c   : > { %v745_v58 = vsel %vm707_vm4, %v12041_v48, %v12040_v39  ;;  %v747_v22 = vsel %vm707_vm4, %v12043_v0, %v12042_v49  ;;  %v12048_v55 = vrot.slane %v9538_v2, 1  ;;  %v12049_v59 = vrot.slane %v9535_v20, 1  ;;  %v12062_v39 = vld [vmem:[#allocation12_spill] sm:$0xff] }
  0x5d   : > { %v750_v29 = vsel %vm707_vm4, %v12045_v17, %v12044_v28  ;;  %v12047_v10 = vmov %v12044_v28  ;;  %v10013_v25 = vpack.c.bf16 %v747_v22, %v745_v58  ;;  %v12050_v5 = vrot.slane %v9649_v45, 1 }
  0x5e   : > { %v752_v54 = vsel %vm707_vm4, %v12047_v10, %v12046_v47  ;;  %v755_v51 = vsel %vm707_vm4, %v12049_v59, %v12048_v55  ;;  %v12051_v6 = vmov %v12048_v55  ;;  %v12052_v63 = vrot.slane %v9550_v19, 1 }
  0x5f   : > { %7836 = vmatmul.mubr.msk.bf16.gmra.mrb[4].mxu0 %vm410_vm2, %v9957_v14  ;;  %v10015_v26 = vpack.c.bf16 %v752_v54, %v750_v29  ;;  %v757_v12 = vsel %vm707_vm4, %v12051_v6, %v12050_v5  ;;  %v12053_v27 = vrot.slane %v9547_v56, 1  ;;  %v12054_v52 = vrot.slane %v9658_v41, 1  ;;  %v12057_v56 = vld [vmem:[#allocation11_spill] sm:$0xff] }
  0x60   : > { %7839 = vmatprep.mubr.msk.bf16.mxu0 %vm410_vm2, %v9959_v13  ;;  %v12055_v15 = vmov %v12052_v63  ;;  %v10041_v7 = vpack.c.bf16 %v757_v12, %v755_v51  ;;  %v12056_v45 = vrot.slane %v9562_v18, 1  ;;  %v12058_v2 = vrot.slane %v12057_v56, 1  ;;  %v12076_v12 = vld [vmem:[#allocation23_spill] sm:$0xff]  ;;  %v12085_v56 = vld [vmem:[#allocation29_spill] sm:$0xff] }
  0x61   : > { %v760_v46 = vsel %vm707_vm4, %v12053_v27, %v12052_v63  ;;  %v762_v20 = vsel %vm707_vm4, %v12055_v15, %v12054_v52  ;;  %v12059_v19 = vrot.slane %v9767_v31, 1  ;;  %v12061_v9 = vrot.slane %v9572_v35, 1  ;;  %v12077_v63 = vld [vmem:[#allocation19_spill] sm:$0xff]  ;;  %v12079_v52 = vld [vmem:[#allocation22_spill] sm:$0xff] }
  0x62   : > { %v10043_v16 = vpack.c.bf16 %v762_v20, %v760_v46  ;;  %v765_v41 = vsel %vm707_vm4, %v12058_v2, %v12056_v45  ;;  %v12060_v43 = vmov %v12056_v45  ;;  %v12063_v48 = vrot.slane %v12062_v39, 1  ;;  %v12082_v15 = vld [vmem:[#allocation26_spill] sm:$0xff]  ;;  %v12083_v20 = vld [vmem:[#allocation27_spill] sm:$0xff]  ;;  %v12084_v45 = vld [vmem:[#allocation28_spill] sm:$0xff] }
  0x63   : > { %v767_v61 = vsel %vm707_vm4, %v12060_v43, %v12059_v19  ;;  %v12064_v49 = vrot.slane %v9783_v38, 1  ;;  %v12065_v0 = vmov %v12061_v9  ;;  %v12066_v18 = vrot.slane %v9582_v40, 1  ;;  %v12087_v2 = vld [vmem:[#allocation31_spill] sm:$0xff]  ;;  %v12091_v39 = vld [vmem:[#allocation6_spill] sm:$0xff] }
  0x64   : > { %v770_v58 = vsel %vm707_vm4, %v12063_v48, %v12061_v9  ;;  %v10069_v28 = vpack.c.bf16 %v767_v61, %v765_v41  ;;  %v12067_v31 = vrot.slane %v9579_v44, 1  ;;  %v12068_v35 = vrot.slane %v9797_v32, 1  ;;  %v12088_v41 = vld [vmem:[#allocation2_spill] sm:$0xff]  ;;  %v6732_v19 = vld [vmem:[%s11878_s1 + $0xa] sm:$0x3]  ;;  %v12090_v9 = vld [vmem:[#allocation5_spill] sm:$0xff] }
  0x65   : > { %v772_v22 = vsel %vm707_vm4, %v12065_v0, %v12064_v49  ;;  %v12069_v29 = vmov %v12066_v18  ;;  %v12070_v10 = vrot.slane %v9592_v30, 1  ;;  %v12071_v54 = vrot.slane %v9589_v62, 1  ;;  %v12089_v61 = vld [vmem:[#allocation3_spill] sm:$0xff]  ;;  %v12092_v48 = vld [vmem:[#allocation8_spill] sm:$0xff]  ;;  %v12094_v49 = vld [vmem:[#allocation10_spill] sm:$0xff] }
  0x66   : > { %v10071_v17 = vpack.c.bf16 %v772_v22, %v770_v58  ;;  %v775_v38 = vsel %vm707_vm4, %v12067_v31, %v12066_v18  ;;  %v777_v47 = vsel %vm707_vm4, %v12069_v29, %v12068_v35  ;;  %v12073_v40 = vrot.slane %v9604_v57, 1  ;;  %v12080_v57 = vld [vmem:[#allocation24_spill] sm:$0xff]  ;;  %v12093_v58 = vld [vmem:[#allocation9_spill] sm:$0xff]  ;;  %v12096_v22 = vld [vmem:[#allocation15_spill] sm:$0xff] }
  0x67   : > { %7840 = vmatmul.mubr.msk.bf16.gmra.mrb[8].mxu0 %vm410_vm2, %v9985_v50  ;;  %v780_v55 = vsel %vm707_vm4, %v12071_v54, %v12070_v10  ;;  %v12072_v59 = vmov %v12070_v10  ;;  %v10095_v5 = vpack.c.bf16 %v777_v47, %v775_v38  ;;  %v12074_v62 = vrot.slane %v9601_v37, 1  ;;  %v6715_v37 = vld [vmem:[%s11878_s1 + $0x8] sm:$0x3]  ;;  %v12095_v0 = vld [vmem:[#allocation13_spill] sm:$0xff]  ;;  %v12097_v18 = vld [vmem:[#allocation16_spill] sm:$0xff] }
  0x68   : > { %7843 = vmatprep.mubr.msk.bf16.mxu0 %vm410_vm2, %v9987_v3  ;;  %v782_v51 = vsel %vm707_vm4, %v12072_v59, %v781_v1  ;;  %v12075_v30 = vmov %v12073_v40  ;;  %v12078_v27 = vpack.c.bf16 %v12076_v12, %v12077_v63  ;;  %v1676_v46 = vand.u32 %v6715_v37, %v9377_v4  ;;  %v12098_v31 = vld [vmem:[#allocation17_spill] sm:$0xff]  ;;  %v12099_v38 = vld [vmem:[#allocation18_spill] sm:$0xff]  ;;  %v12100_v35 = vld [vmem:[#allocation20_spill] sm:$0xff] }
  0x69   : > { %v10097_v44 = vpack.c.bf16 %v782_v51, %v780_v55  ;;  %v785_v32 = vsel %vm707_vm4, %v12074_v62, %v12073_v40  ;;  %v787_v1 = vsel %vm707_vm4, %v12075_v30, %v786_v53  ;;  %v12081_v53 = vld [vmem:[#allocation25_spill] sm:$0xff]  ;;  %v1885_v43 = vand.u32 %v6732_v19, %v9377_v4  ;;  %v380_v29 = vld [vmem:[%s9390_s20 + $0x180] sm:$0xff]  ;;  %v381_v47 = vld [vmem:[%s9390_s20 + $0x188] sm:$0xff] }
  0x6a   : > { %v10111_v6 = vpack.c.bf16 %v787_v1, %v785_v32  ;;  %v1871_v10 = vrot.slane %v380_v29, 2  ;;  %v1872_v54 = vrot.slane %v381_v47, 2  ;;  %v12101_v55 = vld [vmem:[#allocation21_spill] sm:$0xff]  ;;  %v382_v59 = vld [vmem:[%s9390_s20 + $0x190] sm:$0x3]  ;;  %v10192_v32 = vpack.c.bf16 %v381_v47, %v380_v29 }
  0x6b   : > { %v1874_v40 = vrot.slane %v382_v59, 2  ;;  %v6749_v1 = vld [vmem:[%s11878_s1 + $0xc] sm:$0x3]  ;;  %v1663_v63 = vrot.slane %v381_v47, 1  ;;  %v6766_v19 = vld [vmem:[%s11878_s1 + $0xe] sm:$0x3] }
  0x6c   : > { %v1873_v51 = vsel %vm1082_vm3, %v1871_v10, %v1872_v54  ;;  %v2087_v12 = vand.u32 %v6749_v1, %v9377_v4 }
  0x6d   : > { %v1875_v62 = vsel %vm1082_vm3, %v1872_v54, %v1874_v40 }
  0x6e   : > { %v10194_v30 = vpack.c.bf16 %v1875_v62, %v1873_v51  ;;  %v9109_v51 = vld [vmem:[%s11880_s3 + $0x100] sm:$0xff]  }
  0x6f   : > { %7844 = vmatmul.mubr.msk.bf16.gmra.mrb[12].mxu0 %vm410_vm2, %v10013_v25 }
  0x70   : > { %7847 = vmatprep.mubr.msk.bf16.mxu0 %vm410_vm2, %v10015_v26 }
  0x77   : > { %7848 = vmatmul.mubr.msk.bf16.gmra.mrb[16].mxu0 %vm410_vm2, %v10041_v7 }
  0x78   : > { %7851 = vmatprep.mubr.msk.bf16.mxu0 %vm410_vm2, %v10043_v16 }
  0x7f   : > { %7852 = vmatmul.mubr.msk.bf16.gmra.mrb[20].mxu0 %vm410_vm2, %v10069_v28 }
  0x80   : > { %7855 = vmatprep.mubr.msk.bf16.mxu0 %vm410_vm2, %v10071_v17 }
  0x87   : > { %7856 = vmatmul.mubr.msk.bf16.gmra.mrb[24].mxu0 %vm410_vm2, %v10095_v5 }
  0x88   : > { %7859 = vmatprep.mubr.msk.bf16.mxu0 %vm410_vm2, %v10097_v44 }
  0x8f   : > { %7860 = vmatmul.mubr.msk.bf16.gmra.mrb[28].mxu0 %vm410_vm2, %v10111_v6 }
  0x90   : > { %7865 = vmatprep.mubr.msk.bf16.mxu0 %vm410_vm2, %v12078_v27  ;;  %v1665_v27 = vrot.slane %v382_v59, 1 }
  0x97   : > { %7866 = vmatmul.mubr.msk.bf16.vlgmr.msra.gmra.mrb[0].mxu0 %vm410_vm2, %v12079_v52 }
  0x98   : > { %7898 = vmatpush3.bf16.msra.mxu0 %v1464_v21  ;;  %7869 = vmatprep.mubr.msk.bf16.mxu0 %vm410_vm2, %v12080_v57  ;;  %v12086_v21 = vld [vmem:[#allocation30_spill] sm:$0xff] }
  0x99   : > { %7931 = vmatprep.subr.bf16.mxu0 %v1676_v46 }
  0x9f   : > { %7870 = vmatmul.mubr.msk.bf16.gmra.mrb[4].mxu0 %vm410_vm2, %v12081_v53 }
  0xa0   : > { %7873 = vmatprep.mubr.msk.bf16.mxu0 %vm410_vm2, %v12082_v15 }
  0xa7   : > { %7874 = vmatmul.mubr.msk.bf16.gmra.mrb[8].mxu0 %vm410_vm2, %v12083_v20 }
  0xa8   : > { %7877 = vmatprep.mubr.msk.bf16.mxu0 %vm410_vm2, %v12084_v45 }
  0xaf   : > { %7878 = vmatmul.mubr.msk.bf16.gmra.mrb[12].mxu0 %vm410_vm2, %v12085_v56 }
  0xb0   : > { %7881 = vmatprep.mubr.msk.bf16.mxu0 %vm410_vm2, %v12086_v21 }
  0xb7   : > { %7882 = vmatmul.mubr.msk.bf16.gmra.mrb[16].mxu0 %vm410_vm2, %v9821_v36 }
  0xb8   : > { %7885 = vmatprep.mubr.msk.bf16.mxu0 %vm410_vm2, %v9836_v34 }
  0xbf   : > { %7886 = vmatmul.mubr.msk.bf16.gmra.mrb[20].mxu0 %vm410_vm2, %v9845_v24 }
  0xc0   : > { %7889 = vmatprep.mubr.msk.bf16.mxu0 %vm410_vm2, %v9850_v60 }
  0xc7   : > { %7890 = vmatmul.mubr.msk.bf16.gmra.mrb[24].mxu0 %vm410_vm2, %v12087_v2 }
  0xc8   : > { %7893 = vmatprep.mubr.msk.bf16.mxu0 %vm410_vm2, %v9888_v42 }
  0xcf   : > { %7894 = vmatmul.mubr.msk.bf16.gmra.mrb[28].mxu0 %vm410_vm2, %v9897_v23 }
  0xd0   : > { %7899 = vmatprep.mubr.msk.bf16.mxu0 %vm410_vm2, %v12088_v41 }
  0xd7   : > { %7900 = vmatmul.mubr.msk.bf16.vlgmr.msra.gmra.mrb[0].mxu0 %vm410_vm2, %v12089_v61 }
  0xd8   : > { %7932 = vmatpush3.bf16.msra.mxu0 %v1676_v46  ;;  %7903 = vmatprep.mubr.msk.bf16.mxu0 %vm410_vm2, %v12090_v9  ;;  %v1666_v46 = vsel %vm707_vm4, %v1663_v63, %v1665_v27 }
  0xd9   : > { %7965 = vmatprep.subr.bf16.mxu0 %v1885_v43 }
  0xdf   : > { %7904 = vmatmul.mubr.msk.bf16.gmra.mrb[4].mxu0 %vm410_vm2, %v12091_v39 }
  0xe0   : > { %7907 = vmatprep.mubr.msk.bf16.mxu0 %vm410_vm2, %v12092_v48 }
  0xe7   : > { %7908 = vmatmul.mubr.msk.bf16.gmra.mrb[8].mxu0 %vm410_vm2, %v12093_v58 }
  0xe8   : > { %7911 = vmatprep.mubr.msk.bf16.mxu0 %vm410_vm2, %v12094_v49 }
  0xef   : > { %7912 = vmatmul.mubr.msk.bf16.gmra.mrb[12].mxu0 %vm410_vm2, %v12095_v0 }
  0xf0   : > { %7915 = vmatprep.mubr.msk.bf16.mxu0 %vm410_vm2, %v12096_v22 }
  0xf7   : > { %7916 = vmatmul.mubr.msk.bf16.gmra.mrb[16].mxu0 %vm410_vm2, %v12097_v18 }
  0xf8   : > { %7919 = vmatprep.mubr.msk.bf16.mxu0 %vm410_vm2, %v12098_v31 }
  0xff   : > { %7920 = vmatmul.mubr.msk.bf16.gmra.mrb[20].mxu0 %vm410_vm2, %v12099_v38 }
 0x100   : > { %7923 = vmatprep.mubr.msk.bf16.mxu0 %vm410_vm2, %v12100_v35 }
 0x107   : > { %7924 = vmatmul.mubr.msk.bf16.gmra.mrb[24].mxu0 %vm410_vm2, %v12101_v55 }
 0x108   : > { %7927 = vmatprep.mubr.msk.bf16.mxu0 %vm410_vm2, %v9895_v8 }
 0x10f   : > { %7928 = vmatmul.mubr.msk.bf16.gmra.mrb[28].mxu0 %vm410_vm2, %v10192_v32 }
 0x110   : > { %7933 = vmatprep.mubr.msk.bf16.mxu0 %vm410_vm2, %v9927_v33  ;;  %v1662_v33 = vrot.slane %v380_v29, 1 }
 0x112   : > { %v1664_v37 = vsel %vm707_vm4, %v1662_v33, %v1663_v63 }
 0x113   : > { %v10234_v41 = vpack.c.bf16 %v1666_v46, %v1664_v37 }
 0x117   : > { %7934 = vmatmul.mubr.msk.bf16.vlgmr.msra.gmra.mrb[0].mxu0 %vm410_vm2, %v9929_v11 }
 0x118   : > { %7966 = vmatpush3.bf16.msra.mxu0 %v1885_v43  ;;  %7937 = vmatprep.mubr.msk.bf16.mxu0 %vm410_vm2, %v9957_v14  ;;  %v2299_v43 = vand.u32 %v6766_v19, %v9377_v4 }
 0x119   : > { %7999 = vmatprep.subr.bf16.mxu0 %v2087_v12 }
 0x11f   : > { %7938 = vmatmul.mubr.msk.bf16.gmra.mrb[4].mxu0 %vm410_vm2, %v9959_v13 }
 0x120   : > { %7941 = vmatprep.mubr.msk.bf16.mxu0 %vm410_vm2, %v9985_v50 }
 0x127   : > { %7942 = vmatmul.mubr.msk.bf16.gmra.mrb[8].mxu0 %vm410_vm2, %v9987_v3 }
 0x128   : > { %7945 = vmatprep.mubr.msk.bf16.mxu0 %vm410_vm2, %v10013_v25 }
 0x12f   : > { %7946 = vmatmul.mubr.msk.bf16.gmra.mrb[12].mxu0 %vm410_vm2, %v10015_v26 }
 0x130   : > { %7949 = vmatprep.mubr.msk.bf16.mxu0 %vm410_vm2, %v10041_v7 }
 0x137   : > { %7950 = vmatmul.mubr.msk.bf16.gmra.mrb[16].mxu0 %vm410_vm2, %v10043_v16 }
 0x138   : > { %7953 = vmatprep.mubr.msk.bf16.mxu0 %vm410_vm2, %v10069_v28 }
 0x13f   : > { %7954 = vmatmul.mubr.msk.bf16.gmra.mrb[20].mxu0 %vm410_vm2, %v10071_v17 }
 0x140   : > { %7957 = vmatprep.mubr.msk.bf16.mxu0 %vm410_vm2, %v10095_v5 }
 0x147   : > { %7958 = vmatmul.mubr.msk.bf16.gmra.mrb[24].mxu0 %vm410_vm2, %v10097_v44 }
 0x148   : > { %7961 = vmatprep.mubr.msk.bf16.mxu0 %vm410_vm2, %v10111_v6 }
 0x14f   : > { %7962 = vmatmul.mubr.msk.bf16.gmra.mrb[28].mxu0 %vm410_vm2, %v10234_v41 }
 0x150   : > { %7967 = vmatprep.mubr.msk.bf16.mxu0 %vm410_vm2, %v12079_v52  ;;  %v6783_v52 = vld [vmem:[%s11878_s1 + $0x10] sm:$0x3] }
 0x151   : > { %v2508_v29 = vand.u32 %v6783_v52, %v9377_v4  ;;  %v383_v4 = vld [vmem:[%s9390_s20 + $0x198] sm:$0xff] }
 0x157   : > { %7968 = vmatmul.mubr.msk.bf16.vlgmr.msra.gmra.mrb[0].mxu0 %vm410_vm2, %v12080_v57 }
 0x158   : > { %8000 = vmatpush3.bf16.msra.mxu0 %v2087_v12  ;;  %7971 = vmatprep.mubr.msk.bf16.mxu0 %vm410_vm2, %v12081_v53 }
 0x159   : > { %8033 = vmatprep.subr.bf16.mxu0 %v2299_v43 }
 0x15f   : > { %7972 = vmatmul.mubr.msk.bf16.gmra.mrb[4].mxu0 %vm410_vm2, %v12082_v15 }
 0x160   : > { %7975 = vmatprep.mubr.msk.bf16.mxu0 %vm410_vm2, %v12083_v20 }
 0x167   : > { %7976 = vmatmul.mubr.msk.bf16.gmra.mrb[8].mxu0 %vm410_vm2, %v12084_v45 }
 0x168   : > { %7979 = vmatprep.mubr.msk.bf16.mxu0 %vm410_vm2, %v12085_v56 }
 0x16f   : > { %7980 = vmatmul.mubr.msk.bf16.gmra.mrb[12].mxu0 %vm410_vm2, %v12086_v21 }
 0x170   : > { %7983 = vmatprep.mubr.msk.bf16.mxu0 %vm410_vm2, %v9821_v36 }
 0x177   : > { %7984 = vmatmul.mubr.msk.bf16.gmra.mrb[16].mxu0 %vm410_vm2, %v9836_v34 }
 0x178   : > { %7987 = vmatprep.mubr.msk.bf16.mxu0 %vm410_vm2, %v9845_v24 }
 0x17f   : > { %7988 = vmatmul.mubr.msk.bf16.gmra.mrb[20].mxu0 %vm410_vm2, %v9850_v60 }
 0x180   : > { %7991 = vmatprep.mubr.msk.bf16.mxu0 %vm410_vm2, %v12087_v2 }
 0x187   : > { %7992 = vmatmul.mubr.msk.bf16.gmra.mrb[24].mxu0 %vm410_vm2, %v9888_v42 }
 0x188   : > { %7995 = vmatprep.mubr.msk.bf16.mxu0 %vm410_vm2, %v9897_v23 }
 0x18f   : > { %7996 = vmatmul.mubr.msk.bf16.gmra.mrb[28].mxu0 %vm410_vm2, %v10194_v30 }
 0x190   : > { %8001 = vmatprep.mubr.msk.bf16.mxu0 %vm410_vm2, %v12089_v61  ;;  %v384_v61 = vld [vmem:[%s9390_s20 + $0x1a0] sm:$0xff] }
 0x197   : > { %8002 = vmatmul.mubr.msk.bf16.vlgmr.msra.gmra.mrb[0].mxu0 %vm410_vm2, %v12090_v9  ;;  %v2494_v9 = vrot.slane %v383_v4, 2 }
 0x198   : > { %8034 = vmatpush3.bf16.msra.mxu0 %v2299_v43  ;;  %8005 = vmatprep.mubr.msk.bf16.mxu0 %vm410_vm2, %v12091_v39  ;;  %v2495_v39 = vrot.slane %v384_v61, 2 }
 0x199   : > { %8067 = vmatprep.subr.bf16.mxu0 %v2508_v29 }
 0x19f   : > { %8006 = vmatmul.mubr.msk.bf16.gmra.mrb[4].mxu0 %vm410_vm2, %v12092_v48  ;;  %v385_v48 = vld [vmem:[%s9390_s20 + $0x1a8] sm:$0x3] }
 0x1a0   : > { %8009 = vmatprep.mubr.msk.bf16.mxu0 %vm410_vm2, %v12093_v58  ;;  %v2496_v58 = vsel %vm1082_vm3, %v2494_v9, %v2495_v39 }
 0x1a7   : > { %8010 = vmatmul.mubr.msk.bf16.gmra.mrb[8].mxu0 %vm410_vm2, %v12094_v49  ;;  %v2497_v49 = vrot.slane %v385_v48, 2 }
 0x1a8   : > { %8013 = vmatprep.mubr.msk.bf16.mxu0 %vm410_vm2, %v12095_v0 }
 0x1a9   : > { %v2498_v0 = vsel %vm1082_vm3, %v2495_v39, %v2497_v49 }
 0x1af   : > { %8014 = vmatmul.mubr.msk.bf16.gmra.mrb[12].mxu0 %vm410_vm2, %v12096_v22  ;;  %v2080_v22 = vpack.c.bf16 %v384_v61, %v383_v4 }
 0x1b0   : > { %8017 = vmatprep.mubr.msk.bf16.mxu0 %vm410_vm2, %v12097_v18  ;;  %v2501_v18 = vpack.c.bf16 %v2498_v0, %v2496_v58 }
 0x1b7   : > { %8018 = vmatmul.mubr.msk.bf16.gmra.mrb[16].mxu0 %vm410_vm2, %v12098_v31 }
 0x1b8   : > { %8021 = vmatprep.mubr.msk.bf16.mxu0 %vm410_vm2, %v12099_v38 }
 0x1bf   : > { %8022 = vmatmul.mubr.msk.bf16.gmra.mrb[20].mxu0 %vm410_vm2, %v12100_v35 }
 0x1c0   : > { %8025 = vmatprep.mubr.msk.bf16.mxu0 %vm410_vm2, %v12101_v55 }
 0x1c7   : > { %8026 = vmatmul.mubr.msk.bf16.gmra.mrb[24].mxu0 %vm410_vm2, %v9895_v8  ;;  %v2285_v8 = vrot.slane %v383_v4, 1 }
 0x1c8   : > { %8029 = vmatprep.mubr.msk.bf16.mxu0 %vm410_vm2, %v10192_v32 }
 0x1cf   : > { %8030 = vmatmul.mubr.msk.bf16.gmra.mrb[28].mxu0 %vm410_vm2, %v2080_v22 }
 0x1d0   : > { %8035 = vmatprep.mubr.msk.bf16.mxu0 %vm410_vm2, %v9929_v11  ;;  %v2286_v11 = vrot.slane %v384_v61, 1 }
 0x1d7   : > { %8036 = vmatmul.mubr.msk.bf16.vlgmr.msra.gmra.mrb[0].mxu0 %vm410_vm2, %v9957_v14  ;;  %v2288_v14 = vrot.slane %v385_v48, 1 }
 0x1d8   : > { %8068 = vmatpush3.bf16.msra.mxu0 %v2508_v29  ;;  %8039 = vmatprep.mubr.msk.bf16.mxu0 %vm410_vm2, %v9959_v13  ;;  %v2287_v13 = vsel %vm707_vm4, %v2285_v8, %v2286_v11 }
 0x1df   : > { %8040 = vmatmul.mubr.msk.bf16.gmra.mrb[4].mxu0 %vm410_vm2, %v9985_v50  ;;  %v2289_v50 = vsel %vm707_vm4, %v2286_v11, %v2288_v14 }
 0x1e0   : > { %8043 = vmatprep.mubr.msk.bf16.mxu0 %vm410_vm2, %v9987_v3  ;;  %v2292_v3 = vpack.c.bf16 %v2289_v50, %v2287_v13 }
 0x1e7   : > { %8044 = vmatmul.mubr.msk.bf16.gmra.mrb[8].mxu0 %vm410_vm2, %v10013_v25  ;;  %v9096_v25 = vld [vmem:[%s11880_s3 + $0x20] sm:$0xff]  }
 0x1e8   : > { %8047 = vmatprep.mubr.msk.bf16.mxu0 %vm410_vm2, %v10015_v26  ;;  %v9097_v26 = vld [vmem:[%s11880_s3 + $0xd0] sm:$0xff]  }
 0x1ef   : > { %8048 = vmatmul.mubr.msk.bf16.gmra.mrb[12].mxu0 %vm410_vm2, %v10041_v7  ;;  %v9098_v7 = vld [vmem:[%s11880_s3 + $0x28] sm:$0xff]  }
 0x1f0   : > { %8051 = vmatprep.mubr.msk.bf16.mxu0 %vm410_vm2, %v10043_v16  ;;  %v9099_v16 = vld [vmem:[%s11880_s3 + $0xd8] sm:$0xff]  }
 0x1f7   : > { %8052 = vmatmul.mubr.msk.bf16.gmra.mrb[16].mxu0 %vm410_vm2, %v10069_v28  ;;  %v9100_v28 = vld [vmem:[%s11880_s3 + $0x30] sm:$0xff]  }
 0x1f8   : > { %8055 = vmatprep.mubr.msk.bf16.mxu0 %vm410_vm2, %v10071_v17  ;;  %v9101_v17 = vld [vmem:[%s11880_s3 + $0xe0] sm:$0xff]  }
 0x1ff   : > { %8056 = vmatmul.mubr.msk.bf16.gmra.mrb[20].mxu0 %vm410_vm2, %v10095_v5  ;;  %v9102_v5 = vld [vmem:[%s11880_s3 + $0x38] sm:$0xff]  }
 0x200   : > { %8059 = vmatprep.mubr.msk.bf16.mxu0 %vm410_vm2, %v10097_v44  ;;  %v9103_v44 = vld [vmem:[%s11880_s3 + $0xe8] sm:$0xff]  }
 0x207   : > { %8060 = vmatmul.mubr.msk.bf16.gmra.mrb[24].mxu0 %vm410_vm2, %v10111_v6  ;;  %v9104_v6 = vld [vmem:[%s11880_s3 + $0xf0] sm:$0xff]  }
 0x208   : > { %8063 = vmatprep.mubr.msk.bf16.mxu0 %vm410_vm2, %v10234_v41 }
 0x20f   : > { %8064 = vmatmul.mubr.msk.bf16.gmra.mrb[28].mxu0 %vm410_vm2, %v2292_v3 }
 0x210   : > { %8069 = vmatprep.mubr.msk.bf16.mxu0 %vm410_vm2, %v12080_v57  ;;  %v9105_v57 = vld [vmem:[%s11880_s3 + $0xf8] sm:$0xff]  }
 0x217   : > { %8070 = vmatmul.mubr.msk.bf16.vlgmr.msra.gmra.mrb[0].mxu0 %vm410_vm2, %v12081_v53  ;;  %v10429_v53 = vld [vmem:[%s11880_s3 + $0x40] sm:$0xff]  }
 0x218   : > { %8073 = vmatprep.mubr.msk.bf16.mxu0 %vm410_vm2, %v12082_v15  ;;  %v10435_v15 = vld [vmem:[%s11879_s2] ss:$0 sm:$0xff] }
 0x21f   : > { %8074 = vmatmul.mubr.msk.bf16.gmra.mrb[4].mxu0 %vm410_vm2, %v12083_v20 }
 0x220   : > { %8077 = vmatprep.mubr.msk.bf16.mxu0 %vm410_vm2, %v12084_v45 }
 0x227   : > { %8078 = vmatmul.mubr.msk.bf16.gmra.mrb[8].mxu0 %vm410_vm2, %v12085_v56 }
 0x228   : > { %8081 = vmatprep.mubr.msk.bf16.mxu0 %vm410_vm2, %v12086_v21 }
 0x22f   : > { %8082 = vmatmul.mubr.msk.bf16.gmra.mrb[12].mxu0 %vm410_vm2, %v9821_v36  ;;  %v9091_v36 = vld [vmem:[%s11880_s3 + $0x8] sm:$0xff]  }
 0x230   : > { %8085 = vmatprep.mubr.msk.bf16.mxu0 %vm410_vm2, %v9836_v34  ;;  %v9090_v34 = vld [vmem:[%s11880_s3] sm:$0xff]  }
 0x231   : > { %8101 = vmatprep.subr.bf16.mxu0 %v9090_v34 }
 0x232   : > { %8102 = vmatpush3.bf16.msra.mxu0 %v9090_v34 }
 0x233   : > { %8103 = vmatprep.subr.bf16.mxu0 %v9091_v36 }
 0x236   : > { %8104 = vmatpush3.bf16.msra.mxu0 %v9091_v36 }
 0x237   : > { %8086 = vmatmul.mubr.msk.bf16.gmra.mrb[16].mxu0 %vm410_vm2, %v9845_v24  ;;  %v9092_v24 = vld [vmem:[%s11880_s3 + $0x10] sm:$0xff]  }
 0x238   : > { %8089 = vmatprep.mubr.msk.bf16.mxu0 %vm410_vm2, %v9850_v60  ;;  %v9093_v60 = vld [vmem:[%s11880_s3 + $0xc0] sm:$0xff]   ;;  %8105 = vmatprep.subr.bf16.mxu0 %v9092_v24 }
 0x239   : > { %8173 = vmatprep.subr.bf16.mxu1 %v9093_v60 }
 0x23a   : > { %8106 = vmatpush3.bf16.msra.mxu0 %v9092_v24  ;;  %8174 = vmatpush3.bf16.msra.mxu1 %v9093_v60 }
 0x23f   : > { %8090 = vmatmul.mubr.msk.bf16.gmra.mrb[20].mxu0 %vm410_vm2, %v12087_v2 }
 0x240   : > { %8093 = vmatprep.mubr.msk.bf16.mxu0 %vm410_vm2, %v9888_v42  ;;  %v9094_v42 = vld [vmem:[%s11880_s3 + $0x18] sm:$0xff]  }
 0x241   : > { %8107 = vmatprep.subr.bf16.mxu0 %v9094_v42 }
 0x242   : > { %8108 = vmatpush3.bf16.msra.mxu0 %v9094_v42 }
 0x243   : > { %8109 = vmatprep.subr.bf16.mxu0 %v9096_v25 }
 0x246   : > { %8110 = vmatpush3.bf16.msra.mxu0 %v9096_v25 }
 0x247   : > { %8094 = vmatmul.mubr.msk.bf16.gmra.mrb[24].mxu0 %vm410_vm2, %v9897_v23  ;;  %v9095_v23 = vld [vmem:[%s11880_s3 + $0xc8] sm:$0xff]   ;;  %8111 = vmatprep.subr.bf16.mxu0 %v9098_v7 }
 0x248   : > { %8097 = vmatprep.mubr.msk.bf16.mxu0 %vm410_vm2, %v10194_v30  ;;  %8175 = vmatprep.subr.bf16.mxu1 %v9095_v23 }
 0x249   : > { %8176 = vmatpush3.bf16.msra.mxu1 %v9095_v23 }
 0x24a   : > { %8177 = vmatprep.subr.bf16.mxu1 %v9097_v26  ;;  %8112 = vmatpush3.bf16.msra.mxu0 %v9098_v7 }
 0x24b   : > { %8113 = vmatprep.subr.bf16.mxu0 %v9100_v28 }
 0x24d   : > { %8178 = vmatpush3.bf16.msra.mxu1 %v9097_v26 }
 0x24e   : > { %8179 = vmatprep.subr.bf16.mxu1 %v9099_v16  ;;  %8114 = vmatpush3.bf16.msra.mxu0 %v9100_v28 }
 0x24f   : > { %8098 = vmatmul.mubr.msk.bf16.gmra.mrb[28].mxu0 %vm410_vm2, %v2501_v18  ;;  %8115 = vmatprep.subr.bf16.mxu0 %v9102_v5 }
 0x251   : > { %8180 = vmatpush3.bf16.msra.mxu1 %v9099_v16 }
 0x252   : > { %8181 = vmatprep.subr.bf16.mxu1 %v9101_v17  ;;  %8116 = vmatpush3.bf16.msra.mxu0 %v9102_v5 }
 0x253   : > { %8125 = vmatprep.subr.bf16.mxu0 %v10429_v53 }
 0x255   : > { %8182 = vmatpush3.bf16.msra.mxu1 %v9101_v17 }
 0x256   : > { %8183 = vmatprep.subr.bf16.mxu1 %v9103_v44 }
 0x259   : > { %8184 = vmatpush3.bf16.msra.mxu1 %v9103_v44 }
 0x25a   : > { %8185 = vmatprep.subr.bf16.mxu1 %v9104_v6 }
 0x25d   : > { %8186 = vmatpush3.bf16.msra.mxu1 %v9104_v6 }
 0x25e   : > { %8187 = vmatprep.subr.bf16.mxu1 %v9105_v57 }
 0x261   : > { %8188 = vmatpush3.bf16.msra.mxu1 %v9105_v57 }
 0x262   : > { %8197 = vmatprep.subr.bf16.mxu1 %v9109_v51 }
 0x2ea   : > { %v8071_v20 = vpop.f32.mrb[0].mxu0 }
 0x2eb   : > { %v8657_v45 = vadd.f32 %v8071_v20, %v10435_v15  ;;  %v2544_v56 = vpop.f32.mrb[1].mxu0 }
 0x2ec   : > { %v8658_v21 = vadd.f32 %v10435_v15, %v2544_v56  ;;  %v8072_v2 = vpop.f32.mrb[2].mxu0 }
 0x2ed   : > { %v2705_v31 = vmax.f32 %v8657_v45, 0.0  ;;  %v8659_v38 = vadd.f32 %v8072_v2, %v10435_v15  ;;  %v2547_v35 = vpop.f32.mrb[3].mxu0 }
 0x2ee   : > { %v2703_v47 = vmax.f32 %v8658_v21, 0.0  ;;  %v8660_v10 = vadd.f32 %v10435_v15, %v2547_v35 }
 0x2ef   : > { %v2706_v55 = vmax.f32 %v8659_v38, 0.0 }
 0x2f0   : > { %v2735_v54 = vmax.f32 %v2703_v47, %v2705_v31  ;;  %v2704_v59 = vmax.f32 %v8660_v10, 0.0 }
 0x2f2   : > { %v2751_v40 = vsel %vm460_vm1, %v2735_v54, -inf  ;;  %v2808_v62 = vsel %vm2807_vm5, %v2735_v54, -inf  ;;  %v2865_v32 = vsel %vm2864_vm6, %v2735_v54, -inf  ;;  %v2922_v30 = vsel %vm2921_vm7, %v2735_v54, -inf  ;;  %v8075_v1 = vpop.f32.mrb[4].mxu0 }
 0x2f3   : > { %v2752_v12 = vrot.slane %v2751_v40, 4  ;;  %v2809_v33 = vrot.slane %v2808_v62, 4  ;;  %v2866_v63 = vrot.slane %v2865_v32, 4  ;;  %v2923_v27 = vrot.slane %v2922_v30, 4  ;;  %v2560_v37 = vpop.f32.mrb[5].mxu0 }
 0x2f4   : > { %v2736_v46 = vmax.f32 %v2704_v59, %v2706_v55  ;;  %v8661_v41 = vadd.f32 %v8075_v1, %v10435_v15  ;;  %v8662_v19 = vadd.f32 %v10435_v15, %v2560_v37  ;;  %v8076_v43 = vpop.f32.mrb[6].mxu0 }
 0x2f5   : > { %v2753_v52 = vmax.f32 %v2751_v40, %v2752_v12  ;;  %v2810_v29 = vmax.f32 %v2808_v62, %v2809_v33  ;;  %v2867_v4 = vmax.f32 %v2865_v32, %v2866_v63  ;;  %v2924_v61 = vmax.f32 %v2922_v30, %v2923_v27  ;;  %v2563_v9 = vpop.f32.mrb[7].mxu0 }
 0x2f6   : > { %v2978_v39 = vsel %vm460_vm1, %v2736_v46, -inf  ;;  %v3034_v48 = vsel %vm2807_vm5, %v2736_v46, -inf  ;;  %v3090_v58 = vsel %vm2864_vm6, %v2736_v46, -inf  ;;  %v3146_v49 = vsel %vm2921_vm7, %v2736_v46, -inf }
 0x2f7   : > { %v2754_v0 = vrot.slane %v2753_v52, 2  ;;  %v2811_v22 = vrot.slane %v2810_v29, 2  ;;  %v2868_v18 = vrot.slane %v2867_v4, 2  ;;  %v2925_v8 = vrot.slane %v2924_v61, 2 }
 0x2f8   : > { %v2979_v11 = vrot.slane %v2978_v39, 4  ;;  %v3035_v14 = vrot.slane %v3034_v48, 4  ;;  %v3091_v13 = vrot.slane %v3090_v58, 4  ;;  %v3147_v50 = vrot.slane %v3146_v49, 4 }
 0x2f9   : > { %v2755_v3 = vmax.f32 %v2753_v52, %v2754_v0  ;;  %v2812_v34 = vmax.f32 %v2810_v29, %v2811_v22  ;;  %v2869_v36 = vmax.f32 %v2867_v4, %v2868_v18  ;;  %v2926_v24 = vmax.f32 %v2924_v61, %v2925_v8 }
 0x2fa   : > { %v2980_v60 = vmax.f32 %v2978_v39, %v2979_v11  ;;  %v3036_v42 = vmax.f32 %v3034_v48, %v3035_v14  ;;  %v3092_v23 = vmax.f32 %v3090_v58, %v3091_v13  ;;  %v3148_v25 = vmax.f32 %v3146_v49, %v3147_v50  ;;  %v8079_v26 = vpop.f32.mrb[8].mxu0 }
 0x2fb   : > { %v2756_v7 = vrot.slane %v2755_v3, 1  ;;  %v2813_v16 = vrot.slane %v2812_v34, 1  ;;  %v2870_v28 = vrot.slane %v2869_v36, 1  ;;  %v2927_v17 = vrot.slane %v2926_v24, 1  ;;  %v2576_v5 = vpop.f32.mrb[9].mxu0 }
 0x2fc   : > { %v2981_v44 = vrot.slane %v2980_v60, 2  ;;  %v3037_v6 = vrot.slane %v3036_v42, 2  ;;  %v3093_v57 = vrot.slane %v3092_v23, 2  ;;  %v3149_v20 = vrot.slane %v3148_v25, 2  ;;  %v8080_v45 = vpop.f32.mrb[10].mxu0 }
 0x2fd   : > { %v2757_v56 = vmax.f32 %v2755_v3, %v2756_v7  ;;  %v10454_v21 = vmax.f32 %v2812_v34, %v2813_v16  ;;  %v10456_v2 = vmax.f32 %v2869_v36, %v2870_v28  ;;  %v2579_v31 = vpop.f32.mrb[11].mxu0  ;;  %v10458_v38 = vmax.f32 %v2926_v24, %v2927_v17 }
 0x2fe   : > { %v2982_v35 = vmax.f32 %v2980_v60, %v2981_v44  ;;  %v10460_v47 = vmax.f32 %v3036_v42, %v3037_v6  ;;  %v10462_v10 = vmax.f32 %v3092_v23, %v3093_v57  ;;  %v10464_v54 = vmax.f32 %v3148_v25, %v3149_v20 }
 0x2ff   : > { %v2709_v55 = vmax.f32 %v8661_v41, 0.0  ;;  %v2707_v59 = vmax.f32 %v8662_v19, 0.0  ;;  %v8663_v51 = vadd.f32 %v8076_v43, %v10435_v15  ;;  %v10468_v40 = vsel %vm459_vm0, 0.0, %v2757_v56 }
 0x300   : > { %12102 = vst [vmem:[#allocation4_spill] sm:$0xff] %v10464_v54  ;;  %v2983_v62 = vrot.slane %v2982_v35, 1  ;;  %v8664_v32 = vadd.f32 %v10435_v15, %v2563_v9  ;;  %v8665_v30 = vadd.f32 %v8079_v26, %v10435_v15  ;;  %v8666_v33 = vadd.f32 %v10435_v15, %v2576_v5 }
 0x301   : > { %v2737_v1 = vmax.f32 %v2707_v59, %v2709_v55  ;;  %v2710_v12 = vmax.f32 %v8663_v51, 0.0  ;;  %v8667_v63 = vadd.f32 %v8080_v45, %v10435_v15  ;;  %v3039_v27 = vrot.slane %v10460_v47, 1 }
 0x302   : > { %v2708_v37 = vmax.f32 %v8664_v32, 0.0  ;;  %v2713_v46 = vmax.f32 %v8665_v30, 0.0  ;;  %v8668_v41 = vadd.f32 %v10435_v15, %v2579_v31  ;;  %v10476_v19 = vpop.f32.mrb[12].mxu0  ;;  %v2711_v22 = vmax.f32 %v8666_v33, 0.0 }
 0x303   : > { %v2758_v43 = vsel %vm460_vm1, %v2737_v1, -inf  ;;  %v2815_v52 = vsel %vm2807_vm5, %v2737_v1, -inf  ;;  %v2872_v29 = vsel %vm2864_vm6, %v2737_v1, -inf  ;;  %v2929_v4 = vsel %vm2921_vm7, %v2737_v1, -inf  ;;  %v10482_v61 = vpop.f32.mrb[13].mxu0 }
 0x304   : > { %v2759_v9 = vrot.slane %v2758_v43, 4  ;;  %v2816_v39 = vrot.slane %v2815_v52, 4  ;;  %v2873_v48 = vrot.slane %v2872_v29, 4  ;;  %v2930_v58 = vrot.slane %v2929_v4, 4  ;;  %v10484_v49 = vpop.f32.mrb[14].mxu0 }
 0x305   : > { %v2738_v0 = vmax.f32 %v2708_v37, %v2710_v12  ;;  %v2714_v18 = vmax.f32 %v8667_v63, 0.0  ;;  %v2712_v8 = vmax.f32 %v8668_v41, 0.0  ;;  %v10486_v11 = vpop.f32.mrb[15].mxu0  ;;  %v10496_v45 = vmax.f32 %v2982_v35, %v2983_v62 }
 0x306   : > { %v2760_v14 = vmax.f32 %v2758_v43, %v2759_v9  ;;  %v2817_v13 = vmax.f32 %v2815_v52, %v2816_v39  ;;  %v2874_v50 = vmax.f32 %v2872_v29, %v2873_v48  ;;  %v2931_v3 = vmax.f32 %v2929_v4, %v2930_v58 }
 0x307   : > { %v2985_v34 = vsel %vm460_vm1, %v2738_v0, -inf  ;;  %v3041_v36 = vsel %vm2807_vm5, %v2738_v0, -inf  ;;  %v3097_v24 = vsel %vm2864_vm6, %v2738_v0, -inf  ;;  %v3153_v60 = vsel %vm2921_vm7, %v2738_v0, -inf }
 0x308   : > { %v2761_v42 = vrot.slane %v2760_v14, 2  ;;  %v2818_v23 = vrot.slane %v2817_v13, 2  ;;  %v2875_v25 = vrot.slane %v2874_v50, 2  ;;  %v2932_v26 = vrot.slane %v2931_v3, 2 }
 0x309   : > { %v2986_v7 = vrot.slane %v2985_v34, 4  ;;  %v3042_v16 = vrot.slane %v3041_v36, 4  ;;  %v3098_v28 = vrot.slane %v3097_v24, 4  ;;  %v3154_v17 = vrot.slane %v3153_v60, 4 }
 0x30a   : > { %v2762_v5 = vmax.f32 %v2760_v14, %v2761_v42  ;;  %v2819_v44 = vmax.f32 %v2817_v13, %v2818_v23  ;;  %v2876_v6 = vmax.f32 %v2874_v50, %v2875_v25  ;;  %v10492_v57 = vmax.f32 %v2931_v3, %v2932_v26  ;;  %v10494_v20 = vpop.f32.mrb[16].mxu0 }
 0x30b   : > { %v2987_v56 = vmax.f32 %v2985_v34, %v2986_v7  ;;  %v10498_v31 = vmax.f32 %v3041_v36, %v3042_v16  ;;  %v3155_v55 = vmax.f32 %v3153_v60, %v3154_v17  ;;  %v10500_v59 = vpop.f32.mrb[17].mxu0  ;;  %v10502_v1 = vmax.f32 %v3097_v24, %v3098_v28 }
 0x30c   : > { %v2763_v51 = vrot.slane %v2762_v5, 1  ;;  %v2820_v32 = vrot.slane %v2819_v44, 1  ;;  %v2877_v30 = vrot.slane %v2876_v6, 1  ;;  %v10504_v12 = vpop.f32.mrb[18].mxu0  ;;  %v2739_v41 = vmax.f32 %v2711_v22, %v2713_v46 }
 0x30d   : > { %v2988_v63 = vrot.slane %v2987_v56, 2  ;;  %v3156_v37 = vrot.slane %v3155_v55, 2  ;;  %v10507_v35 = vpop.f32.mrb[19].mxu0  ;;  %v2740_v29 = vmax.f32 %v2712_v8, %v2714_v18 }
 0x30e   : > { %v10509_v62 = vmax.f32 %v2762_v5, %v2763_v51  ;;  %v10511_v43 = vmax.f32 %v2819_v44, %v2820_v32  ;;  %v10514_v4 = vmax.f32 %v2876_v6, %v2877_v30  ;;  %v2765_v39 = vsel %vm460_vm1, %v2739_v41, -inf }
 0x30f   : > { %v3157_v9 = vmax.f32 %v3155_v55, %v3156_v37  ;;  %v2822_v48 = vsel %vm2807_vm5, %v2739_v41, -inf  ;;  %v2766_v58 = vrot.slane %v2765_v39, 4  ;;  %v2879_v46 = vsel %vm2864_vm6, %v2739_v41, -inf }
 0x310   : > { %v2823_v0 = vrot.slane %v2822_v48, 4  ;;  %v2936_v22 = vsel %vm2921_vm7, %v2739_v41, -inf  ;;  %v10520_v14 = vmax.f32 %v2987_v56, %v2988_v63  ;;  %v2880_v13 = vrot.slane %v2879_v46, 4 }
 0x311   : > { %v2937_v50 = vrot.slane %v2936_v22, 4  ;;  %v2992_v3 = vsel %vm460_vm1, %v2740_v29, -inf  ;;  %v2767_v18 = vmax.f32 %v2765_v39, %v2766_v58  ;;  %v3048_v36 = vsel %vm2807_vm5, %v2740_v29, -inf }
 0x312   : > { %v2824_v8 = vmax.f32 %v2822_v48, %v2823_v0  ;;  %v2993_v34 = vrot.slane %v2992_v3, 4  ;;  %v10524_v24 = vpop.f32.mrb[20].mxu0  ;;  %v3158_v60 = vrot.slane %v3157_v9, 1  ;;  %v2881_v42 = vmax.f32 %v2879_v46, %v2880_v13 }
 0x313   : > { %v2938_v23 = vmax.f32 %v2936_v22, %v2937_v50  ;;  %v3049_v25 = vrot.slane %v3048_v36, 4  ;;  %v10526_v26 = vpop.f32.mrb[21].mxu0  ;;  %v2768_v7 = vrot.slane %v2767_v18, 2  ;;  %v3104_v17 = vsel %vm2864_vm6, %v2740_v29, -inf }
 0x314   : > { %v2825_v16 = vrot.slane %v2824_v8, 2  ;;  %v2994_v28 = vmax.f32 %v2992_v3, %v2993_v34  ;;  %v10529_v5 = vpop.f32.mrb[22].mxu0  ;;  %v2882_v44 = vrot.slane %v2881_v42, 2  ;;  %v3105_v55 = vrot.slane %v3104_v17, 4 }
 0x315   : > { %v2939_v6 = vrot.slane %v2938_v23, 2  ;;  %v3050_v56 = vmax.f32 %v3048_v36, %v3049_v25  ;;  %v10531_v51 = vpop.f32.mrb[23].mxu0  ;;  %v2769_v32 = vmax.f32 %v2767_v18, %v2768_v7  ;;  %v3160_v37 = vsel %vm2921_vm7, %v2740_v29, -inf }
 0x316   : > { %v2826_v30 = vmax.f32 %v2824_v8, %v2825_v16  ;;  %v2995_v63 = vrot.slane %v2994_v28, 2  ;;  %v2883_v41 = vmax.f32 %v2881_v42, %v2882_v44  ;;  %v3106_v58 = vmax.f32 %v3104_v17, %v3105_v55 }
 0x317   : > { %v2940_v39 = vmax.f32 %v2938_v23, %v2939_v6  ;;  %v3051_v48 = vrot.slane %v3050_v56, 2  ;;  %v2770_v0 = vrot.slane %v2769_v32, 1  ;;  %v3161_v13 = vrot.slane %v3160_v37, 4 }
 0x318   : > { %v2827_v46 = vrot.slane %v2826_v30, 1  ;;  %v2996_v22 = vmax.f32 %v2994_v28, %v2995_v63  ;;  %v2884_v50 = vrot.slane %v2883_v41, 1  ;;  %v3107_v36 = vrot.slane %v3106_v58, 2 }
 0x319   : > { %v2941_v3 = vrot.slane %v2940_v39, 1  ;;  %v3052_v34 = vmax.f32 %v3050_v56, %v3051_v48  ;;  %v2771_v25 = vmax.f32 %v2769_v32, %v2770_v0  ;;  %v3162_v7 = vmax.f32 %v3160_v37, %v3161_v13 }
 0x31a   : > { %v2828_v18 = vmax.f32 %v2826_v30, %v2827_v46  ;;  %v2997_v8 = vrot.slane %v2996_v22, 1  ;;  %v10534_v16 = vpop.f32.mrb[24].mxu0  ;;  %v10536_v29 = vmax.f32 %v3157_v9, %v3158_v60  ;;  %v2885_v42 = vmax.f32 %v2883_v41, %v2884_v50 }
 0x31b   : > { %v3053_v23 = vrot.slane %v3052_v34, 1  ;;  %v3108_v17 = vmax.f32 %v3106_v58, %v3107_v36  ;;  %v10538_v44 = vpop.f32.mrb[25].mxu0  ;;  %v10540_v28 = vmax.f32 %v2940_v39, %v2941_v3  ;;  %v3204_v6 = vsel %vm459_vm0, 0.0, %v2771_v25 }
 0x31c   : > { %v3163_v56 = vrot.slane %v3162_v7, 2  ;;  %v8669_v55 = vadd.f32 %v10476_v19, %v10435_v15  ;;  %v10545_v32 = vpop.f32.mrb[26].mxu0  ;;  %v3212_v30 = vsel %vm460_vm1, %v3204_v6, %v2828_v18  ;;  %v10548_v63 = vmax.f32 %v2996_v22, %v2997_v8 }
 0x31d   : > { %v3109_v9 = vrot.slane %v3108_v17, 1  ;;  %v8670_v60 = vadd.f32 %v10435_v15, %v10482_v61  ;;  %v10552_v37 = vpop.f32.mrb[27].mxu0  ;;  %v10554_v41 = vmax.f32 %v3052_v34, %v3053_v23  ;;  %v8671_v58 = vadd.f32 %v10484_v49, %v10435_v15 }
 0x31e   : > { %v3164_v39 = vmax.f32 %v3162_v7, %v3163_v56  ;;  %v2717_v48 = vmax.f32 %v8669_v55, 0.0  ;;  %v10559_v19 = vsel %vm3218_vm8, %v3212_v30, %v2885_v42  ;;  %v8672_v22 = vadd.f32 %v10435_v15, %v10486_v11 }
 0x31f   : > { %v10561_v0 = vmax.f32 %v3108_v17, %v3109_v9  ;;  %v2715_v46 = vmax.f32 %v8670_v60, 0.0  ;;  %v3040_v61 = vmax.f32 %v10460_v47, %v3039_v27  ;;  %v3095_v50 = vrot.slane %v10462_v10, 1 }
 0x320   : > { %v3165_v13 = vrot.slane %v3164_v39, 1  ;;  %v3210_v49 = vsel %vm460_vm1, %v10468_v40, %v10454_v21  ;;  %v2718_v34 = vmax.f32 %v8671_v58, 0.0  ;;  %v2716_v36 = vmax.f32 %v8672_v22, 0.0 }
 0x321   : > { %v2741_v3 = vmax.f32 %v2715_v46, %v2717_v48  ;;  %v3219_v25 = vsel %vm3218_vm8, %v3210_v49, %v10456_v2  ;;  %v3096_v11 = vmax.f32 %v10462_v10, %v3095_v50  ;;  %v10579_v47 = vadd.f32 %v10494_v20, %v10435_v15 }
 0x322   : > { %v3166_v18 = vmax.f32 %v3164_v39, %v3165_v13  ;;  %v3228_v8 = vsel %vm3227_vm9, %v3219_v25, %v10458_v38  ;;  %v10581_v27 = vpop.f32.mrb[28].mxu0  ;;  %v8674_v38 = vadd.f32 %v10435_v15, %v10500_v59  ;;  %v2742_v55 = vmax.f32 %v2716_v36, %v2718_v34 }
 0x323   : > { %v2772_v21 = vsel %vm460_vm1, %v2741_v3, -inf  ;;  %v2829_v40 = vsel %vm2807_vm5, %v2741_v3, -inf  ;;  %v2886_v7 = vsel %vm2864_vm6, %v2741_v3, -inf  ;;  %v2943_v2 = vsel %vm2921_vm7, %v2741_v3, -inf  ;;  %v10587_v42 = vpop.f32.mrb[29].mxu0 }
 0x324   : > { %12103 = vst [vmem:[#allocation14_spill] sm:$0xff] %v10587_v42  ;;  %v2773_v10 = vrot.slane %v2772_v21, 4  ;;  %v2830_v23 = vrot.slane %v2829_v40, 4  ;;  %v2887_v17 = vrot.slane %v2886_v7, 4  ;;  %v10591_v20 = vpop.f32.mrb[30].mxu0  ;;  %v10594_v6 = vsel %vm459_vm0, %v3166_v18, 0.0 }
 0x325   : > { %12104 = vst [vmem:[#allocation7_spill] sm:$0xff] %v10591_v20  ;;  %12105 = vst [vmem:[#allocation11_spill] sm:$0xff] %v10594_v6  ;;  %v2944_v56 = vrot.slane %v2943_v2, 4  ;;  %v3237_v30 = vsel %vm3236_vm10, %v3228_v8, %v10496_v45  ;;  %v10598_v9 = vpop.f32.mrb[31].mxu0  ;;  %v2999_v59 = vsel %vm460_vm1, %v2742_v55, -inf  ;;  %v3055_v22 = vsel %vm2807_vm5, %v2742_v55, -inf }
 0x326   : > { %12106 = vst [vmem:[#allocation12_spill] sm:$0xff] %v10598_v9  ;;  %v2774_v60 = vmax.f32 %v2772_v21, %v2773_v10  ;;  %v2831_v39 = vmax.f32 %v2829_v40, %v2830_v23  ;;  %v2888_v48 = vmax.f32 %v2886_v7, %v2887_v17  ;;  %v3245_v58 = vsel %vm1082_vm3, %v3237_v30, %v3040_v61 }
 0x327   : > { %v2945_v46 = vmax.f32 %v2943_v2, %v2944_v56  ;;  %v3111_v13 = vsel %vm2864_vm6, %v2742_v55, -inf  ;;  %v3000_v34 = vrot.slane %v2999_v59, 4  ;;  %v3056_v45 = vrot.slane %v3055_v22, 4 }
 0x328   : > { %v2775_v50 = vrot.slane %v2774_v60, 2  ;;  %v2832_v49 = vrot.slane %v2831_v39, 2  ;;  %v2889_v3 = vrot.slane %v2888_v48, 2  ;;  %v3112_v25 = vrot.slane %v3111_v13, 4 }
 0x329   : > { %v2946_v36 = vrot.slane %v2945_v46, 2  ;;  %v3167_v18 = vsel %vm2921_vm7, %v2742_v55, -inf  ;;  %v3001_v61 = vmax.f32 %v2999_v59, %v3000_v34  ;;  %v3057_v2 = vmax.f32 %v3055_v22, %v3056_v45 }
 0x32a   : > { %v2776_v8 = vmax.f32 %v2774_v60, %v2775_v50  ;;  %v2833_v21 = vmax.f32 %v2831_v39, %v2832_v49  ;;  %v2890_v40 = vmax.f32 %v2888_v48, %v2889_v3  ;;  %v3113_v10 = vmax.f32 %v3111_v13, %v3112_v25 }
 0x32b   : > { %v2947_v7 = vmax.f32 %v2945_v46, %v2946_v36  ;;  %v3168_v23 = vrot.slane %v3167_v18, 4  ;;  %v3002_v33 = vrot.slane %v3001_v61, 2  ;;  %v3058_v6 = vrot.slane %v3057_v2, 2 }
 0x32c   : > { %v2777_v17 = vrot.slane %v2776_v8, 1  ;;  %v2834_v56 = vrot.slane %v2833_v21, 1  ;;  %v2891_v30 = vrot.slane %v2890_v40, 1  ;;  %v3114_v54 = vrot.slane %v3113_v10, 2 }
 0x32d   : > { %v2948_v52 = vrot.slane %v2947_v7, 1  ;;  %v3169_v9 = vmax.f32 %v3167_v18, %v3168_v23  ;;  %v3003_v55 = vmax.f32 %v3001_v61, %v3002_v33  ;;  %v2721_v60 = vmax.f32 %v10579_v47, 0.0 }
 0x32e   : > { %v2778_v20 = vmax.f32 %v2776_v8, %v2777_v17  ;;  %v10605_v42 = vmax.f32 %v2833_v21, %v2834_v56  ;;  %v10608_v39 = vmax.f32 %v2890_v40, %v2891_v30  ;;  %v10612_v46 = vmax.f32 %v3057_v2, %v3058_v6 }
 0x32f   : > { %v10610_v48 = vmax.f32 %v2947_v7, %v2948_v52  ;;  %v3170_v59 = vrot.slane %v3169_v9, 2  ;;  %v3004_v22 = vrot.slane %v3003_v55, 1  ;;  %v10614_v13 = vmax.f32 %v3113_v10, %v3114_v54 }
 0x330   : > { %v10617_v50 = vsel %vm707_vm4, %v3245_v58, %v3096_v11  ;;  %v2719_v49 = vmax.f32 %v8674_v38, 0.0  ;;  %v10620_v3 = vsel %vm459_vm0, 0.0, %v2778_v20  ;;  %v11932_v47 = vmov 0.0  }
 0x331   : > { %v3276_v52 = vpack.c.bf16 %v10617_v50, %v11932_v47  ;;  %v8675_v6 = vadd.f32 %v10504_v12, %v10435_v15  ;;  %v10627_v34 = vmax.f32 %v3003_v55, %v3004_v22  ;;  %v10629_v54 = vmax.f32 %v3169_v9, %v3170_v59 }
 0x332   : > { %v2743_v36 = vmax.f32 %v2719_v49, %v2721_v60  ;;  %v8676_v11 = vadd.f32 %v10435_v15, %v10507_v35  ;;  %v2990_v20 = vrot.slane %v10520_v14, 1  ;;  %v12109_v58 = vrot.slane %v10498_v31, 2 }
 0x333   : > { %12107 = vst [vmem:[#allocation23_spill] sm:$0xff] %v10627_v34  ;;  %12108 = vst [vmem:[#allocation19_spill] sm:$0xff] %v10629_v54  ;;  %8117 = vmatprep.mubr.bf16.mxu0 %v3276_v52  ;;  %v2722_v38 = vmax.f32 %v8675_v6, 0.0  ;;  %v3100_v25 = vrot.slane %v10502_v1, 2  ;;  %v12110_v2 = vrot.slane %v10492_v57, 1  ;;  %v3203_v49 = vsel %vm459_vm0, 0.0, %v10509_v62 }
 0x334   : > { %v3045_v45 = vmax.f32 %v10498_v31, %v12109_v58  ;;  %v2779_v12 = vsel %vm460_vm1, %v2743_v36, -inf  ;;  %v2836_v18 = vsel %vm2807_vm5, %v2743_v36, -inf  ;;  %v2893_v9 = vsel %vm2864_vm6, %v2743_v36, -inf }
 0x335   : > { %v2950_v8 = vsel %vm2921_vm7, %v2743_v36, -inf  ;;  %v2780_v21 = vrot.slane %v2779_v12, 4  ;;  %v2837_v35 = vrot.slane %v2836_v18, 4  ;;  %v2894_v40 = vrot.slane %v2893_v9, 4 }
 0x336   : > { %v2951_v61 = vrot.slane %v2950_v8, 4  ;;  %v2720_v7 = vmax.f32 %v8676_v11, 0.0  ;;  %v2935_v10 = vmax.f32 %v10492_v57, %v12110_v2  ;;  %v2991_v31 = vmax.f32 %v10520_v14, %v2990_v20 }
 0x337   : > { %v3101_v23 = vmax.f32 %v10502_v1, %v3100_v25  ;;  %v2781_v17 = vmax.f32 %v2779_v12, %v2780_v21  ;;  %v2838_v56 = vmax.f32 %v2836_v18, %v2837_v35  ;;  %v2895_v30 = vmax.f32 %v2893_v9, %v2894_v40 }
 0x338   : > { %v2952_v55 = vmax.f32 %v2950_v8, %v2951_v61  ;;  %v2744_v60 = vmax.f32 %v2720_v7, %v2722_v38  ;;  %v3046_v59 = vrot.slane %v3045_v45, 1 }
 0x339   : > { %v3102_v22 = vrot.slane %v3101_v23, 1  ;;  %v2782_v52 = vrot.slane %v2781_v17, 2  ;;  %v2839_v6 = vrot.slane %v2838_v56, 2  ;;  %v2896_v36 = vrot.slane %v2895_v30, 2 }
 0x33a   : > { %v2953_v11 = vrot.slane %v2952_v55, 2  ;;  %v3006_v57 = vsel %vm460_vm1, %v2744_v60, -inf  ;;  %v3062_v14 = vsel %vm2807_vm5, %v2744_v60, -inf  ;;  %v3118_v1 = vsel %vm2864_vm6, %v2744_v60, -inf }
 0x33b   : > { %v3174_v20 = vsel %vm2921_vm7, %v2744_v60, -inf  ;;  %v2783_v58 = vmax.f32 %v2781_v17, %v2782_v52  ;;  %v2840_v25 = vmax.f32 %v2838_v56, %v2839_v6  ;;  %v2897_v38 = vmax.f32 %v2895_v30, %v2896_v36 }
 0x33c   : > { %v2954_v12 = vmax.f32 %v2952_v55, %v2953_v11  ;;  %v3007_v18 = vrot.slane %v3006_v57, 4  ;;  %v3063_v9 = vrot.slane %v3062_v14, 4  ;;  %v3119_v8 = vrot.slane %v3118_v1, 4 }
 0x33d   : > { %v3175_v62 = vrot.slane %v3174_v20, 4  ;;  %v2784_v21 = vrot.slane %v2783_v58, 1  ;;  %v2841_v35 = vrot.slane %v2840_v25, 1  ;;  %v2898_v40 = vrot.slane %v2897_v38, 1 }
 0x33e   : > { %v2955_v61 = vrot.slane %v2954_v12, 1  ;;  %v3008_v7 = vmax.f32 %v3006_v57, %v3007_v18  ;;  %v3064_v2 = vmax.f32 %v3062_v14, %v3063_v9  ;;  %v3120_v47 = vmax.f32 %v3118_v1, %v3119_v8 }
 0x33f   : > { %v3176_v33 = vmax.f32 %v3174_v20, %v3175_v62  ;;  %v2785_v54 = vmax.f32 %v2783_v58, %v2784_v21  ;;  %v10653_v34 = vmax.f32 %v2840_v25, %v2841_v35  ;;  %v10655_v60 = vmax.f32 %v2897_v38, %v2898_v40 }
 0x340   : > { %v3047_v17 = vmax.f32 %v3045_v45, %v3046_v59  ;;  %v3009_v56 = vrot.slane %v3008_v7, 2  ;;  %v3065_v30 = vrot.slane %v3064_v2, 2  ;;  %v3121_v55 = vrot.slane %v3120_v47, 2 }
 0x341   : > { %v3177_v52 = vrot.slane %v3176_v33, 2  ;;  %v10657_v6 = vmax.f32 %v2954_v12, %v2955_v61  ;;  %v10660_v36 = vsel %vm459_vm0, 0.0, %v2785_v54  ;;  %v3211_v11 = vsel %vm460_vm1, %v3203_v49, %v10511_v43 }
 0x342   : > { %v3230_v57 = vsel %vm3227_vm9, %v10559_v19, %v10540_v28  ;;  %v3010_v14 = vmax.f32 %v3008_v7, %v3009_v56  ;;  %v10667_v1 = vmax.f32 %v3064_v2, %v3065_v30  ;;  %v10669_v45 = vmax.f32 %v3120_v47, %v3121_v55 }
 0x343   : > { %v3103_v59 = vmax.f32 %v3101_v23, %v3102_v22  ;;  %v3220_v20 = vsel %vm3218_vm8, %v3211_v11, %v10514_v4  ;;  %v3239_v54 = vsel %vm3236_vm10, %v3230_v57, %v10548_v63  ;;  %v10677_v58 = vsel %vm459_vm0, %v10536_v29, 0.0 }
 0x344   : > { %v8677_v43 = vadd.f32 %v10524_v24, %v10435_v15  ;;  %v3011_v28 = vrot.slane %v3010_v14, 1  ;;  %v10681_v19 = vmax.f32 %v3176_v33, %v3177_v52  ;;  %v3229_v47 = vsel %vm3227_vm9, %v3220_v20, %v2935_v10 }
 0x345   : > { %v3247_v23 = vsel %vm1082_vm3, %v3239_v54, %v10554_v41  ;;  %v3067_v4 = vrot.slane %v10667_v1, 1  ;;  %v3238_v22 = vsel %vm3236_vm10, %v3229_v47, %v2991_v31  ;;  %v3438_v29 = vrot.slane %v10677_v58, 1 }
 0x346   : > { %v10690_v63 = vsel %vm707_vm4, %v3247_v23, %v10561_v0  ;;  %v10693_v49 = vmax.f32 %v3010_v14, %v3011_v28  ;;  %v3246_v24 = vsel %vm1082_vm3, %v3238_v22, %v3047_v17  ;;  %v2725_v33 = vmax.f32 %v8677_v43, 0.0  ;;  %v9110_v22 = vld [vmem:[%s11880_s3 + $0x58] sm:$0xff]  }
 0x347   : > { %v8678_v10 = vadd.f32 %v10435_v15, %v10526_v26  ;;  %v10699_v41 = vsel %vm707_vm4, %v3246_v24, %v3103_v59  ;;  %v8679_v31 = vadd.f32 %v10529_v5, %v10435_v15  ;;  %v8680_v0 = vadd.f32 %v10435_v15, %v10531_v51  ;;  %v9107_v5 = vld [vmem:[%s11880_s3 + $0x48] sm:$0xff]  }
 0x348   : > { %v10707_v25 = vadd.f32 %v10534_v16, %v10435_v15  ;;  %v10711_v38 = vpack.c.bf16 %v10690_v63, %v10699_v41  ;;  %v3437_v12 = vrot.slane %v10699_v41, 1  ;;  %v3440_v26 = vrot.slane %v10690_v63, 1 }
 0x349   : > { %v3778_v18 = vpack.c.bf16 %v10699_v41, %v10617_v50  ;;  %v2723_v51 = vmax.f32 %v8678_v10, 0.0  ;;  %v2726_v9 = vmax.f32 %v8679_v31, 0.0  ;;  %v2724_v8 = vmax.f32 %v8680_v0, 0.0 }
 0x34a   : > { %v2729_v16 = vmax.f32 %v10707_v25, 0.0  ;;  %v10722_v62 = vsel %vm707_vm4, %v3437_v12, %v3438_v29  ;;  %8118 = vmatmul.mubr.bf16.vlgmr.msra.gmra.mrb[32].mxu0 %v10711_v38  ;;  %v10727_v21 = vadd.f32 %v10435_v15, %v10538_v44  ;;  %v10731_v35 = vadd.f32 %v10545_v32, %v10435_v15 }
 0x34b   : > { %8189 = vmatprep.mubr.bf16.mxu1 %v3778_v18  ;;  %v3116_v40 = vrot.slane %v10614_v13, 1  ;;  %v2745_v61 = vmax.f32 %v2723_v51, %v2725_v33  ;;  %v2746_v7 = vmax.f32 %v2724_v8, %v2726_v9  ;;  %v10736_v2 = vadd.f32 %v10435_v15, %v10552_v37  ;;  %8126 = vmatpush3.bf16.msra.mxu0 %v10429_v53  ;;  %v9108_v53 = vld [vmem:[%s11880_s3 + $0x50] sm:$0xff]  }
 0x34c   : > { %v12111_v17 = vrot.slane %v10612_v46, 1  ;;  %v2727_v44 = vmax.f32 %v10727_v21, 0.0  ;;  %v2730_v32 = vmax.f32 %v10731_v35, 0.0  ;;  %v10752_v55 = vsel %vm460_vm1, %v10620_v3, %v10605_v42  ;;  %8127 = vmatprep.subr.bf16.mxu0 %v9107_v5 }
 0x34d   : > { %v10747_v30 = vmax.f32 %v10614_v13, %v3116_v40  ;;  %v2786_v37 = vsel %vm460_vm1, %v2745_v61, -inf  ;;  %v2900_v52 = vsel %vm2864_vm6, %v2745_v61, -inf  ;;  %v2957_v11 = vsel %vm2921_vm7, %v2745_v61, -inf }
 0x34e   : > { %v10742_v56 = vmax.f32 %v10612_v46, %v12111_v17  ;;  %v2843_v46 = vsel %vm2807_vm5, %v2745_v61, -inf  ;;  %v2787_v13 = vrot.slane %v2786_v37, 4  ;;  %v2901_v14 = vrot.slane %v2900_v52, 4 }
 0x34f   : > { %v2844_v57 = vrot.slane %v2843_v46, 4  ;;  %v2958_v59 = vrot.slane %v2957_v11, 4  ;;  %v3013_v42 = vsel %vm460_vm1, %v2746_v7, -inf  ;;  %v3069_v3 = vsel %vm2807_vm5, %v2746_v7, -inf  ;;  %8128 = vmatpush3.bf16.msra.mxu0 %v9107_v5 }
 0x350   : > { %v3125_v20 = vsel %vm2864_vm6, %v2746_v7, -inf  ;;  %v3181_v54 = vsel %vm2921_vm7, %v2746_v7, -inf  ;;  %v2788_v43 = vmax.f32 %v2786_v37, %v2787_v13  ;;  %v2902_v47 = vmax.f32 %v2900_v52, %v2901_v14  ;;  %8129 = vmatprep.subr.bf16.mxu0 %v9108_v53  ;;  %v9112_v37 = vld [vmem:[%s11880_s3 + $0x60] sm:$0xff]  }
 0x351   : > { %v2845_v28 = vmax.f32 %v2843_v46, %v2844_v57  ;;  %v2959_v23 = vmax.f32 %v2957_v11, %v2958_v59  ;;  %v3014_v29 = vrot.slane %v3013_v42, 4  ;;  %v3070_v24 = vrot.slane %v3069_v3, 4 }
 0x352   : > { %v3126_v33 = vrot.slane %v3125_v20, 4  ;;  %v3182_v10 = vrot.slane %v3181_v54, 4  ;;  %v2789_v31 = vrot.slane %v2788_v43, 2  ;;  %v2903_v12 = vrot.slane %v2902_v47, 2 }
 0x353   : > { %v2846_v0 = vrot.slane %v2845_v28, 2  ;;  %v2960_v18 = vrot.slane %v2959_v23, 2  ;;  %v3015_v51 = vmax.f32 %v3013_v42, %v3014_v29  ;;  %v3071_v9 = vmax.f32 %v3069_v3, %v3070_v24  ;;  %8130 = vmatpush3.bf16.msra.mxu0 %v9108_v53  ;;  %v9114_v29 = vld [vmem:[%s11880_s3 + $0x68] sm:$0xff]  }
 0x354   : > { %v3127_v5 = vmax.f32 %v3125_v20, %v3126_v33  ;;  %v3183_v8 = vmax.f32 %v3181_v54, %v3182_v10  ;;  %v2790_v40 = vmax.f32 %v2788_v43, %v2789_v31  ;;  %v2904_v7 = vmax.f32 %v2902_v47, %v2903_v12  ;;  %8131 = vmatprep.subr.bf16.mxu0 %v9110_v22 }
 0x355   : > { %v2847_v61 = vmax.f32 %v2845_v28, %v2846_v0  ;;  %v2961_v17 = vmax.f32 %v2959_v23, %v2960_v18  ;;  %v3016_v46 = vrot.slane %v3015_v51, 2  ;;  %v3072_v52 = vrot.slane %v3071_v9, 2  ;;  %v12112_v18 = vld [vmem:[#allocation14_spill] sm:$0xff] }
 0x356   : > { %v3128_v11 = vrot.slane %v3127_v5, 2  ;;  %v3184_v13 = vrot.slane %v3183_v8, 2  ;;  %v2791_v57 = vrot.slane %v2790_v40, 1  ;;  %v2905_v59 = vrot.slane %v2904_v7, 1 }
 0x357   : > { %v2848_v14 = vrot.slane %v2847_v61, 1  ;;  %v2962_v42 = vrot.slane %v2961_v17, 1  ;;  %v3017_v3 = vmax.f32 %v3015_v51, %v3016_v46  ;;  %v10771_v20 = vmax.f32 %v3071_v9, %v3072_v52  ;;  %8132 = vmatpush3.bf16.msra.mxu0 %v9110_v22 }
 0x358   : > { %v10773_v53 = vmax.f32 %v3127_v5, %v3128_v11  ;;  %v10775_v54 = vmax.f32 %v3183_v8, %v3184_v13  ;;  %v2792_v43 = vmax.f32 %v2790_v40, %v2791_v57  ;;  %v10779_v47 = vmax.f32 %v2904_v7, %v2905_v59  ;;  %8133 = vmatprep.subr.bf16.mxu0 %v9112_v37  ;;  %v9118_v59 = vld [vmem:[%s11880_s3 + $0x78] sm:$0xff]  }
 0x359   : > { %v10777_v28 = vmax.f32 %v2847_v61, %v2848_v14  ;;  %v10781_v23 = vmax.f32 %v2961_v17, %v2962_v42  ;;  %v3018_v24 = vrot.slane %v3017_v3, 1  ;;  %v3074_v33 = vrot.slane %v10771_v20, 1 }
 0x35a   : > { %v2747_v22 = vmax.f32 %v2727_v44, %v2729_v16  ;;  %v2728_v10 = vmax.f32 %v10736_v2, 0.0  ;;  %v10793_v31 = vsel %vm459_vm0, 0.0, %v2792_v43  ;;  %v3222_v0 = vsel %vm3218_vm8, %v10752_v55, %v10608_v39 }
 0x35b   : > { %v10800_v12 = vadd.f32 %v10581_v27, %v10435_v15  ;;  %v10804_v51 = vadd.f32 %v10435_v15, %v12112_v18  ;;  %v10806_v25 = vmax.f32 %v3017_v3, %v3018_v24  ;;  %8134 = vmatpush3.bf16.msra.mxu0 %v9112_v37  ;;  %v9116_v15 = vld [vmem:[%s11880_s3 + $0x70] sm:$0xff]   ;;  %v3231_v8 = vsel %vm3227_vm9, %v3222_v0, %v10610_v48  ;;  %v12113_v37 = vld [vmem:[#allocation23_spill] sm:$0xff] }
 0x35c   : > { %v2793_v16 = vsel %vm460_vm1, %v2747_v22, -inf  ;;  %v2850_v21 = vsel %vm2807_vm5, %v2747_v22, -inf  ;;  %v2907_v2 = vsel %vm2864_vm6, %v2747_v22, -inf  ;;  %v2964_v55 = vsel %vm2921_vm7, %v2747_v22, -inf  ;;  %8135 = vmatprep.subr.bf16.mxu0 %v9114_v29 }
 0x35d   : > { %v2794_v44 = vrot.slane %v2793_v16, 4  ;;  %v2851_v9 = vrot.slane %v2850_v21, 4  ;;  %v2908_v39 = vrot.slane %v2907_v2, 4  ;;  %v2965_v27 = vrot.slane %v2964_v55, 4 }
 0x35e   : > { %v2748_v5 = vmax.f32 %v2728_v10, %v2730_v32  ;;  %v2733_v40 = vmax.f32 %v10800_v12, 0.0  ;;  %v3240_v46 = vsel %vm3236_vm10, %v3231_v8, %v12113_v37 }
 0x35f   : > { %v2795_v61 = vmax.f32 %v2793_v16, %v2794_v44  ;;  %v2852_v7 = vmax.f32 %v2850_v21, %v2851_v9  ;;  %v2909_v17 = vmax.f32 %v2907_v2, %v2908_v39  ;;  %v2966_v52 = vmax.f32 %v2964_v55, %v2965_v27  ;;  %8136 = vmatpush3.bf16.msra.mxu0 %v9114_v29  ;;  %v10832_v55 = vld [vmem:[%s11880_s3 + $0x80] sm:$0xff]  }
 0x360   : > { %v3020_v11 = vsel %vm460_vm1, %v2748_v5, -inf  ;;  %v3076_v13 = vsel %vm2807_vm5, %v2748_v5, -inf  ;;  %v3132_v57 = vsel %vm2864_vm6, %v2748_v5, -inf  ;;  %8137 = vmatprep.subr.bf16.mxu0 %v9116_v15  ;;  %v3188_v24 = vsel %vm2921_vm7, %v2748_v5, -inf }
 0x361   : > { %v2796_v35 = vrot.slane %v2795_v61, 2  ;;  %v2853_v32 = vrot.slane %v2852_v7, 2  ;;  %v2910_v14 = vrot.slane %v2909_v17, 2  ;;  %v3021_v48 = vrot.slane %v3020_v11, 4 }
 0x362   : > { %v2967_v42 = vrot.slane %v2966_v52, 2  ;;  %v3077_v3 = vrot.slane %v3076_v13, 4  ;;  %v3133_v43 = vrot.slane %v3132_v57, 4  ;;  %v3189_v21 = vrot.slane %v3188_v24, 4 }
 0x363   : > { %v2797_v22 = vmax.f32 %v2795_v61, %v2796_v35  ;;  %v2854_v10 = vmax.f32 %v2852_v7, %v2853_v32  ;;  %v2911_v0 = vmax.f32 %v2909_v17, %v2910_v14  ;;  %v3022_v12 = vmax.f32 %v3020_v11, %v3021_v48  ;;  %8138 = vmatpush3.bf16.msra.mxu0 %v9116_v15 }
 0x364   : > { %v2968_v18 = vmax.f32 %v2966_v52, %v2967_v42  ;;  %v3078_v29 = vmax.f32 %v3076_v13, %v3077_v3  ;;  %v3134_v16 = vmax.f32 %v3132_v57, %v3133_v43  ;;  %8139 = vmatprep.subr.bf16.mxu0 %v9118_v59  ;;  %v3190_v61 = vmax.f32 %v3188_v24, %v3189_v21  ;;  %v12114_v24 = vld [vmem:[#allocation7_spill] sm:$0xff] }
 0x365   : > { %v2798_v2 = vrot.slane %v2797_v22, 1  ;;  %v2855_v44 = vrot.slane %v2854_v10, 1  ;;  %v2912_v9 = vrot.slane %v2911_v0, 1  ;;  %v3023_v39 = vrot.slane %v3022_v12, 2 }
 0x366   : > { %v2969_v27 = vrot.slane %v2968_v18, 1  ;;  %v3079_v5 = vrot.slane %v3078_v29, 2  ;;  %v3135_v8 = vrot.slane %v3134_v16, 2  ;;  %v3191_v57 = vrot.slane %v3190_v61, 2 }
 0x367   : > { %v2799_v7 = vmax.f32 %v2797_v22, %v2798_v2  ;;  %v10834_v17 = vmax.f32 %v2854_v10, %v2855_v44  ;;  %v10836_v37 = vmax.f32 %v2911_v0, %v2912_v9  ;;  %v3024_v15 = vmax.f32 %v3022_v12, %v3023_v39  ;;  %8140 = vmatpush3.bf16.msra.mxu0 %v9118_v59  ;;  %v9298_v59 = vld [vmem:[%s11879_s2] ss:$0 sm:$0xff]  ;;  %v9111_v12 = vld [vmem:[%s11880_s3 + $0x108] sm:$0xff]  }
 0x368   : > { %v10838_v52 = vmax.f32 %v2968_v18, %v2969_v27  ;;  %v10840_v11 = vmax.f32 %v3078_v29, %v3079_v5  ;;  %v10842_v13 = vmax.f32 %v3134_v16, %v3135_v8  ;;  %v3248_v14 = vsel %vm1082_vm3, %v3240_v46, %v10742_v56  ;;  %8149 = vmatprep.subr.bf16.mxu0 %v10832_v55  ;;  %v12115_v46 = vld [vmem:[#allocation12_spill] sm:$0xff] }
 0x369   : > { %v10845_v35 = vsel %vm459_vm0, 0.0, %v2799_v7  ;;  %v3025_v32 = vrot.slane %v3024_v15, 1  ;;  %v2731_v48 = vmax.f32 %v10804_v51, 0.0  ;;  %v10852_v3 = vmax.f32 %v3190_v61, %v3191_v57  ;;  %v9113_v8 = vld [vmem:[%s11880_s3 + $0x110] sm:$0xff]  }
 0x36a   : > { %v3081_v42 = vrot.slane %v10840_v11, 1  ;;  %v10856_v43 = vsel %vm707_vm4, %v3248_v14, %v10747_v30  ;;  %v8687_v22 = vadd.f32 %v9298_v59, %v12114_v24  ;;  %v8688_v0 = vadd.f32 %v9298_v59, %v12115_v46 }
 0x36b   : > { %v10862_v10 = vmax.f32 %v3024_v15, %v3025_v32  ;;  %v3779_v56 = vpack.c.bf16 %v10856_v43, %v10690_v63  ;;  %v2749_v51 = vmax.f32 %v2731_v48, %v2733_v40  ;;  %v10873_v18 = vmax.f32 %v10667_v1, %v3067_v4  ;;  %v9299_v4 = vld [vmem:[%s11880_s3 + $0x100] sm:$0xff]  }
 0x36c   : > { %v2734_v30 = vmax.f32 %v8687_v22, 0.0  ;;  %v3123_v29 = vrot.slane %v10669_v45, 1  ;;  %v3214_v16 = vsel %vm460_vm1, %v10660_v36, %v10653_v34  ;;  %v2732_v5 = vmax.f32 %v8688_v0, 0.0 }
 0x36d   : > { %8190 = vmatmul.mubr.bf16.vlgmr.msra.gmra.mrb[0].mxu1 %v3779_v56  ;;  %v2800_v40 = vsel %vm460_vm1, %v2749_v51, -inf  ;;  %v2857_v21 = vsel %vm2807_vm5, %v2749_v51, -inf  ;;  %v2914_v2 = vsel %vm2864_vm6, %v2749_v51, -inf  ;;  %v2971_v44 = vsel %vm2921_vm7, %v2749_v51, -inf }
 0x36e   : > { %v2801_v9 = vrot.slane %v2800_v40, 4  ;;  %v2858_v39 = vrot.slane %v2857_v21, 4  ;;  %v2915_v27 = vrot.slane %v2914_v2, 4  ;;  %v2972_v1 = vrot.slane %v2971_v44, 4  ;;  %8198 = vmatpush3.bf16.msra.mxu1 %v9299_v4 }
 0x36f   : > { %v10887_v34 = vmax.f32 %v10669_v45, %v3123_v29  ;;  %v3223_v36 = vsel %vm3218_vm8, %v3214_v16, %v10655_v60  ;;  %8199 = vmatprep.subr.bf16.mxu1 %v9111_v12  ;;  %v10897_v61 = vmax.f32 %v10771_v20, %v3074_v33  ;;  %v2750_v14 = vmax.f32 %v2732_v5, %v2734_v30  ;;  %v9117_v5 = vld [vmem:[%s11880_s3 + $0x120] sm:$0xff]  }
 0x370   : > { %v2802_v7 = vmax.f32 %v2800_v40, %v2801_v9  ;;  %v2859_v15 = vmax.f32 %v2857_v21, %v2858_v39  ;;  %v2916_v57 = vmax.f32 %v2914_v2, %v2915_v27  ;;  %v2973_v32 = vmax.f32 %v2971_v44, %v2972_v1 }
 0x371   : > { %v3232_v45 = vsel %vm3227_vm9, %v3223_v36, %v10657_v6  ;;  %v3130_v60 = vrot.slane %v10773_v53, 1  ;;  %v3215_v48 = vsel %vm460_vm1, %v10793_v31, %v10777_v28  ;;  %v3027_v20 = vsel %vm460_vm1, %v2750_v14, -inf  ;;  %v9115_v6 = vld [vmem:[%s11880_s3 + $0x118] sm:$0xff]  }
 0x372   : > { %v2803_v59 = vrot.slane %v2802_v7, 2  ;;  %v2860_v24 = vrot.slane %v2859_v15, 2  ;;  %v2917_v22 = vrot.slane %v2916_v57, 2  ;;  %v2974_v56 = vrot.slane %v2973_v32, 2  ;;  %8200 = vmatpush3.bf16.msra.mxu1 %v9111_v12 }
 0x373   : > { %v3083_v33 = vsel %vm2807_vm5, %v2750_v14, -inf  ;;  %v3139_v51 = vsel %vm2864_vm6, %v2750_v14, -inf  ;;  %v3195_v46 = vsel %vm2921_vm7, %v2750_v14, -inf  ;;  %8201 = vmatprep.subr.bf16.mxu1 %v9113_v8  ;;  %v3028_v29 = vrot.slane %v3027_v20, 4 }
 0x374   : > { %v2804_v0 = vmax.f32 %v2802_v7, %v2803_v59  ;;  %v2861_v28 = vmax.f32 %v2859_v15, %v2860_v24  ;;  %v2918_v31 = vmax.f32 %v2916_v57, %v2917_v22  ;;  %v2975_v30 = vmax.f32 %v2973_v32, %v2974_v56 }
 0x375   : > { %v3084_v16 = vrot.slane %v3083_v33, 4  ;;  %v3140_v12 = vrot.slane %v3139_v51, 4  ;;  %v3196_v40 = vrot.slane %v3195_v46, 4  ;;  %v3029_v39 = vmax.f32 %v3027_v20, %v3028_v29  ;;  %v12116_v29 = vld [vmem:[#allocation4_spill] sm:$0xff] }
 0x376   : > { %v2805_v21 = vrot.slane %v2804_v0, 1  ;;  %v2862_v2 = vrot.slane %v2861_v28, 1  ;;  %v2919_v44 = vrot.slane %v2918_v31, 1  ;;  %v2976_v9 = vrot.slane %v2975_v30, 1  ;;  %8202 = vmatpush3.bf16.msra.mxu1 %v9113_v8 }
 0x377   : > { %v3085_v27 = vmax.f32 %v3083_v33, %v3084_v16  ;;  %v3141_v1 = vmax.f32 %v3139_v51, %v3140_v12  ;;  %v3197_v4 = vmax.f32 %v3195_v46, %v3196_v40  ;;  %8203 = vmatprep.subr.bf16.mxu1 %v9115_v6  ;;  %v3030_v32 = vrot.slane %v3029_v39, 2 }
 0x378   : > { %v2806_v36 = vmax.f32 %v2804_v0, %v2805_v21  ;;  %v2863_v7 = vmax.f32 %v2861_v28, %v2862_v2  ;;  %v2920_v15 = vmax.f32 %v2918_v31, %v2919_v44  ;;  %v2977_v57 = vmax.f32 %v2975_v30, %v2976_v9  ;;  %v9119_v28 = vld [vmem:[%s11880_s3 + $0x128] sm:$0xff]  }
 0x379   : > { %v3086_v14 = vrot.slane %v3085_v27, 2  ;;  %v3142_v59 = vrot.slane %v3141_v1, 2  ;;  %v3198_v24 = vrot.slane %v3197_v4, 2  ;;  %v3241_v8 = vsel %vm3236_vm10, %v3232_v45, %v10693_v49  ;;  %v12118_v2 = vld [vmem:[#allocation11_spill] sm:$0xff] }
 0x37a   : > { %v3209_v22 = vsel %vm459_vm0, 0.0, %v2806_v36  ;;  %v3131_v56 = vmax.f32 %v10773_v53, %v3130_v60  ;;  %v3224_v20 = vsel %vm3218_vm8, %v3215_v48, %v10779_v47  ;;  %8204 = vmatpush3.bf16.msra.mxu1 %v9115_v6  ;;  %v3031_v33 = vmax.f32 %v3029_v39, %v3030_v32 }
 0x37b   : > { %v3087_v51 = vmax.f32 %v3085_v27, %v3086_v14  ;;  %v3143_v46 = vmax.f32 %v3141_v1, %v3142_v59  ;;  %v10921_v0 = vmax.f32 %v3197_v4, %v3198_v24  ;;  %8205 = vmatprep.subr.bf16.mxu1 %v9117_v5  ;;  %v3249_v31 = vsel %vm1082_vm3, %v3241_v8, %v10873_v18  ;;  %v12119_v1 = vld [vmem:[#allocation19_spill] sm:$0xff] }
 0x37c   : > { %v3233_v49 = vsel %vm3227_vm9, %v3224_v20, %v10781_v23  ;;  %v3082_v53 = vmax.f32 %v10840_v11, %v3081_v42  ;;  %v3137_v47 = vrot.slane %v10842_v13, 1  ;;  %v3032_v45 = vrot.slane %v3031_v33, 1 }
 0x37d   : > { %v3088_v60 = vrot.slane %v3087_v51, 1  ;;  %v10936_v48 = vsel %vm707_vm4, %v3249_v31, %v10887_v34  ;;  %v3242_v6 = vsel %vm3236_vm10, %v3233_v49, %v10806_v25  ;;  %v3216_v42 = vsel %vm460_vm1, %v10845_v35, %v10834_v17 }
 0x37e   : > { %v10942_v18 = vpack.c.bf16 %v10936_v48, %v10856_v43  ;;  %v3250_v23 = vsel %vm1082_vm3, %v3242_v6, %v10897_v61  ;;  %v3138_v11 = vmax.f32 %v10842_v13, %v3137_v47  ;;  %8206 = vmatpush3.bf16.msra.mxu1 %v9117_v5  ;;  %v3033_v30 = vmax.f32 %v3031_v33, %v3032_v45  ;;  %v9121_v61 = vld [vmem:[%s11880_s3 + $0x130] sm:$0xff]  }
 0x37f   : > { %v10951_v34 = vsel %vm707_vm4, %v3250_v23, %v3131_v56  ;;  %v3225_v25 = vsel %vm3218_vm8, %v3216_v42, %v10836_v37  ;;  %v3151_v16 = vrot.slane %v12116_v29, 1  ;;  %8207 = vmatprep.subr.bf16.mxu1 %v9119_v28  ;;  %v12117_v35 = vmov 0.0  }
 0x380   : > { %8121 = vmatprep.mubr.bf16.mxu0 %v10942_v18  ;;  %v3780_v17 = vpack.c.bf16 %v10951_v34, %v10936_v48  ;;  %v3234_v13 = vsel %vm3227_vm9, %v3225_v25, %v10838_v52  ;;  %v10965_v12 = vrot.slane %v12117_v35, 1  ;;  %v3434_v37 = vrot.slane %v10617_v50, 1 }
 0x381   : > { %v3243_v40 = vsel %vm3236_vm10, %v3234_v13, %v10862_v10  ;;  %v3152_v21 = vmax.f32 %v12116_v29, %v3151_v16  ;;  %v3441_v44 = vrot.slane %v12118_v2, 1  ;;  %v3089_v9 = vmax.f32 %v3087_v51, %v3088_v60  ;;  %v9122_v13 = vld [vmem:[%s11880_s3 + $0x88] sm:$0xff]  }
 0x382   : > { %8193 = vmatprep.mubr.bf16.mxu1 %v3780_v17  ;;  %v3251_v39 = vsel %vm1082_vm3, %v3243_v40, %v3082_v53  ;;  %8208 = vmatpush3.bf16.msra.mxu1 %v9119_v28  ;;  %v3144_v27 = vrot.slane %v3143_v46, 1  ;;  %v3217_v52 = vsel %vm460_vm1, %v3209_v22, %v2863_v7  ;;  %v3172_v4 = vrot.slane %v12119_v1, 1  ;;  %v9123_v7 = vld [vmem:[%s11880_s3 + $0x138] sm:$0xff]   ;;  %v11015_v53 = vld [vmem:[%s11880_s3 + $0x140] sm:$0xff]  }
 0x383   : > { %v10976_v5 = vsel %vm707_vm4, %v3251_v39, %v3138_v11  ;;  %v10979_v36 = vsel %vm459_vm0, %v3152_v21, 0.0  ;;  %8209 = vmatprep.subr.bf16.mxu1 %v9121_v61  ;;  %v10984_v10 = vsel %vm707_vm4, %v3440_v26, %v3441_v44  ;;  %v3226_v32 = vsel %vm3218_vm8, %v3217_v52, %v2920_v15 }
 0x384   : > { %v10992_v14 = vpack.c.bf16 %v10976_v5, %v10951_v34  ;;  %v3435_v59 = vrot.slane %v10979_v36, 1  ;;  %v10997_v24 = vpack.c.bf16 %v10984_v10, %v10722_v62  ;;  %v3145_v22 = vmax.f32 %v3143_v46, %v3144_v27 }
 0x385   : > { %v3235_v26 = vsel %vm3227_vm9, %v3226_v32, %v2977_v57  ;;  %v3173_v8 = vmax.f32 %v12119_v1, %v3172_v4  ;;  %v3179_v15 = vrot.slane %v10681_v19, 1  ;;  %v3443_v56 = vrot.slane %v10856_v43, 1 }
 0x386   : > { %8122 = vmatmul.mubr.bf16.gmra.mrb[36].mxu0 %v10992_v14  ;;  %v3436_v20 = vsel %vm707_vm4, %v3434_v37, %v3435_v59  ;;  %v3244_v33 = vsel %vm3236_vm10, %v3235_v26, %v3033_v30  ;;  %8210 = vmatpush3.bf16.msra.mxu1 %v9121_v61  ;;  %v3446_v51 = vrot.slane %v10936_v48, 1  ;;  %v3186_v28 = vrot.slane %v10775_v54, 1 }
 0x387   : > { %v3463_v46 = vpack.c.bf16 %v3436_v20, %v10965_v12  ;;  %v3252_v57 = vsel %vm1082_vm3, %v3244_v33, %v3089_v9  ;;  %v3180_v31 = vmax.f32 %v10681_v19, %v3179_v15  ;;  %v3264_v49 = vsel %vm459_vm0, %v3173_v8, 0.0  ;;  %8211 = vmatprep.subr.bf16.mxu1 %v9123_v7 }
 0x388   : > { %v11018_v47 = vsel %vm707_vm4, %v3252_v57, %v3145_v22  ;;  %v3444_v45 = vrot.slane %v3264_v49, 1  ;;  %v3926_v60 = vpack.c.bf16 %v10722_v62, %v3436_v20  ;;  %v3187_v6 = vmax.f32 %v10775_v54, %v3186_v28  ;;  %v9126_v57 = vld [vmem:[%s11880_s3 + $0x98] sm:$0xff]  }
 0x389   : > { %8141 = vmatprep.mubr.bf16.mxu0 %v3463_v46  ;;  %v3781_v19 = vpack.c.bf16 %v11018_v47, %v10976_v5  ;;  %v11025_v23 = vsel %vm459_vm0, %v3180_v31, 0.0  ;;  %v3193_v11 = vrot.slane %v10852_v3, 1  ;;  %v3449_v42 = vrot.slane %v10951_v34, 1 }
 0x38a   : > { %v3610_v30 = vrot.slane %v10699_v41, 2  ;;  %v3445_v25 = vsel %vm707_vm4, %v3443_v56, %v3444_v45  ;;  %v3447_v29 = vrot.slane %v11025_v23, 1  ;;  %8212 = vmatpush3.bf16.msra.mxu1 %v9123_v7  ;;  %v11033_v62 = vsel %vm459_vm0, %v3187_v6, 0.0  ;;  %v9124_v7 = vld [vmem:[%s11880_s3 + $0x90] sm:$0xff]  }
 0x38b   : > { %8194 = vmatmul.mubr.bf16.gmra.mrb[4].mxu1 %v3781_v19  ;;  %v3927_v54 = vpack.c.bf16 %v3445_v25, %v10984_v10  ;;  %8221 = vmatprep.subr.bf16.mxu1 %v11015_v53  ;;  %v3194_v16 = vmax.f32 %v10852_v3, %v3193_v11  ;;  %v3450_v61 = vrot.slane %v11033_v62, 1  ;;  %v3452_v17 = vrot.slane %v10976_v5, 1 }
 0x38c   : > { %v3448_v41 = vsel %vm707_vm4, %v3446_v51, %v3447_v29  ;;  %8213 = vmatprep.mubr.bf16.mxu1 %v3926_v60  ;;  %v11045_v37 = vrot.slane %v12117_v35, 2  ;;  %v3607_v40 = vrot.slane %v10617_v50, 2  ;;  %v3200_v21 = vrot.slane %v10921_v0, 1 }
 0x38d   : > { %v11049_v44 = vpack.c.bf16 %v3448_v41, %v3445_v25  ;;  %v3267_v3 = vsel %vm459_vm0, %v3194_v16, 0.0  ;;  %v3451_v9 = vsel %vm707_vm4, %v3449_v42, %v3450_v61  ;;  %v3608_v39 = vrot.slane %v10979_v36, 2  ;;  %v9131_v61 = vld [vmem:[%s11880_s3 + $0x158] sm:$0xff]  }
 0x38e   : > { %8142 = vmatmul.mubr.bf16.vlgmr.msra.gmra.mrb[32].mxu0 %v10997_v24  ;;  %v3453_v27 = vrot.slane %v3267_v3, 1  ;;  %v3928_v52 = vpack.c.bf16 %v3451_v9, %v3448_v41  ;;  %v3201_v1 = vmax.f32 %v10921_v0, %v3200_v21  ;;  %v3922_v4 = vrot.slane %v11018_v47, 1  ;;  %v9133_v41 = vld [vmem:[%s11880_s3 + $0x160] sm:$0xff]   ;;  %v9134_v21 = vld [vmem:[%s11880_s3 + $0xb8] sm:$0xff]  }
 0x38f   : > { %8150 = vmatpush3.bf16.msra.mxu0 %v10832_v55  ;;  %8145 = vmatprep.mubr.bf16.mxu0 %v11049_v44  ;;  %v3609_v50 = vsel %vm1082_vm3, %v3607_v40, %v3608_v39  ;;  %v3611_v10 = vrot.slane %v10677_v58, 2  ;;  %v3613_v32 = vrot.slane %v10690_v63, 2  ;;  %v3614_v36 = vrot.slane %v12118_v2, 2  ;;  %v9127_v58 = vld [vmem:[%s11880_s3 + $0x148] sm:$0xff]   ;;  %v9138_v39 = vld [vmem:[%s11880_s3 + $0x180] sm:$0xff]  }
 0x390   : > { %8151 = vmatprep.subr.bf16.mxu0 %v9122_v13  ;;  %v3454_v0 = vsel %vm707_vm4, %v3452_v17, %v3453_v27  ;;  %v3268_v59 = vsel %vm459_vm0, %v3201_v1, 0.0  ;;  %v3616_v55 = vrot.slane %v10856_v43, 2  ;;  %v3617_v22 = vrot.slane %v3264_v49, 2  ;;  %v9130_v17 = vld [vmem:[%s11880_s3 + $0xa8] sm:$0xff]   ;;  %v9141_v1 = vld [vmem:[%s11880_s3 + $0x198] sm:$0xff]  }
 0x391   : > { %v11069_v26 = vpack.c.bf16 %v3454_v0, %v3451_v9  ;;  %v3923_v63 = vrot.slane %v3268_v59, 1  ;;  %v3612_v2 = vsel %vm1082_vm3, %v3610_v30, %v3611_v10  ;;  %v11076_v8 = vsel %vm1082_vm3, %v3613_v32, %v3614_v36  ;;  %v9135_v40 = vld [vmem:[%s11880_s3 + $0x168] sm:$0xff]   ;;  %v9137_v9 = vld [vmem:[%s11880_s3 + $0x178] sm:$0xff]   ;;  %v9144_v10 = vld [vmem:[%s11880_s3 + $0x1b0] sm:$0xff]  }
 0x392   : > { %v11079_v15 = vpack.c.bf16 %v11076_v8, %v3612_v2  ;;  %v4072_v56 = vpack.c.bf16 %v3612_v2, %v3609_v50  ;;  %v11082_v20 = vsel %vm1082_vm3, %v3616_v55, %v3617_v22  ;;  %v3619_v43 = vrot.slane %v10936_v48, 2  ;;  %v9139_v27 = vld [vmem:[%s11880_s3 + $0x188] sm:$0xff]   ;;  %v9146_v32 = vld [vmem:[%s11880_s3 + $0x1c0] sm:$0xff]   ;;  %v9161_v2 = vld [vmem:[%s11880_s3 + $0x238] sm:$0xff]  }
 0x393   : > { %8152 = vmatpush3.bf16.msra.mxu0 %v9122_v13  ;;  %8214 = vmatmul.mubr.bf16.vlgmr.msra.gmra.mrb[0].mxu1 %v3927_v54  ;;  %v11086_v33 = vsel %vm707_vm4, %v3922_v4, %v3923_v63  ;;  %v3620_v51 = vrot.slane %v11025_v23, 2  ;;  %v4073_v28 = vpack.c.bf16 %v11082_v20, %v11076_v8  ;;  %v3622_v46 = vrot.slane %v10951_v34, 2  ;;  %v9129_v34 = vld [vmem:[%s11880_s3 + $0x150] sm:$0xff]   ;;  %v9142_v4 = vld [vmem:[%s11880_s3 + $0x1a0] sm:$0xff]   ;;  %v9147_v36 = vld [vmem:[%s11880_s3 + $0x1c8] sm:$0xff]  }
 0x394   : > { %8153 = vmatprep.subr.bf16.mxu0 %v9124_v7  ;;  %8222 = vmatpush3.bf16.msra.mxu1 %v11015_v53  ;;  %v3929_v48 = vpack.c.bf16 %v11086_v33, %v3454_v0  ;;  %v3623_v31 = vrot.slane %v11033_v62, 2  ;;  %v3625_v49 = vrot.slane %v10976_v5, 2  ;;  %v3626_v45 = vrot.slane %v3267_v3, 2  ;;  %v9128_v62 = vld [vmem:[%s11880_s3 + $0xa0] sm:$0xff]   ;;  %v9132_v13 = vld [vmem:[%s11880_s3 + $0xb0] sm:$0xff]   ;;  %v9155_v22 = vld [vmem:[%s11880_s3 + $0x208] sm:$0xff]  }
 0x395   : > { %v3636_v60 = vpack.c.bf16 %v3609_v50, %v11045_v37  ;;  %8217 = vmatprep.mubr.bf16.mxu1 %v3928_v52  ;;  %8223 = vmatprep.subr.bf16.mxu1 %v9127_v58  ;;  %v3621_v53 = vsel %vm1082_vm3, %v3619_v43, %v3620_v51  ;;  %v4068_v6 = vrot.slane %v11018_v47, 2  ;;  %v4069_v19 = vrot.slane %v3268_v59, 2  ;;  %v9136_v3 = vld [vmem:[%s11880_s3 + $0x170] sm:$0xff]   ;;  %v9143_v50 = vld [vmem:[%s11880_s3 + $0x1a8] sm:$0xff]   ;;  %v9149_v59 = vld [vmem:[%s11880_s3 + $0x1d8] sm:$0xff]  }
 0x396   : > { %8146 = vmatmul.mubr.bf16.gmra.mrb[36].mxu0 %v11069_v26  ;;  %v11107_v23 = vpack.c.bf16 %v3621_v53, %v11082_v20  ;;  %v3624_v5 = vsel %vm1082_vm3, %v3622_v46, %v3623_v31  ;;  %v3627_v11 = vsel %vm1082_vm3, %v3625_v49, %v3626_v45  ;;  %v4353_v42 = vpack.c.bf16 %v10965_v12, %v11086_v33  ;;  %v9140_v52 = vld [vmem:[%s11880_s3 + $0x190] sm:$0xff]   ;;  %v9154_v55 = vld [vmem:[%s11880_s3 + $0x200] sm:$0xff]   ;;  %v9157_v63 = vld [vmem:[%s11880_s3 + $0x218] sm:$0xff]  }
 0x397   : > { %8154 = vmatpush3.bf16.msra.mxu0 %v9124_v7  ;;  %8165 = vmatprep.mubr.bf16.mxu0 %v3636_v60  ;;  %v11113_v30 = vpack.c.bf16 %v3627_v11, %v3624_v5  ;;  %v4074_v25 = vpack.c.bf16 %v3624_v5, %v3621_v53  ;;  %v11116_v29 = vsel %vm1082_vm3, %v4068_v6, %v4069_v19  ;;  %v9148_v7 = vld [vmem:[%s11880_s3 + $0x1d0] sm:$0xff]   ;;  %v9162_v8 = vld [vmem:[%s11882_s5] sm:$0xff]   ;;  %v9165_v20 = vld [vmem:[%s11882_s5 + $0x18] sm:$0xff]  }
 0x398   : > { %8155 = vmatprep.subr.bf16.mxu0 %v9126_v57  ;;  %8224 = vmatpush3.bf16.msra.mxu1 %v9127_v58  ;;  %v4075_v54 = vpack.c.bf16 %v11116_v29, %v3627_v11  ;;  %v4492_v16 = vpack.c.bf16 %v11045_v37, %v11116_v29  ;;  %v4214_v0 = vpack.c.bf16 %v12117_v35, %v11018_v47  ;;  %v9152_v47 = vld [vmem:[%s11880_s3 + $0x1f0] sm:$0xff]   ;;  %v9166_v43 = vld [vmem:[%s11882_s5 + $0x20] sm:$0xff]   ;;  %v9167_v37 = vld [vmem:[%s11882_s5 + $0x28] sm:$0xff]  }
 0x399   : > { %8225 = vmatprep.subr.bf16.mxu1 %v9129_v34  ;;  %v9156_v58 = vld [vmem:[%s11880_s3 + $0x210] sm:$0xff]   ;;  %v6800_v31 = vld [vmem:[%s11881_s4] ss:$0 sm:$0xff] }
 0x39a   : > { %v9160_v12 = vld [vmem:[%s11880_s3 + $0x230] sm:$0xff]  }
 0x39b   : > { %8156 = vmatpush3.bf16.msra.mxu0 %v9126_v57  ;;  %8218 = vmatmul.mubr.bf16.gmra.mrb[4].mxu1 %v3929_v48  ;;  %v9169_v48 = vld [vmem:[%s11882_s5 + $0x38] sm:$0xff]  }
 0x39c   : > { %8157 = vmatprep.subr.bf16.mxu0 %v9128_v62  ;;  %8226 = vmatpush3.bf16.msra.mxu1 %v9129_v34 }
 0x39d   : > { %8237 = vmatprep.mubr.bf16.mxu1 %v4072_v56  ;;  %8227 = vmatprep.subr.bf16.mxu1 %v9131_v61  ;;  %v9164_v56 = vld [vmem:[%s11882_s5 + $0x10] sm:$0xff]  }
 0x39f   : > { %8158 = vmatpush3.bf16.msra.mxu0 %v9128_v62 }
 0x3a0   : > { %8159 = vmatprep.subr.bf16.mxu0 %v9130_v17  ;;  %8228 = vmatpush3.bf16.msra.mxu1 %v9131_v61 }
 0x3a1   : > { %8229 = vmatprep.subr.bf16.mxu1 %v9133_v41 }
 0x3a3   : > { %8160 = vmatpush3.bf16.msra.mxu0 %v9130_v17 }
 0x3a4   : > { %8161 = vmatprep.subr.bf16.mxu0 %v9132_v13  ;;  %8230 = vmatpush3.bf16.msra.mxu1 %v9133_v41 }
 0x3a5   : > { %8231 = vmatprep.subr.bf16.mxu1 %v9135_v40 }
 0x3a7   : > { %8162 = vmatpush3.bf16.msra.mxu0 %v9132_v13 }
 0x3a8   : > { %8163 = vmatprep.subr.bf16.mxu0 %v9134_v21  ;;  %8232 = vmatpush3.bf16.msra.mxu1 %v9135_v40 }
 0x3a9   : > { %8233 = vmatprep.subr.bf16.mxu1 %v9136_v3 }
 0x3ab   : > { %8164 = vmatpush3.bf16.msra.mxu0 %v9134_v21 }
 0x3ac   : > { %8234 = vmatpush3.bf16.msra.mxu1 %v9136_v3  ;;  %8637 = vmatprep.subr.bf16.mxu0 %v12117_v35 }
 0x3ad   : > { %8235 = vmatprep.subr.bf16.mxu1 %v9137_v9 }
 0x3ae   : > { %8166 = vmatmul.mubr.bf16.vlgmr.msra.gmra.mrb[32].mxu0 %v11079_v15 }
 0x3af   : > { %8169 = vmatprep.mubr.bf16.mxu0 %v11107_v23 }
 0x3b0   : > { %8236 = vmatpush3.bf16.msra.mxu1 %v9137_v9 }
 0x3b1   : > { %8245 = vmatprep.subr.bf16.mxu1 %v9138_v39 }
 0x3b3   : > { %8238 = vmatmul.mubr.bf16.vlgmr.msra.gmra.mrb[0].mxu1 %v4073_v28  ;;  %v9168_v28 = vld [vmem:[%s11882_s5 + $0x30] sm:$0xff]  }
 0x3b4   : > { %8241 = vmatprep.mubr.bf16.mxu1 %v4074_v25  ;;  %8246 = vmatpush3.bf16.msra.mxu1 %v9138_v39 }
 0x3b5   : > { %8247 = vmatprep.subr.bf16.mxu1 %v9139_v27 }
 0x3b6   : > { %8170 = vmatmul.mubr.bf16.gmra.mrb[36].mxu0 %v11113_v30 }
 0x3b7   : > { %8653 = vmatprep.mubr.msk.bf16.mxu0 %vm9310_vm11, %v12117_v35 }
 0x3b8   : > { %8248 = vmatpush3.bf16.msra.mxu1 %v9139_v27 }
 0x3b9   : > { %8249 = vmatprep.subr.bf16.mxu1 %v9140_v52 }
 0x3bb   : > { %8242 = vmatmul.mubr.bf16.gmra.mrb[4].mxu1 %v4075_v54 }
 0x3bc   : > { %8250 = vmatpush3.bf16.msra.mxu1 %v9140_v52  ;;  %8261 = vmatprep.mubr.bf16.mxu1 %v10711_v38  ;;  %v9145_v38 = vld [vmem:[%s11880_s3 + $0x1b8] sm:$0xff]  }
 0x3bd   : > { %8251 = vmatprep.subr.bf16.mxu1 %v9141_v1 }
 0x3c0   : > { %8252 = vmatpush3.bf16.msra.mxu1 %v9141_v1 }
 0x3c1   : > { %8253 = vmatprep.subr.bf16.mxu1 %v9142_v4 }
 0x3c4   : > { %8254 = vmatpush3.bf16.msra.mxu1 %v9142_v4 }
 0x3c5   : > { %8255 = vmatprep.subr.bf16.mxu1 %v9143_v50 }
 0x3c8   : > { %8256 = vmatpush3.bf16.msra.mxu1 %v9143_v50 }
 0x3c9   : > { %8257 = vmatprep.subr.bf16.mxu1 %v9144_v10 }
 0x3cc   : > { %8258 = vmatpush3.bf16.msra.mxu1 %v9144_v10 }
 0x3cd   : > { %8259 = vmatprep.subr.bf16.mxu1 %v9145_v38 }
 0x3d0   : > { %8260 = vmatpush3.bf16.msra.mxu1 %v9145_v38 }
 0x3d1   : > { %8269 = vmatprep.subr.bf16.mxu1 %v9146_v32 }
 0x3d3   : > { %8262 = vmatmul.mubr.bf16.vlgmr.msra.gmra.mrb[0].mxu1 %v10942_v18  ;;  %v9150_v18 = vld [vmem:[%s11880_s3 + $0x1e0] sm:$0xff]  }
 0x3d4   : > { %8265 = vmatprep.mubr.bf16.mxu1 %v10992_v14  ;;  %8270 = vmatpush3.bf16.msra.mxu1 %v9146_v32  ;;  %v9151_v14 = vld [vmem:[%s11880_s3 + $0x1e8] sm:$0xff]  }
 0x3d5   : > { %8271 = vmatprep.subr.bf16.mxu1 %v9147_v36 }
 0x3d8   : > { %8272 = vmatpush3.bf16.msra.mxu1 %v9147_v36 }
 0x3d9   : > { %8273 = vmatprep.subr.bf16.mxu1 %v9148_v7 }
 0x3db   : > { %8266 = vmatmul.mubr.bf16.gmra.mrb[4].mxu1 %v4214_v0 }
 0x3dc   : > { %8274 = vmatpush3.bf16.msra.mxu1 %v9148_v7  ;;  %8285 = vmatprep.mubr.bf16.mxu1 %v10997_v24  ;;  %v9153_v24 = vld [vmem:[%s11880_s3 + $0x1f8] sm:$0xff]  }
 0x3dd   : > { %8275 = vmatprep.subr.bf16.mxu1 %v9149_v59 }
 0x3e0   : > { %8276 = vmatpush3.bf16.msra.mxu1 %v9149_v59 }
 0x3e1   : > { %8277 = vmatprep.subr.bf16.mxu1 %v9150_v18 }
 0x3e4   : > { %8278 = vmatpush3.bf16.msra.mxu1 %v9150_v18 }
 0x3e5   : > { %8279 = vmatprep.subr.bf16.mxu1 %v9151_v14 }
 0x3e8   : > { %8280 = vmatpush3.bf16.msra.mxu1 %v9151_v14 }
 0x3e9   : > { %8281 = vmatprep.subr.bf16.mxu1 %v9152_v47 }
 0x3ec   : > { %8282 = vmatpush3.bf16.msra.mxu1 %v9152_v47 }
 0x3ed   : > { %8283 = vmatprep.subr.bf16.mxu1 %v9153_v24 }
 0x3f0   : > { %8284 = vmatpush3.bf16.msra.mxu1 %v9153_v24 }
 0x3f1   : > { %8293 = vmatprep.subr.bf16.mxu1 %v9154_v55 }
 0x3f3   : > { %8286 = vmatmul.mubr.bf16.vlgmr.msra.gmra.mrb[0].mxu1 %v11049_v44  ;;  %v9158_v44 = vld [vmem:[%s11880_s3 + $0x220] sm:$0xff]  }
 0x3f4   : > { %8289 = vmatprep.mubr.bf16.mxu1 %v11069_v26  ;;  %8294 = vmatpush3.bf16.msra.mxu1 %v9154_v55  ;;  %v9159_v26 = vld [vmem:[%s11880_s3 + $0x228] sm:$0xff]  }
 0x3f5   : > { %8295 = vmatprep.subr.bf16.mxu1 %v9155_v22 }
 0x3f8   : > { %8296 = vmatpush3.bf16.msra.mxu1 %v9155_v22 }
 0x3f9   : > { %8297 = vmatprep.subr.bf16.mxu1 %v9156_v58 }
 0x3fb   : > { %8290 = vmatmul.mubr.bf16.gmra.mrb[4].mxu1 %v4353_v42 }
 0x3fc   : > { %8298 = vmatpush3.bf16.msra.mxu1 %v9156_v58  ;;  %8309 = vmatprep.mubr.bf16.mxu1 %v11079_v15  ;;  %v9163_v15 = vld [vmem:[%s11882_s5 + $0x8] sm:$0xff]  }
 0x3fd   : > { %8299 = vmatprep.subr.bf16.mxu1 %v9157_v63 }
 0x400   : > { %8300 = vmatpush3.bf16.msra.mxu1 %v9157_v63 }
 0x401   : > { %8301 = vmatprep.subr.bf16.mxu1 %v9158_v44 }
 0x404   : > { %8302 = vmatpush3.bf16.msra.mxu1 %v9158_v44 }
 0x405   : > { %8303 = vmatprep.subr.bf16.mxu1 %v9159_v26 }
 0x408   : > { %8304 = vmatpush3.bf16.msra.mxu1 %v9159_v26  ;;  %v9170_v26 = vld [vmem:[%s11882_s5 + $0x100] sm:$0xff]  }
 0x409   : > { %8305 = vmatprep.subr.bf16.mxu1 %v9160_v12 }
 0x40c   : > { %8306 = vmatpush3.bf16.msra.mxu1 %v9160_v12 }
 0x40d   : > { %8307 = vmatprep.subr.bf16.mxu1 %v9161_v2 }
 0x410   : > { %8308 = vmatpush3.bf16.msra.mxu1 %v9161_v2  ;;  %v9171_v2 = vld [vmem:[%s11882_s5 + $0x108] sm:$0xff]  }
 0x411   : > { %8317 = vmatprep.subr.bf16.mxu1 %v12117_v35 }
 0x413   : > { %8310 = vmatmul.mubr.bf16.vlgmr.msra.gmra.mrb[0].mxu1 %v11107_v23 }
 0x414   : > { %8313 = vmatprep.mubr.bf16.mxu1 %v11113_v30  ;;  %8318 = vmatpush3.bf16.msra.mxu1 %v9162_v8 }
 0x415   : > { %8319 = vmatprep.subr.bf16.mxu1 %v12117_v35 }
 0x418   : > { %8320 = vmatpush3.bf16.msra.mxu1 %v9163_v15  ;;  %v9172_v15 = vld [vmem:[%s11882_s5 + $0x110] sm:$0xff]  }
 0x419   : > { %8321 = vmatprep.subr.bf16.mxu1 %v12117_v35 }
 0x41b   : > { %8314 = vmatmul.mubr.bf16.gmra.mrb[4].mxu1 %v4492_v16 }
 0x41c   : > { %8322 = vmatpush3.bf16.msra.mxu1 %v9164_v56  ;;  %8333 = vmatprep.mubr.msk.bf16.mxu1 %vm9310_vm11, %v12117_v35 }
 0x41d   : > { %8323 = vmatprep.subr.bf16.mxu1 %v12117_v35 }
 0x420   : > { %8324 = vmatpush3.bf16.msra.mxu1 %v9165_v20  ;;  %v9173_v20 = vld [vmem:[%s11882_s5 + $0x118] sm:$0xff]  }
 0x421   : > { %8325 = vmatprep.subr.bf16.mxu1 %v12117_v35 }
 0x424   : > { %8326 = vmatpush3.bf16.msra.mxu1 %v9166_v43 }
 0x425   : > { %8327 = vmatprep.subr.bf16.mxu1 %v12117_v35 }
 0x428   : > { %8328 = vmatpush3.bf16.msra.mxu1 %v9167_v37  ;;  %v9174_v37 = vld [vmem:[%s11882_s5 + $0x120] sm:$0xff]  }
 0x429   : > { %8329 = vmatprep.subr.bf16.mxu1 %v12117_v35 }
 0x42c   : > { %8330 = vmatpush3.bf16.msra.mxu1 %v9168_v28 }
 0x42d   : > { %8331 = vmatprep.subr.bf16.mxu1 %v12117_v35 }
 0x430   : > { %8332 = vmatpush3.bf16.msra.mxu1 %v9169_v48  ;;  %v9177_v48 = vld [vmem:[%s11882_s5 + $0x138] sm:$0xff]  }
 0x431   : > { %8337 = vmatprep.subr.bf16.mxu1 %v12117_v35 }
 0x481   : > { %v8167_v33 = vpop.f32.mrb[32].mxu0 }
 0x482   : > { %v3739_v51 = vpop.f32.mrb[33].mxu0  ;;  %v8689_v5 = vadd.f32 %v8167_v33, %v6800_v31 }
 0x483   : > { %v8168_v46 = vpop.f32.mrb[34].mxu0  ;;  %v8691_v11 = vadd.f32 %v6800_v31, %v3739_v51  ;;  %v9175_v51 = vld [vmem:[%s11882_s5 + $0x128] sm:$0xff]  }
 0x484   : > { %v3742_v57 = vpop.f32.mrb[35].mxu0  ;;  %v8693_v30 = vadd.f32 %v8168_v46, %v6800_v31  ;;  %v9176_v46 = vld [vmem:[%s11882_s5 + $0x130] sm:$0xff]  }
 0x485   : > { %v8695_v62 = vadd.f32 %v6800_v31, %v3742_v57 }
 0x489   : > { %v8171_v49 = vpop.f32.mrb[36].mxu0 }
 0x48a   : > { %v8697_v45 = vadd.f32 %v8171_v49, %v6800_v31  ;;  %v3755_v60 = vpop.f32.mrb[37].mxu0  ;;  %v9178_v49 = vld [vmem:[%s11882_s5 + $0x200] sm:$0xff]  }
 0x48b   : > { %v8699_v34 = vadd.f32 %v6800_v31, %v3755_v60  ;;  %v8172_v53 = vpop.f32.mrb[38].mxu0  ;;  %v9179_v60 = vld [vmem:[%s11882_s5 + $0x208] sm:$0xff]  }
 0x48c   : > { %v8701_v6 = vadd.f32 %v8172_v53, %v6800_v31  ;;  %v3758_v19 = vpop.f32.mrb[39].mxu0  ;;  %v9180_v53 = vld [vmem:[%s11882_s5 + $0x210] sm:$0xff]  }
 0x48d   : > { %v8703_v23 = vadd.f32 %v6800_v31, %v3758_v19  ;;  %v9181_v19 = vld [vmem:[%s11882_s5 + $0x218] sm:$0xff]  }
 0x4e6   : > { %v8311_v42 = vpop.f32.mrb[0].mxu1 }
 0x4e7   : > { %v8690_v25 = vadd.f32 %v8689_v5, %v8311_v42  ;;  %v4592_v29 = vpop.f32.mrb[1].mxu1  ;;  %v9182_v5 = vld [vmem:[%s11882_s5 + $0x220] sm:$0xff]   ;;  %v9183_v42 = vld [vmem:[%s11882_s5 + $0x228] sm:$0xff]  }
 0x4e8   : > { %v8692_v54 = vadd.f32 %v8691_v11, %v4592_v29  ;;  %v8312_v16 = vpop.f32.mrb[2].mxu1 }
 0x4e9   : > { %v8694_v61 = vadd.f32 %v8693_v30, %v8312_v16  ;;  %v4595_v17 = vpop.f32.mrb[3].mxu1  ;;  %v4633_v13 = vmax.f32 %v8690_v25, 0.0  ;;  %v9184_v25 = vld [vmem:[%s11882_s5 + $0x230] sm:$0xff]   ;;  %v9186_v16 = vld [vmem:[%s11882_s5 + $0x300] sm:$0xff]  }
 0x4ea   : > { %v8696_v41 = vadd.f32 %v8695_v62, %v4595_v17  ;;  %v4631_v21 = vmax.f32 %v8692_v54, 0.0  ;;  %v9185_v62 = vld [vmem:[%s11882_s5 + $0x238] sm:$0xff]   ;;  %v9187_v17 = vld [vmem:[%s11882_s5 + $0x308] sm:$0xff]  }
 0x4eb   : > { %v4634_v40 = vmax.f32 %v8694_v61, 0.0 }
 0x4ec   : > { %v4632_v3 = vmax.f32 %v8696_v41, 0.0 }
 0x4ed   : > { %v11284_v9 = vmax.f32 %v4633_v13, %v4634_v40  ;;  %v9188_v13 = vld [vmem:[%s11882_s5 + $0x310] sm:$0xff]  }
 0x4ee   : > { %v11286_v39 = vmax.f32 %v4631_v21, %v4632_v3  ;;  %v8315_v27 = vpop.f32.mrb[4].mxu1  ;;  %v9189_v21 = vld [vmem:[%s11882_s5 + $0x318] sm:$0xff]  }
 0x4ef   : > { %v4608_v52 = vpop.f32.mrb[5].mxu1  ;;  %v8698_v38 = vadd.f32 %v8697_v45, %v8315_v27  ;;  %v4657_v8 = vsel %vm460_vm1, %v11284_v9, -inf  ;;  %v9190_v27 = vld [vmem:[%s11882_s5 + $0x320] sm:$0xff]  }
 0x4f0   : > { %v8316_v1 = vpop.f32.mrb[6].mxu1  ;;  %v4650_v4 = vsel %vm460_vm1, %v11286_v39, -inf  ;;  %v8700_v32 = vadd.f32 %v8699_v34, %v4608_v52  ;;  %v4658_v56 = vrot.slane %v4657_v8, 4 }
 0x4f1   : > { %v4611_v50 = vpop.f32.mrb[7].mxu1  ;;  %v4651_v10 = vrot.slane %v4650_v4, 4  ;;  %v8702_v36 = vadd.f32 %v8701_v6, %v8316_v1  ;;  %v4637_v59 = vmax.f32 %v8698_v38, 0.0  ;;  %v9191_v1 = vld [vmem:[%s11882_s5 + $0x328] sm:$0xff]   ;;  %v9193_v38 = vld [vmem:[%s11882_s5 + $0x338] sm:$0xff]  }
 0x4f2   : > { %v8704_v7 = vadd.f32 %v8703_v23, %v4611_v50  ;;  %v4635_v18 = vmax.f32 %v8700_v32, 0.0  ;;  %v4659_v43 = vmax.f32 %v4657_v8, %v4658_v56  ;;  %v9192_v50 = vld [vmem:[%s11882_s5 + $0x330] sm:$0xff]   ;;  %v9201_v8 = vld [vmem:[%s11882_s5 + $0x78] sm:$0xff]   ;;  %v9202_v56 = vld [vmem:[%s11882_s5 + $0x140] sm:$0xff]  }
 0x4f3   : > { %v4652_v0 = vmax.f32 %v4650_v4, %v4651_v10  ;;  %v4638_v14 = vmax.f32 %v8702_v36, 0.0  ;;  %v9194_v36 = vld [vmem:[%s11882_s5 + $0x40] sm:$0xff]  }
 0x4f4   : > { %v4636_v47 = vmax.f32 %v8704_v7, 0.0  ;;  %v4660_v33 = vrot.slane %v4659_v43, 2 }
 0x4f5   : > { %v4653_v24 = vrot.slane %v4652_v0, 2  ;;  %v11290_v55 = vmax.f32 %v4637_v59, %v4638_v14  ;;  %v5105_v59 = vsel %vm2807_vm5, %v11286_v39, -inf }
 0x4f6   : > { %v11292_v22 = vmax.f32 %v4635_v18, %v4636_v47  ;;  %v4661_v28 = vmax.f32 %v4659_v43, %v4660_v33  ;;  %v9196_v18 = vld [vmem:[%s11882_s5 + $0x50] sm:$0xff]   ;;  %v5106_v14 = vrot.slane %v5105_v59, 4  ;;  %v9197_v47 = vld [vmem:[%s11882_s5 + $0x58] sm:$0xff]   ;;  %v9203_v43 = vld [vmem:[%s11882_s5 + $0x148] sm:$0xff]  }
 0x4f7   : > { %v4654_v58 = vmax.f32 %v4652_v0, %v4653_v24  ;;  %v4671_v41 = vsel %vm460_vm1, %v11290_v55, -inf  ;;  %v9195_v0 = vld [vmem:[%s11882_s5 + $0x48] sm:$0xff]   ;;  %v9204_v33 = vld [vmem:[%s11882_s5 + $0x150] sm:$0xff]  }
 0x4f8   : > { %v4662_v57 = vrot.slane %v4661_v28, 1  ;;  %v4664_v34 = vsel %vm460_vm1, %v11292_v22, -inf  ;;  %v4672_v40 = vrot.slane %v4671_v41, 4  ;;  %v5107_v24 = vmax.f32 %v5105_v59, %v5106_v14  ;;  %v9225_v59 = vld [vmem:[%s11882_s5 + $0x378] sm:$0xff]   ;;  %v9226_v14 = vld [vmem:[%s11882_s5 + $0x80] sm:$0xff]  }
 0x4f9   : > { %v4655_v63 = vrot.slane %v4654_v58, 1  ;;  %v4665_v6 = vrot.slane %v4664_v34, 4 }
 0x4fa   : > { %v4663_v31 = vmax.f32 %v4661_v28, %v4662_v57  ;;  %v4673_v3 = vmax.f32 %v4671_v41, %v4672_v40  ;;  %v9205_v28 = vld [vmem:[%s11882_s5 + $0x158] sm:$0xff]   ;;  %v9206_v57 = vld [vmem:[%s11882_s5 + $0x160] sm:$0xff]  }
 0x4fb   : > { %v4656_v44 = vmax.f32 %v4654_v58, %v4655_v63  ;;  %v4666_v23 = vmax.f32 %v4664_v34, %v4665_v6  ;;  %v9198_v58 = vld [vmem:[%s11882_s5 + $0x60] sm:$0xff]   ;;  %v5108_v63 = vrot.slane %v5107_v24, 2  ;;  %v9209_v34 = vld [vmem:[%s11882_s5 + $0x178] sm:$0xff]  }
 0x4fc   : > { %v4784_v45 = vpack.c.bf16 %v4663_v31, %v4663_v31  ;;  %v4674_v52 = vrot.slane %v4673_v3, 2  ;;  %v9207_v31 = vld [vmem:[%s11882_s5 + $0x168] sm:$0xff]   ;;  %v9210_v6 = vld [vmem:[%s11882_s5 + $0x240] sm:$0xff]   ;;  %v9217_v41 = vld [vmem:[%s11882_s5 + $0x278] sm:$0xff]  }
 0x4fd   : > { %v4678_v12 = vpack.c.bf16 %v4656_v44, %v4656_v44  ;;  %v4667_v11 = vrot.slane %v4666_v23, 2  ;;  %v9199_v44 = vld [vmem:[%s11882_s5 + $0x68] sm:$0xff]   ;;  %v9218_v40 = vld [vmem:[%s11882_s5 + $0x340] sm:$0xff]  }
 0x4fe   : > { %v4675_v4 = vmax.f32 %v4673_v3, %v4674_v52  ;;  %v9219_v3 = vld [vmem:[%s11882_s5 + $0x348] sm:$0xff]   ;;  %v9220_v52 = vld [vmem:[%s11882_s5 + $0x350] sm:$0xff]  }
 0x4ff   : > { %8334 = vmatmul.mubr.bf16.vlgmr.msra.gmra.mrb[8].mxu1 %v4678_v12  ;;  %v4668_v30 = vmax.f32 %v4666_v23, %v4667_v11  ;;  %v9200_v12 = vld [vmem:[%s11882_s5 + $0x70] sm:$0xff]   ;;  %v9211_v23 = vld [vmem:[%s11882_s5 + $0x248] sm:$0xff]  }
 0x500   : > { %8338 = vmatpush3.bf16.msra.mxu1 %v9170_v26  ;;  %8353 = vmatprep.mubr.msk.bf16.mxu1 %vm9310_vm11, %v12117_v35  ;;  %v4676_v10 = vrot.slane %v4675_v4, 1  ;;  %v5109_v26 = vmax.f32 %v5107_v24, %v5108_v63  ;;  %v9212_v11 = vld [vmem:[%s11882_s5 + $0x250] sm:$0xff]   ;;  %v9227_v24 = vld [vmem:[%s11882_s5 + $0x88] sm:$0xff]  }
 0x501   : > { %8339 = vmatprep.subr.bf16.mxu1 %v12117_v35  ;;  %v4669_v29 = vrot.slane %v4668_v30, 1  ;;  %v9228_v63 = vld [vmem:[%s11882_s5 + $0x90] sm:$0xff]  }
 0x502   : > { %v4677_v32 = vmax.f32 %v4675_v4, %v4676_v10  ;;  %v9221_v4 = vld [vmem:[%s11882_s5 + $0x358] sm:$0xff]   ;;  %v9222_v10 = vld [vmem:[%s11882_s5 + $0x360] sm:$0xff]  }
 0x503   : > { %v4670_v54 = vmax.f32 %v4668_v30, %v4669_v29  ;;  %v9213_v30 = vld [vmem:[%s11882_s5 + $0x258] sm:$0xff]   ;;  %v9214_v29 = vld [vmem:[%s11882_s5 + $0x260] sm:$0xff]  }
 0x504   : > { %8340 = vmatpush3.bf16.msra.mxu1 %v9171_v2  ;;  %v4998_v7 = vpack.c.bf16 %v4677_v32, %v4677_v32  ;;  %v5110_v2 = vrot.slane %v5109_v26, 1  ;;  %v9223_v32 = vld [vmem:[%s11882_s5 + $0x368] sm:$0xff]  }
 0x505   : > { %8341 = vmatprep.subr.bf16.mxu1 %v12117_v35  ;;  %v4891_v61 = vpack.c.bf16 %v4670_v54, %v4670_v54  ;;  %v9215_v54 = vld [vmem:[%s11882_s5 + $0x268] sm:$0xff]  }
 0x508   : > { %8342 = vmatpush3.bf16.msra.mxu1 %v9172_v15  ;;  %v5111_v15 = vmax.f32 %v5109_v26, %v5110_v2  ;;  %v9229_v26 = vld [vmem:[%s11882_s5 + $0x98] sm:$0xff]   ;;  %v9230_v2 = vld [vmem:[%s11882_s5 + $0xa0] sm:$0xff]  }
 0x509   : > { %8343 = vmatprep.subr.bf16.mxu1 %v12117_v35 }
 0x50c   : > { %8344 = vmatpush3.bf16.msra.mxu1 %v9173_v20  ;;  %v5133_v20 = vpack.c.bf16 %v5111_v15, %v5111_v15  ;;  %v9231_v15 = vld [vmem:[%s11882_s5 + $0xa8] sm:$0xff]  }
 0x50d   : > { %8345 = vmatprep.subr.bf16.mxu1 %v12117_v35 }
 0x510   : > { %8346 = vmatpush3.bf16.msra.mxu1 %v9174_v37  ;;  %v5112_v37 = vsel %vm2807_vm5, %v11284_v9, -inf }
 0x511   : > { %8347 = vmatprep.subr.bf16.mxu1 %v12117_v35 }
 0x514   : > { %8348 = vmatpush3.bf16.msra.mxu1 %v9175_v51  ;;  %v5113_v51 = vrot.slane %v5112_v37, 4 }
 0x515   : > { %8349 = vmatprep.subr.bf16.mxu1 %v12117_v35 }
 0x518   : > { %8350 = vmatpush3.bf16.msra.mxu1 %v9176_v46  ;;  %v5114_v46 = vmax.f32 %v5112_v37, %v5113_v51  ;;  %v9233_v37 = vld [vmem:[%s11882_s5 + $0xb8] sm:$0xff]   ;;  %v9234_v51 = vld [vmem:[%s11882_s5 + $0x180] sm:$0xff]  }
 0x519   : > { %8351 = vmatprep.subr.bf16.mxu1 %v12117_v35 }
 0x51c   : > { %8352 = vmatpush3.bf16.msra.mxu1 %v9177_v48  ;;  %v5115_v48 = vrot.slane %v5114_v46, 2 }
 0x51d   : > { %8357 = vmatprep.subr.bf16.mxu1 %v12117_v35 }
 0x51f   : > { %8354 = vmatmul.mubr.bf16.vlgmr.msra.gmra.mrb[8].mxu1 %v4784_v45  ;;  %v9208_v45 = vld [vmem:[%s11882_s5 + $0x170] sm:$0xff]  }
 0x520   : > { %8358 = vmatpush3.bf16.msra.mxu1 %v9178_v49  ;;  %8373 = vmatprep.mubr.msk.bf16.mxu1 %vm9310_vm11, %v12117_v35  ;;  %v5116_v49 = vmax.f32 %v5114_v46, %v5115_v48  ;;  %v9235_v46 = vld [vmem:[%s11882_s5 + $0x188] sm:$0xff]   ;;  %v9236_v48 = vld [vmem:[%s11882_s5 + $0x190] sm:$0xff]  }
 0x521   : > { %8359 = vmatprep.subr.bf16.mxu1 %v12117_v35 }
 0x524   : > { %8360 = vmatpush3.bf16.msra.mxu1 %v9179_v60  ;;  %v5117_v60 = vrot.slane %v5116_v49, 1 }
 0x525   : > { %8361 = vmatprep.subr.bf16.mxu1 %v12117_v35 }
 0x528   : > { %8362 = vmatpush3.bf16.msra.mxu1 %v9180_v53  ;;  %v5118_v53 = vmax.f32 %v5116_v49, %v5117_v60  ;;  %v9237_v49 = vld [vmem:[%s11882_s5 + $0x198] sm:$0xff]   ;;  %v9238_v60 = vld [vmem:[%s11882_s5 + $0x1a0] sm:$0xff]  }
 0x529   : > { %8363 = vmatprep.subr.bf16.mxu1 %v12117_v35 }
 0x52c   : > { %8364 = vmatpush3.bf16.msra.mxu1 %v9181_v19  ;;  %v5240_v19 = vpack.c.bf16 %v5118_v53, %v5118_v53  ;;  %v9239_v53 = vld [vmem:[%s11882_s5 + $0x1a8] sm:$0xff]  }
 0x52d   : > { %8365 = vmatprep.subr.bf16.mxu1 %v12117_v35 }
 0x530   : > { %8366 = vmatpush3.bf16.msra.mxu1 %v9182_v5  ;;  %v5119_v5 = vsel %vm2807_vm5, %v11292_v22, -inf }
 0x531   : > { %8367 = vmatprep.subr.bf16.mxu1 %v12117_v35 }
 0x534   : > { %8368 = vmatpush3.bf16.msra.mxu1 %v9183_v42  ;;  %v5120_v42 = vrot.slane %v5119_v5, 4 }
 0x535   : > { %8369 = vmatprep.subr.bf16.mxu1 %v12117_v35 }
 0x538   : > { %8370 = vmatpush3.bf16.msra.mxu1 %v9184_v25  ;;  %v5121_v25 = vmax.f32 %v5119_v5, %v5120_v42  ;;  %v9241_v5 = vld [vmem:[%s11882_s5 + $0x1b8] sm:$0xff]   ;;  %v9242_v42 = vld [vmem:[%s11882_s5 + $0x280] sm:$0xff]  }
 0x539   : > { %8371 = vmatprep.subr.bf16.mxu1 %v12117_v35 }
 0x53c   : > { %8372 = vmatpush3.bf16.msra.mxu1 %v9185_v62  ;;  %v5122_v62 = vrot.slane %v5121_v25, 2 }
 0x53d   : > { %8377 = vmatprep.subr.bf16.mxu1 %v12117_v35 }
 0x53f   : > { %8374 = vmatmul.mubr.bf16.vlgmr.msra.gmra.mrb[8].mxu1 %v4891_v61  ;;  %v9216_v61 = vld [vmem:[%s11882_s5 + $0x270] sm:$0xff]  }
 0x540   : > { %8378 = vmatpush3.bf16.msra.mxu1 %v9186_v16  ;;  %8393 = vmatprep.mubr.msk.bf16.mxu1 %vm9310_vm11, %v12117_v35  ;;  %v5123_v16 = vmax.f32 %v5121_v25, %v5122_v62  ;;  %v9243_v25 = vld [vmem:[%s11882_s5 + $0x288] sm:$0xff]   ;;  %v9244_v62 = vld [vmem:[%s11882_s5 + $0x290] sm:$0xff]  }
 0x541   : > { %8379 = vmatprep.subr.bf16.mxu1 %v12117_v35 }
 0x544   : > { %8380 = vmatpush3.bf16.msra.mxu1 %v9187_v17  ;;  %v5124_v17 = vrot.slane %v5123_v16, 1 }
 0x545   : > { %8381 = vmatprep.subr.bf16.mxu1 %v12117_v35 }
 0x548   : > { %8382 = vmatpush3.bf16.msra.mxu1 %v9188_v13  ;;  %v5125_v13 = vmax.f32 %v5123_v16, %v5124_v17  ;;  %v9245_v16 = vld [vmem:[%s11882_s5 + $0x298] sm:$0xff]   ;;  %v9246_v17 = vld [vmem:[%s11882_s5 + $0x2a0] sm:$0xff]  }
 0x549   : > { %8383 = vmatprep.subr.bf16.mxu1 %v12117_v35 }
 0x54c   : > { %8384 = vmatpush3.bf16.msra.mxu1 %v9189_v21  ;;  %v5347_v21 = vpack.c.bf16 %v5125_v13, %v5125_v13  ;;  %v9247_v13 = vld [vmem:[%s11882_s5 + $0x2a8] sm:$0xff]  }
 0x54d   : > { %8385 = vmatprep.subr.bf16.mxu1 %v12117_v35 }
 0x550   : > { %8386 = vmatpush3.bf16.msra.mxu1 %v9190_v27  ;;  %v5126_v27 = vsel %vm2807_vm5, %v11290_v55, -inf }
 0x551   : > { %8387 = vmatprep.subr.bf16.mxu1 %v12117_v35 }
 0x554   : > { %8388 = vmatpush3.bf16.msra.mxu1 %v9191_v1  ;;  %v5127_v1 = vrot.slane %v5126_v27, 4 }
 0x555   : > { %8389 = vmatprep.subr.bf16.mxu1 %v12117_v35 }
 0x558   : > { %8390 = vmatpush3.bf16.msra.mxu1 %v9192_v50  ;;  %v5128_v50 = vmax.f32 %v5126_v27, %v5127_v1  ;;  %v9249_v27 = vld [vmem:[%s11882_s5 + $0x2b8] sm:$0xff]   ;;  %v9250_v1 = vld [vmem:[%s11882_s5 + $0x380] sm:$0xff]  }
 0x559   : > { %8391 = vmatprep.subr.bf16.mxu1 %v12117_v35 }
 0x55c   : > { %8392 = vmatpush3.bf16.msra.mxu1 %v9193_v38  ;;  %v5129_v38 = vrot.slane %v5128_v50, 2 }
 0x55d   : > { %8397 = vmatprep.subr.bf16.mxu1 %v12117_v35 }
 0x55f   : > { %8394 = vmatmul.mubr.bf16.vlgmr.msra.gmra.mrb[8].mxu1 %v4998_v7  ;;  %v9224_v7 = vld [vmem:[%s11882_s5 + $0x370] sm:$0xff]  }
 0x560   : > { %8398 = vmatpush3.bf16.msra.mxu1 %v9194_v36  ;;  %8413 = vmatprep.mubr.msk.bf16.mxu1 %vm9310_vm11, %v12117_v35  ;;  %v5130_v36 = vmax.f32 %v5128_v50, %v5129_v38  ;;  %v9251_v50 = vld [vmem:[%s11882_s5 + $0x388] sm:$0xff]   ;;  %v9252_v38 = vld [vmem:[%s11882_s5 + $0x390] sm:$0xff]  }
 0x561   : > { %8399 = vmatprep.subr.bf16.mxu1 %v12117_v35 }
 0x564   : > { %8400 = vmatpush3.bf16.msra.mxu1 %v9195_v0  ;;  %v5131_v0 = vrot.slane %v5130_v36, 1 }
 0x565   : > { %8401 = vmatprep.subr.bf16.mxu1 %v12117_v35 }
 0x568   : > { %8402 = vmatpush3.bf16.msra.mxu1 %v9196_v18  ;;  %v5132_v18 = vmax.f32 %v5130_v36, %v5131_v0  ;;  %v9253_v36 = vld [vmem:[%s11882_s5 + $0x398] sm:$0xff]   ;;  %v9254_v0 = vld [vmem:[%s11882_s5 + $0x3a0] sm:$0xff]  }
 0x569   : > { %8403 = vmatprep.subr.bf16.mxu1 %v12117_v35 }
 0x56c   : > { %8404 = vmatpush3.bf16.msra.mxu1 %v9197_v47  ;;  %v5454_v47 = vpack.c.bf16 %v5132_v18, %v5132_v18  ;;  %v9255_v18 = vld [vmem:[%s11882_s5 + $0x3a8] sm:$0xff]  }
 0x56d   : > { %8405 = vmatprep.subr.bf16.mxu1 %v12117_v35 }
 0x570   : > { %8406 = vmatpush3.bf16.msra.mxu1 %v9198_v58  ;;  %v5561_v58 = vsel %vm2864_vm6, %v11286_v39, -inf }
 0x571   : > { %8407 = vmatprep.subr.bf16.mxu1 %v12117_v35 }
 0x574   : > { %8408 = vmatpush3.bf16.msra.mxu1 %v9199_v44  ;;  %v5562_v44 = vrot.slane %v5561_v58, 4 }
 0x575   : > { %8409 = vmatprep.subr.bf16.mxu1 %v12117_v35 }
 0x578   : > { %8410 = vmatpush3.bf16.msra.mxu1 %v9200_v12  ;;  %v5563_v12 = vmax.f32 %v5561_v58, %v5562_v44  ;;  %v9257_v58 = vld [vmem:[%s11882_s5 + $0x3b8] sm:$0xff]   ;;  %v9258_v44 = vld [vmem:[%s11882_s5 + $0xc0] sm:$0xff]  }
 0x579   : > { %8411 = vmatprep.subr.bf16.mxu1 %v12117_v35 }
 0x57c   : > { %8412 = vmatpush3.bf16.msra.mxu1 %v9201_v8  ;;  %v5564_v8 = vrot.slane %v5563_v12, 2 }
 0x57d   : > { %8417 = vmatprep.subr.bf16.mxu1 %v12117_v35 }
 0x57f   : > { %8414 = vmatmul.mubr.bf16.vlgmr.msra.gmra.mrb[8].mxu1 %v5133_v20  ;;  %v9232_v20 = vld [vmem:[%s11882_s5 + $0xb0] sm:$0xff]  }
 0x580   : > { %8418 = vmatpush3.bf16.msra.mxu1 %v9202_v56  ;;  %8433 = vmatprep.mubr.msk.bf16.mxu1 %vm9310_vm11, %v12117_v35  ;;  %v5565_v56 = vmax.f32 %v5563_v12, %v5564_v8  ;;  %v9290_v12 = vld [vmem:[%s11884_s7] sm:$0xff]   ;;  %v9291_v8 = vld [vmem:[%s11884_s7 + $0x8] sm:$0xff]  }
 0x581   : > { %8419 = vmatprep.subr.bf16.mxu1 %v12117_v35  ;;  %8638 = vmatpush3.bf16.msra.mxu0 %v9290_v12 }
 0x582   : > { %8639 = vmatprep.subr.bf16.mxu0 %v12117_v35 }
 0x584   : > { %8420 = vmatpush3.bf16.msra.mxu1 %v9203_v43  ;;  %v5566_v43 = vrot.slane %v5565_v56, 1 }
 0x585   : > { %8421 = vmatprep.subr.bf16.mxu1 %v12117_v35  ;;  %8640 = vmatpush3.bf16.msra.mxu0 %v9291_v8 }
 0x586   : > { %8641 = vmatprep.subr.bf16.mxu0 %v12117_v35 }
 0x588   : > { %8422 = vmatpush3.bf16.msra.mxu1 %v9204_v33  ;;  %v5567_v33 = vmax.f32 %v5565_v56, %v5566_v43  ;;  %v9260_v56 = vld [vmem:[%s11882_s5 + $0xd0] sm:$0xff]  }
 0x589   : > { %8423 = vmatprep.subr.bf16.mxu1 %v12117_v35  ;;  %v9292_v43 = vld [vmem:[%s11884_s7 + $0x10] sm:$0xff]  }
 0x58a   : > { %8642 = vmatpush3.bf16.msra.mxu0 %v9292_v43  ;;  %v9296_v43 = vld [vmem:[%s11884_s7 + $0x30] sm:$0xff]  }
 0x58b   : > { %8643 = vmatprep.subr.bf16.mxu0 %v12117_v35 }
 0x58c   : > { %8424 = vmatpush3.bf16.msra.mxu1 %v9205_v28  ;;  %v5589_v28 = vpack.c.bf16 %v5567_v33, %v5567_v33  ;;  %v9293_v33 = vld [vmem:[%s11884_s7 + $0x18] sm:$0xff]  }
 0x58d   : > { %8425 = vmatprep.subr.bf16.mxu1 %v12117_v35 }
 0x58e   : > { %8644 = vmatpush3.bf16.msra.mxu0 %v9293_v33 }
 0x58f   : > { %8645 = vmatprep.subr.bf16.mxu0 %v12117_v35 }
 0x590   : > { %8426 = vmatpush3.bf16.msra.mxu1 %v9206_v57  ;;  %v5568_v57 = vsel %vm2864_vm6, %v11284_v9, -inf }
 0x591   : > { %8427 = vmatprep.subr.bf16.mxu1 %v12117_v35 }
 0x594   : > { %8428 = vmatpush3.bf16.msra.mxu1 %v9207_v31  ;;  %v5569_v31 = vrot.slane %v5568_v57, 4 }
 0x595   : > { %8429 = vmatprep.subr.bf16.mxu1 %v12117_v35 }
 0x598   : > { %8430 = vmatpush3.bf16.msra.mxu1 %v9208_v45  ;;  %v5570_v45 = vmax.f32 %v5568_v57, %v5569_v31  ;;  %v9263_v57 = vld [vmem:[%s11882_s5 + $0xe8] sm:$0xff]  }
 0x599   : > { %8431 = vmatprep.subr.bf16.mxu1 %v12117_v35  ;;  %v9295_v31 = vld [vmem:[%s11884_s7 + $0x28] sm:$0xff]  }
 0x59c   : > { %8432 = vmatpush3.bf16.msra.mxu1 %v9209_v34  ;;  %v5571_v34 = vrot.slane %v5570_v45, 2 }
 0x59d   : > { %8437 = vmatprep.subr.bf16.mxu1 %v12117_v35 }
 0x59f   : > { %8434 = vmatmul.mubr.bf16.vlgmr.msra.gmra.mrb[8].mxu1 %v5240_v19  ;;  %v9240_v19 = vld [vmem:[%s11882_s5 + $0x1b0] sm:$0xff]  }
 0x5a0   : > { %8438 = vmatpush3.bf16.msra.mxu1 %v9210_v6  ;;  %8453 = vmatprep.mubr.msk.bf16.mxu1 %vm9310_vm11, %v12117_v35  ;;  %v5572_v6 = vmax.f32 %v5570_v45, %v5571_v34 }
 0x5a1   : > { %8439 = vmatprep.subr.bf16.mxu1 %v12117_v35 }
 0x5a4   : > { %8440 = vmatpush3.bf16.msra.mxu1 %v9211_v23  ;;  %v5573_v23 = vrot.slane %v5572_v6, 1 }
 0x5a5   : > { %8441 = vmatprep.subr.bf16.mxu1 %v12117_v35 }
 0x5a8   : > { %8442 = vmatpush3.bf16.msra.mxu1 %v9212_v11  ;;  %v5574_v11 = vmax.f32 %v5572_v6, %v5573_v23  ;;  %v6024_v23 = vsel %vm2921_vm7, %v11284_v9, -inf  ;;  %v9270_v9 = vld [vmem:[%s11882_s5 + $0x1e0] sm:$0xff]  }
 0x5a9   : > { %8443 = vmatprep.subr.bf16.mxu1 %v12117_v35 }
 0x5ac   : > { %8444 = vmatpush3.bf16.msra.mxu1 %v9213_v30  ;;  %v5696_v30 = vpack.c.bf16 %v5574_v11, %v5574_v11  ;;  %v6025_v11 = vrot.slane %v6024_v23, 4 }
 0x5ad   : > { %8445 = vmatprep.subr.bf16.mxu1 %v12117_v35 }
 0x5b0   : > { %8446 = vmatpush3.bf16.msra.mxu1 %v9214_v29  ;;  %v5575_v29 = vsel %vm2864_vm6, %v11292_v22, -inf }
 0x5b1   : > { %8447 = vmatprep.subr.bf16.mxu1 %v12117_v35 }
 0x5b4   : > { %8448 = vmatpush3.bf16.msra.mxu1 %v9215_v54  ;;  %v5576_v54 = vrot.slane %v5575_v29, 4 }
 0x5b5   : > { %8449 = vmatprep.subr.bf16.mxu1 %v12117_v35 }
 0x5b8   : > { %8450 = vmatpush3.bf16.msra.mxu1 %v9216_v61  ;;  %v5577_v61 = vmax.f32 %v5575_v29, %v5576_v54  ;;  %v9271_v29 = vld [vmem:[%s11882_s5 + $0x1e8] sm:$0xff]   ;;  %v9272_v54 = vld [vmem:[%s11882_s5 + $0x1f0] sm:$0xff]  }
 0x5b9   : > { %8451 = vmatprep.subr.bf16.mxu1 %v12117_v35 }
 0x5bc   : > { %8452 = vmatpush3.bf16.msra.mxu1 %v9217_v41  ;;  %v5578_v41 = vrot.slane %v5577_v61, 2 }
 0x5bd   : > { %8457 = vmatprep.subr.bf16.mxu1 %v12117_v35 }
 0x5bf   : > { %8454 = vmatmul.mubr.bf16.vlgmr.msra.gmra.mrb[8].mxu1 %v5347_v21  ;;  %v9248_v21 = vld [vmem:[%s11882_s5 + $0x2b0] sm:$0xff]  }
 0x5c0   : > { %8458 = vmatpush3.bf16.msra.mxu1 %v9218_v40  ;;  %8473 = vmatprep.mubr.msk.bf16.mxu1 %vm9310_vm11, %v12117_v35  ;;  %v5579_v40 = vmax.f32 %v5577_v61, %v5578_v41  ;;  %v9273_v61 = vld [vmem:[%s11882_s5 + $0x1f8] sm:$0xff]   ;;  %v9274_v41 = vld [vmem:[%s11882_s5 + $0x2c0] sm:$0xff]  }
 0x5c1   : > { %8459 = vmatprep.subr.bf16.mxu1 %v12117_v35 }
 0x5c4   : > { %8460 = vmatpush3.bf16.msra.mxu1 %v9219_v3  ;;  %v5580_v3 = vrot.slane %v5579_v40, 1 }
 0x5c5   : > { %8461 = vmatprep.subr.bf16.mxu1 %v12117_v35 }
 0x5c8   : > { %8462 = vmatpush3.bf16.msra.mxu1 %v9220_v52  ;;  %v5581_v52 = vmax.f32 %v5579_v40, %v5580_v3  ;;  %v9275_v40 = vld [vmem:[%s11882_s5 + $0x2c8] sm:$0xff]   ;;  %v9276_v3 = vld [vmem:[%s11882_s5 + $0x2d0] sm:$0xff]  }
 0x5c9   : > { %8463 = vmatprep.subr.bf16.mxu1 %v12117_v35 }
 0x5cc   : > { %8464 = vmatpush3.bf16.msra.mxu1 %v9221_v4  ;;  %v5803_v4 = vpack.c.bf16 %v5581_v52, %v5581_v52  ;;  %v9277_v52 = vld [vmem:[%s11882_s5 + $0x2d8] sm:$0xff]  }
 0x5cd   : > { %8465 = vmatprep.subr.bf16.mxu1 %v12117_v35 }
 0x5d0   : > { %8466 = vmatpush3.bf16.msra.mxu1 %v9222_v10  ;;  %v5582_v10 = vsel %vm2864_vm6, %v11290_v55, -inf }
 0x5d1   : > { %8467 = vmatprep.subr.bf16.mxu1 %v12117_v35 }
 0x5d4   : > { %8468 = vmatpush3.bf16.msra.mxu1 %v9223_v32  ;;  %v5583_v32 = vrot.slane %v5582_v10, 4 }
 0x5d5   : > { %8469 = vmatprep.subr.bf16.mxu1 %v12117_v35 }
 0x5d8   : > { %8470 = vmatpush3.bf16.msra.mxu1 %v9224_v7  ;;  %v5584_v7 = vmax.f32 %v5582_v10, %v5583_v32 }
 0x5d9   : > { %8471 = vmatprep.subr.bf16.mxu1 %v12117_v35 }
 0x5dc   : > { %8472 = vmatpush3.bf16.msra.mxu1 %v9225_v59  ;;  %v5585_v59 = vrot.slane %v5584_v7, 2 }
 0x5dd   : > { %8477 = vmatprep.subr.bf16.mxu1 %v12117_v35 }
 0x5df   : > { %8474 = vmatmul.mubr.bf16.vlgmr.msra.gmra.mrb[8].mxu1 %v5454_v47  ;;  %v9256_v47 = vld [vmem:[%s11882_s5 + $0x3b0] sm:$0xff]  }
 0x5e0   : > { %8478 = vmatpush3.bf16.msra.mxu1 %v9226_v14  ;;  %8493 = vmatprep.mubr.msk.bf16.mxu1 %vm9310_vm11, %v12117_v35  ;;  %v5586_v14 = vmax.f32 %v5584_v7, %v5585_v59 }
 0x5e1   : > { %8479 = vmatprep.subr.bf16.mxu1 %v12117_v35 }
 0x5e4   : > { %8480 = vmatpush3.bf16.msra.mxu1 %v9227_v24  ;;  %v5587_v24 = vrot.slane %v5586_v14, 1 }
 0x5e5   : > { %8481 = vmatprep.subr.bf16.mxu1 %v12117_v35 }
 0x5e8   : > { %8482 = vmatpush3.bf16.msra.mxu1 %v9228_v63  ;;  %v5588_v63 = vmax.f32 %v5586_v14, %v5587_v24  ;;  %v6038_v14 = vsel %vm2921_vm7, %v11290_v55, -inf  ;;  %v9286_v55 = vld [vmem:[%s11882_s5 + $0x3e0] sm:$0xff]  }
 0x5e9   : > { %8483 = vmatprep.subr.bf16.mxu1 %v12117_v35  ;;  %v6039_v24 = vrot.slane %v6038_v14, 4 }
 0x5ec   : > { %8484 = vmatpush3.bf16.msra.mxu1 %v9229_v26  ;;  %v5910_v26 = vpack.c.bf16 %v5588_v63, %v5588_v63  ;;  %v6040_v63 = vmax.f32 %v6038_v14, %v6039_v24 }
 0x5ed   : > { %8485 = vmatprep.subr.bf16.mxu1 %v12117_v35 }
 0x5f0   : > { %8486 = vmatpush3.bf16.msra.mxu1 %v9230_v2  ;;  %v9259_v2 = vld [vmem:[%s11882_s5 + $0xc8] sm:$0xff]  }
 0x5f1   : > { %8487 = vmatprep.subr.bf16.mxu1 %v12117_v35 }
 0x5f4   : > { %8488 = vmatpush3.bf16.msra.mxu1 %v9231_v15  ;;  %v6017_v15 = vsel %vm2921_vm7, %v11286_v39, -inf  ;;  %v9261_v39 = vld [vmem:[%s11882_s5 + $0xd8] sm:$0xff]  }
 0x5f5   : > { %8489 = vmatprep.subr.bf16.mxu1 %v12117_v35 }
 0x5f8   : > { %8490 = vmatpush3.bf16.msra.mxu1 %v9232_v20  ;;  %v6018_v20 = vrot.slane %v6017_v15, 4 }
 0x5f9   : > { %8491 = vmatprep.subr.bf16.mxu1 %v12117_v35 }
 0x5fc   : > { %8492 = vmatpush3.bf16.msra.mxu1 %v9233_v37  ;;  %v6019_v37 = vmax.f32 %v6017_v15, %v6018_v20  ;;  %v9289_v15 = vld [vmem:[%s11882_s5 + $0x3f8] sm:$0xff]  }
 0x5fd   : > { %8497 = vmatprep.subr.bf16.mxu1 %v12117_v35 }
 0x5ff   : > { %8494 = vmatmul.mubr.bf16.vlgmr.msra.gmra.mrb[8].mxu1 %v5589_v28  ;;  %v6020_v28 = vrot.slane %v6019_v37, 2 }
 0x600   : > { %8498 = vmatpush3.bf16.msra.mxu1 %v9234_v51  ;;  %8513 = vmatprep.mubr.msk.bf16.mxu1 %vm9310_vm11, %v12117_v35  ;;  %v9262_v51 = vld [vmem:[%s11882_s5 + $0xe0] sm:$0xff]  }
 0x601   : > { %8499 = vmatprep.subr.bf16.mxu1 %v12117_v35 }
 0x604   : > { %8500 = vmatpush3.bf16.msra.mxu1 %v9235_v46  ;;  %v9294_v46 = vld [vmem:[%s11884_s7 + $0x20] sm:$0xff]  }
 0x605   : > { %8501 = vmatprep.subr.bf16.mxu1 %v12117_v35  ;;  %8646 = vmatpush3.bf16.msra.mxu0 %v9294_v46 }
 0x606   : > { %8647 = vmatprep.subr.bf16.mxu0 %v12117_v35 }
 0x608   : > { %8502 = vmatpush3.bf16.msra.mxu1 %v9236_v48  ;;  %v6021_v48 = vmax.f32 %v6019_v37, %v6020_v28  ;;  %v7001_v37 = vld [vmem:[%s11883_s6] ss:$0 sm:$0xff] }
 0x609   : > { %8503 = vmatprep.subr.bf16.mxu1 %v12117_v35  ;;  %8648 = vmatpush3.bf16.msra.mxu0 %v9295_v31 }
 0x60a   : > { %v6022_v45 = vrot.slane %v6021_v48, 1  ;;  %8649 = vmatprep.subr.bf16.mxu0 %v12117_v35 }
 0x60c   : > { %8504 = vmatpush3.bf16.msra.mxu1 %v9237_v49  ;;  %v9264_v49 = vld [vmem:[%s11882_s5 + $0xf0] sm:$0xff]   ;;  %v6023_v34 = vmax.f32 %v6021_v48, %v6022_v45 }
 0x60d   : > { %8505 = vmatprep.subr.bf16.mxu1 %v12117_v35  ;;  %8650 = vmatpush3.bf16.msra.mxu0 %v9296_v43 }
 0x60e   : > { %v6045_v6 = vpack.c.bf16 %v6023_v34, %v6023_v34  ;;  %8651 = vmatprep.subr.bf16.mxu0 %v12117_v35 }
 0x610   : > { %8506 = vmatpush3.bf16.msra.mxu1 %v9238_v60  ;;  %v9265_v60 = vld [vmem:[%s11882_s5 + $0xf8] sm:$0xff]  }
 0x611   : > { %8507 = vmatprep.subr.bf16.mxu1 %v12117_v35 }
 0x614   : > { %8508 = vmatpush3.bf16.msra.mxu1 %v9239_v53  ;;  %v9266_v53 = vld [vmem:[%s11882_s5 + $0x1c0] sm:$0xff]  }
 0x615   : > { %8509 = vmatprep.subr.bf16.mxu1 %v12117_v35 }
 0x618   : > { %8510 = vmatpush3.bf16.msra.mxu1 %v9240_v19  ;;  %v9267_v19 = vld [vmem:[%s11882_s5 + $0x1c8] sm:$0xff]  }
 0x619   : > { %8511 = vmatprep.subr.bf16.mxu1 %v12117_v35 }
 0x61c   : > { %8512 = vmatpush3.bf16.msra.mxu1 %v9241_v5  ;;  %v9268_v5 = vld [vmem:[%s11882_s5 + $0x1d0] sm:$0xff]  }
 0x61d   : > { %8517 = vmatprep.subr.bf16.mxu1 %v12117_v35 }
 0x61f   : > { %8514 = vmatmul.mubr.bf16.vlgmr.msra.gmra.mrb[8].mxu1 %v5696_v30  ;;  %v6026_v30 = vmax.f32 %v6024_v23, %v6025_v11 }
 0x620   : > { %8518 = vmatpush3.bf16.msra.mxu1 %v9242_v42  ;;  %8533 = vmatprep.mubr.msk.bf16.mxu1 %vm9310_vm11, %v12117_v35  ;;  %v9269_v42 = vld [vmem:[%s11882_s5 + $0x1d8] sm:$0xff]  }
 0x621   : > { %8519 = vmatprep.subr.bf16.mxu1 %v12117_v35 }
 0x624   : > { %8520 = vmatpush3.bf16.msra.mxu1 %v9243_v25  ;;  %v6027_v25 = vrot.slane %v6026_v30, 2 }
 0x625   : > { %8521 = vmatprep.subr.bf16.mxu1 %v12117_v35 }
 0x628   : > { %8522 = vmatpush3.bf16.msra.mxu1 %v9244_v62  ;;  %v6028_v62 = vmax.f32 %v6026_v30, %v6027_v25 }
 0x629   : > { %8523 = vmatprep.subr.bf16.mxu1 %v12117_v35 }
 0x62c   : > { %8524 = vmatpush3.bf16.msra.mxu1 %v9245_v16  ;;  %v6029_v16 = vrot.slane %v6028_v62, 1 }
 0x62d   : > { %8525 = vmatprep.subr.bf16.mxu1 %v12117_v35 }
 0x630   : > { %8526 = vmatpush3.bf16.msra.mxu1 %v9246_v17  ;;  %v6030_v17 = vmax.f32 %v6028_v62, %v6029_v16 }
 0x631   : > { %8527 = vmatprep.subr.bf16.mxu1 %v12117_v35 }
 0x634   : > { %8528 = vmatpush3.bf16.msra.mxu1 %v9247_v13  ;;  %v6152_v13 = vpack.c.bf16 %v6030_v17, %v6030_v17 }
 0x635   : > { %8529 = vmatprep.subr.bf16.mxu1 %v12117_v35 }
 0x638   : > { %8530 = vmatpush3.bf16.msra.mxu1 %v9248_v21  ;;  %v6031_v21 = vsel %vm2921_vm7, %v11292_v22, -inf  ;;  %v9278_v22 = vld [vmem:[%s11882_s5 + $0x2e0] sm:$0xff]  }
 0x639   : > { %8531 = vmatprep.subr.bf16.mxu1 %v12117_v35 }
 0x63c   : > { %8532 = vmatpush3.bf16.msra.mxu1 %v9249_v27  ;;  %v6032_v27 = vrot.slane %v6031_v21, 4 }
 0x63d   : > { %8537 = vmatprep.subr.bf16.mxu1 %v12117_v35 }
 0x63f   : > { %8534 = vmatmul.mubr.bf16.vlgmr.msra.gmra.mrb[8].mxu1 %v5803_v4 }
 0x640   : > { %8538 = vmatpush3.bf16.msra.mxu1 %v9250_v1  ;;  %8553 = vmatprep.mubr.msk.bf16.mxu1 %vm9310_vm11, %v12117_v35  ;;  %v6033_v1 = vmax.f32 %v6031_v21, %v6032_v27 }
 0x641   : > { %8539 = vmatprep.subr.bf16.mxu1 %v12117_v35 }
 0x642   : > { %v6034_v4 = vrot.slane %v6033_v1, 2 }
 0x644   : > { %8540 = vmatpush3.bf16.msra.mxu1 %v9251_v50  ;;  %v9279_v50 = vld [vmem:[%s11882_s5 + $0x2e8] sm:$0xff]   ;;  %v6035_v10 = vmax.f32 %v6033_v1, %v6034_v4 }
 0x645   : > { %8541 = vmatprep.subr.bf16.mxu1 %v12117_v35 }
 0x646   : > { %v6036_v32 = vrot.slane %v6035_v10, 1 }
 0x648   : > { %8542 = vmatpush3.bf16.msra.mxu1 %v9252_v38  ;;  %v9280_v38 = vld [vmem:[%s11882_s5 + $0x2f0] sm:$0xff]   ;;  %v6037_v7 = vmax.f32 %v6035_v10, %v6036_v32 }
 0x649   : > { %8543 = vmatprep.subr.bf16.mxu1 %v12117_v35 }
 0x64a   : > { %v6259_v59 = vpack.c.bf16 %v6037_v7, %v6037_v7 }
 0x64c   : > { %8544 = vmatpush3.bf16.msra.mxu1 %v9253_v36  ;;  %v9281_v36 = vld [vmem:[%s11882_s5 + $0x2f8] sm:$0xff]  }
 0x64d   : > { %8545 = vmatprep.subr.bf16.mxu1 %v12117_v35 }
 0x650   : > { %8546 = vmatpush3.bf16.msra.mxu1 %v9254_v0  ;;  %v9282_v0 = vld [vmem:[%s11882_s5 + $0x3c0] sm:$0xff]  }
 0x651   : > { %8547 = vmatprep.subr.bf16.mxu1 %v12117_v35 }
 0x654   : > { %8548 = vmatpush3.bf16.msra.mxu1 %v9255_v18  ;;  %v9283_v18 = vld [vmem:[%s11882_s5 + $0x3c8] sm:$0xff]  }
 0x655   : > { %8549 = vmatprep.subr.bf16.mxu1 %v12117_v35 }
 0x658   : > { %8550 = vmatpush3.bf16.msra.mxu1 %v9256_v47  ;;  %v9284_v47 = vld [vmem:[%s11882_s5 + $0x3d0] sm:$0xff]  }
 0x659   : > { %8551 = vmatprep.subr.bf16.mxu1 %v12117_v35 }
 0x65c   : > { %8552 = vmatpush3.bf16.msra.mxu1 %v9257_v58  ;;  %v9285_v58 = vld [vmem:[%s11882_s5 + $0x3d8] sm:$0xff]  }
 0x65d   : > { %8557 = vmatprep.subr.bf16.mxu1 %v12117_v35 }
 0x65f   : > { %8554 = vmatmul.mubr.bf16.vlgmr.msra.gmra.mrb[8].mxu1 %v5910_v26  ;;  %v9287_v26 = vld [vmem:[%s11882_s5 + $0x3e8] sm:$0xff]  }
 0x660   : > { %8558 = vmatpush3.bf16.msra.mxu1 %v9258_v44  ;;  %8573 = vmatprep.mubr.msk.bf16.mxu1 %vm9310_vm11, %v12117_v35  ;;  %v6041_v44 = vrot.slane %v6040_v63, 2 }
 0x661   : > { %8559 = vmatprep.subr.bf16.mxu1 %v12117_v35 }
 0x662   : > { %v6042_v12 = vmax.f32 %v6040_v63, %v6041_v44 }
 0x664   : > { %8560 = vmatpush3.bf16.msra.mxu1 %v9259_v2  ;;  %v9288_v2 = vld [vmem:[%s11882_s5 + $0x3f0] sm:$0xff]   ;;  %v6043_v8 = vrot.slane %v6042_v12, 1 }
 0x665   : > { %8561 = vmatprep.subr.bf16.mxu1 %v12117_v35 }
 0x668   : > { %8562 = vmatpush3.bf16.msra.mxu1 %v9260_v56  ;;  %v6044_v56 = vmax.f32 %v6042_v12, %v6043_v8 }
 0x669   : > { %8563 = vmatprep.subr.bf16.mxu1 %v12117_v35 }
 0x66a   : > { %v6366_v20 = vpack.c.bf16 %v6044_v56, %v6044_v56 }
 0x66c   : > { %8564 = vmatpush3.bf16.msra.mxu1 %v9261_v39  ;;  %v9297_v39 = vld [vmem:[%s11884_s7 + $0x38] sm:$0xff]  }
 0x66d   : > { %8565 = vmatprep.subr.bf16.mxu1 %v12117_v35  ;;  %8652 = vmatpush3.bf16.msra.mxu0 %v9297_v39 }
 0x670   : > { %8566 = vmatpush3.bf16.msra.mxu1 %v9262_v51 }
 0x671   : > { %8567 = vmatprep.subr.bf16.mxu1 %v12117_v35 }
 0x674   : > { %8568 = vmatpush3.bf16.msra.mxu1 %v9263_v57 }
 0x675   : > { %8569 = vmatprep.subr.bf16.mxu1 %v12117_v35 }
 0x678   : > { %8570 = vmatpush3.bf16.msra.mxu1 %v9264_v49  ;;  %v7370_v49 = vld [vmem:[%s11885_s8] ss:$0 sm:$0xff] }
 0x679   : > { %8571 = vmatprep.subr.bf16.mxu1 %v12117_v35 }
 0x67c   : > { %8572 = vmatpush3.bf16.msra.mxu1 %v9265_v60 }
 0x67d   : > { %8577 = vmatprep.subr.bf16.mxu1 %v12117_v35 }
 0x67f   : > { %8574 = vmatmul.mubr.bf16.vlgmr.msra.gmra.mrb[8].mxu1 %v6045_v6 }
 0x680   : > { %8578 = vmatpush3.bf16.msra.mxu1 %v9266_v53  ;;  %8593 = vmatprep.mubr.msk.bf16.mxu1 %vm9310_vm11, %v12117_v35 }
 0x681   : > { %8579 = vmatprep.subr.bf16.mxu1 %v12117_v35 }
 0x684   : > { %8580 = vmatpush3.bf16.msra.mxu1 %v9267_v19 }
 0x685   : > { %8581 = vmatprep.subr.bf16.mxu1 %v12117_v35 }
 0x688   : > { %8582 = vmatpush3.bf16.msra.mxu1 %v9268_v5 }
 0x689   : > { %8583 = vmatprep.subr.bf16.mxu1 %v12117_v35 }
 0x68c   : > { %8584 = vmatpush3.bf16.msra.mxu1 %v9269_v42 }
 0x68d   : > { %8585 = vmatprep.subr.bf16.mxu1 %v12117_v35 }
 0x690   : > { %8586 = vmatpush3.bf16.msra.mxu1 %v9270_v9 }
 0x691   : > { %8587 = vmatprep.subr.bf16.mxu1 %v12117_v35 }
 0x694   : > { %8588 = vmatpush3.bf16.msra.mxu1 %v9271_v29 }
 0x695   : > { %8589 = vmatprep.subr.bf16.mxu1 %v12117_v35 }
 0x698   : > { %8590 = vmatpush3.bf16.msra.mxu1 %v9272_v54 }
 0x699   : > { %8591 = vmatprep.subr.bf16.mxu1 %v12117_v35 }
 0x69c   : > { %8592 = vmatpush3.bf16.msra.mxu1 %v9273_v61 }
 0x69d   : > { %8597 = vmatprep.subr.bf16.mxu1 %v12117_v35 }
 0x69f   : > { %8594 = vmatmul.mubr.bf16.vlgmr.msra.gmra.mrb[8].mxu1 %v6152_v13 }
 0x6a0   : > { %8598 = vmatpush3.bf16.msra.mxu1 %v9274_v41  ;;  %8613 = vmatprep.mubr.msk.bf16.mxu1 %vm9310_vm11, %v12117_v35 }
 0x6a1   : > { %8599 = vmatprep.subr.bf16.mxu1 %v12117_v35 }
 0x6a4   : > { %8600 = vmatpush3.bf16.msra.mxu1 %v9275_v40 }
 0x6a5   : > { %8601 = vmatprep.subr.bf16.mxu1 %v12117_v35 }
 0x6a8   : > { %8602 = vmatpush3.bf16.msra.mxu1 %v9276_v3 }
 0x6a9   : > { %8603 = vmatprep.subr.bf16.mxu1 %v12117_v35 }
 0x6ac   : > { %8604 = vmatpush3.bf16.msra.mxu1 %v9277_v52 }
 0x6ad   : > { %8605 = vmatprep.subr.bf16.mxu1 %v12117_v35 }
 0x6b0   : > { %8606 = vmatpush3.bf16.msra.mxu1 %v9278_v22 }
 0x6b1   : > { %8607 = vmatprep.subr.bf16.mxu1 %v12117_v35 }
 0x6b4   : > { %8608 = vmatpush3.bf16.msra.mxu1 %v9279_v50 }
 0x6b5   : > { %8609 = vmatprep.subr.bf16.mxu1 %v12117_v35 }
 0x6b8   : > { %8610 = vmatpush3.bf16.msra.mxu1 %v9280_v38 }
 0x6b9   : > { %8611 = vmatprep.subr.bf16.mxu1 %v12117_v35 }
 0x6bc   : > { %8612 = vmatpush3.bf16.msra.mxu1 %v9281_v36 }
 0x6bd   : > { %8617 = vmatprep.subr.bf16.mxu1 %v12117_v35 }
 0x6bf   : > { %8614 = vmatmul.mubr.bf16.vlgmr.msra.gmra.mrb[8].mxu1 %v6259_v59 }
 0x6c0   : > { %8618 = vmatpush3.bf16.msra.mxu1 %v9282_v0  ;;  %8633 = vmatprep.mubr.msk.bf16.mxu1 %vm9310_vm11, %v12117_v35 }
 0x6c1   : > { %8619 = vmatprep.subr.bf16.mxu1 %v12117_v35 }
 0x6c4   : > { %8620 = vmatpush3.bf16.msra.mxu1 %v9283_v18 }
 0x6c5   : > { %8621 = vmatprep.subr.bf16.mxu1 %v12117_v35 }
 0x6c8   : > { %8622 = vmatpush3.bf16.msra.mxu1 %v9284_v47 }
 0x6c9   : > { %8623 = vmatprep.subr.bf16.mxu1 %v12117_v35 }
 0x6cc   : > { %8624 = vmatpush3.bf16.msra.mxu1 %v9285_v58 }
 0x6cd   : > { %8625 = vmatprep.subr.bf16.mxu1 %v12117_v35 }
 0x6d0   : > { %8626 = vmatpush3.bf16.msra.mxu1 %v9286_v55 }
 0x6d1   : > { %8627 = vmatprep.subr.bf16.mxu1 %v12117_v35 }
 0x6d4   : > { %8628 = vmatpush3.bf16.msra.mxu1 %v9287_v26 }
 0x6d5   : > { %8629 = vmatprep.subr.bf16.mxu1 %v12117_v35 }
 0x6d8   : > { %8630 = vmatpush3.bf16.msra.mxu1 %v9288_v2 }
 0x6d9   : > { %8631 = vmatprep.subr.bf16.mxu1 %v12117_v35 }
 0x6dc   : > { %8632 = vmatpush3.bf16.msra.mxu1 %v9289_v15 }
 0x6df   : > { %8634 = vmatmul.mubr.bf16.vlgmr.msra.gmra.mrb[8].mxu1 %v6366_v20 }
 0x7b2   : > { %v6466_v33 = vpop.f32.mrb[8].mxu1 }
 0x7b3   : > { %v8705_v51 = vadd.f32 %v7001_v37, %v6466_v33  ;;  %v8635_v28 = vpop.f32.mrb[9].mxu1 }
 0x7b4   : > { %v6469_v46 = vpop.f32.mrb[10].mxu1 }
 0x7b5   : > { %v6473_v57 = vmax.f32 %v8705_v51, 0.0  ;;  %v8636_v48 = vpop.f32.mrb[11].mxu1 }
 0x7b7   : > { %v6474_v31 = vpack.c.bf16 %v6473_v57, %v6473_v57 }
 0x7b9   : > { %8654 = vmatmul.mubr.bf16.vlgmr.msra.gmra.mrb[40].mxu0 %v6474_v31 }
 0x88c   : > { %v6580_v35 = vpop.f32.mrb[40].mxu0 }
 0x88d   : > { %v6581_v45 = vadd.f32 %v7370_v49, %v6580_v35  ;;  %v8655_v60 = vpop.f32.mrb[41].mxu0 }
 0x88e   : > { %v6583_v34 = vpop.f32.mrb[42].mxu0 }
 0x88f   : > { %6586 = vst [vmem:[%s330_s27] sm:$0xff] %v6581_v45  ;;  %v8656_v53 = vpop.f32.mrb[43].mxu0 }
 0x890 PF: > { %s19_s30 = sadd.s32 1, %s9306_s30  }
 0x891   : > { %p16_p4 = scmp.ge.s32.totalorder %s19_s30, 4  }
 0x893   :  { %18 = sbr.rel (!%p16_p4) target bundleno = 1 (0x1), region = 117 }

</bundles_post_ra>
